<compile_context>
chip_gen: v7x
topology: tpu7x:2x2x1
jax: 0.10.0
libtpu: 0.0.40
codegen_flags: <defaults>
</compile_context>

<pallas_src>
import jax
import jax.numpy as jnp
from jax import lax
from jax.experimental import pallas as pl
from jax.experimental.pallas import tpu as pltpu

# ---------------- fixed geometry implied by the module (fc sizing needs 1x28x28) -------------
H0 = W0 = 28
C0, C1, C2, C3 = 1, 16, 32, 32
K1, K2, K3 = 5, 4, 3
PAD = 1
LANES = 128
B = 8                                       # images per grid step (batch tile)

HP1, WP1 = H0 + 2 * PAD, W0 + 2 * PAD       # 30, 30   padded input grid (stage 1)
HO1, WO1 = HP1 - K1 + 1, WP1 - K1 + 1       # 26, 26
HH1, WH1 = HO1 // 2, WO1 // 2               # 13, 13
HP2, WP2 = HH1 + 2 * PAD, WH1 + 2 * PAD     # 15, 15
HO2, WO2 = HP2 - K2 + 1, WP2 - K2 + 1       # 12, 12
HH2, WH2 = HO2 // 2, WO2 // 2               # 6, 6
HP3, WP3 = HH2 + 2 * PAD, WH2 + 2 * PAD     # 8, 8
HO3, WO3 = HP3 - K3 + 1, WP3 - K3 + 1       # 6, 6
HH3, WH3 = HO3 // 2, WO3 // 2               # 3, 3

R1 = HO1 * WP1            # 780 conv1 rows per image (full padded width; cols >= 26 are garbage)
R1P = 784                 # padded to a multiple of 8 so per-image blocks stay sublane aligned
R2 = HO2 * WP2            # 180 conv2 output rows per image (cols >= 12 garbage, never pooled)
R3 = HO3 * WP3            # 48  conv3 output rows per image (cols >= 6 garbage, never pooled)
A2R = 232                 # pooled-1 padded grid rows per image: 15*15=225 grid + shift slack
A3R = 72                  # pooled-2 padded grid rows per image: 8*8=64 grid + shift slack
Y2R = 184                 # conv2 output scratch rows (>= R2, multiple of 8)
FSTRIDE = 16              # per-image row stride inside the pooled-3 feature scratch
NFEAT = HH3 * WH3         # 9 spatial positions -> 9 * 32 = 288 fc input features
CONV2_CHUNKS = ((0, 96), (96, R2 - 96))   # row chunks for register-accumulated conv2


# ---------------------------------- Pallas kernel ---------------------------------------------

def _pool_bias_relu(y_ref, wp_in, hh, wh, bias, out_ref, out_row0, wp_out, pad_out):
    """2x2 / stride-2 max-pool of raw conv output in y_ref (row q = oh*wp_in + ow), then +bias,
    ReLU (exact: max/ReLU commute and the bias is pool-tap invariant), scattering the pooled
    rows into out_ref's zero-padded wp_out-wide flattened grid starting at row out_row0."""
    for ph in range(hh):
        m = None
        for dy in range(2):
            for dx in range(2):
                v = y_ref[pl.ds((2 * ph + dy) * wp_in + dx, wh, stride=2), :]
                m = v if m is None else jnp.maximum(m, v)
        out_ref[pl.ds(out_row0 + (ph + pad_out) * wp_out + pad_out, wh), :] = (
            jnp.maximum(m + bias, 0.0))


def _shifted_conv_chunk(a_ref, row0, n_rows, wp_in, k, cin, w_ref):
    """One row-chunk of a conv over the zero-padded row-flattened grid in a_ref, computed as
    K*K shifted-row matmuls accumulated in registers (chunk kept small to avoid vreg spills)."""
    acc = None
    for kh in range(k):
        for kw in range(k):
            v = a_ref[pl.ds(row0 + kh * wp_in + kw, n_rows), :]
            part = jnp.dot(v[:, :cin], w_ref[kh * k + kw],
                           preferred_element_type=jnp.float32)
            acc = part if acc is None else acc + part
    return acc


def _fused_cnn_kernel(p1_ref, w1_ref, b1_ref, w2_ref, b2_ref, w3_ref, b3_ref,
                      wfc_ref, bfc_ref, o_ref,
                      y1_ref, a2_ref, y2_ref, a3_ref, y3_ref, f_ref):
    # Zero the padded activation grids once per grid step: the zero borders are the conv
    # zero-padding; the interiors are fully overwritten for every image in the loop below.
    a2_ref[...] = jnp.zeros_like(a2_ref)
    a3_ref[...] = jnp.zeros_like(a3_ref)

    b1 = b1_ref[...]
    b2 = b2_ref[...]
    b3 = b3_ref[...]

    def per_image(b, carry):
        pbase = pl.multiple_of(b * R1P, 8)
        fbase = pl.multiple_of(b * FSTRIDE, 8)

        # ---- stage 1: conv1 as one im2col matmul for this image, then pool+bias+relu -> a2
        y1_ref[...] = jnp.dot(p1_ref[pl.ds(pbase, R1P), :], w1_ref[...],
                              preferred_element_type=jnp.float32)
        _pool_bias_relu(y1_ref, WP1, HH1, WH1, b1, a2_ref, 0, WP2, PAD)

        # ---- stage 2: conv2 as 16 shifted-row taps, row-chunked register accumulation
        for c0, clen in CONV2_CHUNKS:
            y2_ref[pl.ds(c0, clen), :] = _shifted_conv_chunk(
                a2_ref, c0, clen, WP2, K2, C1, w2_ref)
        _pool_bias_relu(y2_ref, WP2, HH2, WH2, b2, a3_ref, 0, WP3, PAD)

        # ---- stage 3: conv3 (single 48-row chunk), pool+bias+relu into the fc feature scratch
        y3_ref[...] = _shifted_conv_chunk(a3_ref, 0, R3, WP3, K3, C2, w3_ref)
        _pool_bias_relu(y3_ref, WP3, HH3, WH3, b3, f_ref, fbase, WH3, 0)
        return carry

    lax.fori_loop(0, B, per_image, 0)

    # ---- fc_1, batched over the whole tile (M = B).  For each of the 9 pooled positions r,
    # gather that row from every image (stride FSTRIDE) and matmul against the pre-permuted
    # fc weight slab (PyTorch NCHW flatten order baked in).  3 parallel accumulators break the
    # dependency chain.
    accs = [None, None, None]
    for r in range(NFEAT):
        v = f_ref[pl.ds(r, B, stride=FSTRIDE), :]
        part = jnp.dot(v[:, :C3], wfc_ref[r], preferred_element_type=jnp.float32)
        prev = accs[r % 3]
        accs[r % 3] = part if prev is None else prev + part
    out = accs[0] + accs[1] + accs[2] + bfc_ref[...]
    o_ref[...] = out.astype(o_ref.dtype)


# ---------------------------------- wrappers / glue --------------------------------------------

def _prepare_params(params):
    """PyTorch-convention params -> kernel layout (lane-padded to 128 output channels)."""
    n_classes = params["wfc"].shape[0]

    w1 = params["w1"].reshape(C1, K1 * K1).T                               # (25, 16)
    w1p = jnp.pad(w1, ((0, 0), (0, LANES - C1)))
    b1p = jnp.pad(params["b1"].reshape(1, C1), ((0, 0), (0, LANES - C1)))

    w2 = jnp.transpose(params["w2"], (2, 3, 1, 0)).reshape(K2 * K2, C1, C2)
    w2p = jnp.pad(w2, ((0, 0), (0, 0), (0, LANES - C2)))                   # (16, 16, 128)
    b2p = jnp.pad(params["b2"].reshape(1, C2), ((0, 0), (0, LANES - C2)))

    w3 = jnp.transpose(params["w3"], (2, 3, 1, 0)).reshape(K3 * K3, C2, C3)
    w3p = jnp.pad(w3, ((0, 0), (0, 0), (0, LANES - C3)))                   # (9, 32, 128)
    b3p = jnp.pad(params["b3"].reshape(1, C3), ((0, 0), (0, LANES - C3)))

    # wfc[o, c*9 + r] -> wfcp[r, c, o]   (bakes in the PyTorch NCHW flatten order)
    wfc = jnp.transpose(params["wfc"].reshape(n_classes, C3, NFEAT), (2, 1, 0))
    wfcp = jnp.pad(wfc, ((0, 0), (0, 0), (0, LANES - n_classes)))          # (9, 32, 128)
    bfcp = jnp.pad(params["bfc"].reshape(1, n_classes),
                   ((0, 0), (0, LANES - n_classes)))
    return (w1p, b1p, w2p, b2p, w3p, b3p, wfcp, bfcp), n_classes


def cnn_forward(x_nchw, params):
    N = x_nchw.shape[0]
    assert x_nchw.shape[1:] == (C0, H0, W0), "module's fc sizing implies 1x28x28 input"
    (w1p, b1p, w2p, b2p, w3p, b3p, wfcp, bfcp), n_classes = _prepare_params(params)

    # Pad the batch to a multiple of the tile size B (dummy images are discarded at the end).
    n_pad = ((N + B - 1) // B) * B
    x = x_nchw.reshape(N, H0, W0).astype(jnp.float32)
    if n_pad != N:
        x = jnp.pad(x, ((0, n_pad - N), (0, 0), (0, 0)))

    # Stage-1 im2col (Cin=1): 25 shifted copies of the zero-padded image in full-padded-width
    # layout; conv-row columns >= 26 are garbage that the kernel never pools.
    xp = jnp.pad(x, ((0, 0), (PAD, PAD), (PAD, PAD + K1 - 1)))             # (n_pad, 30, 34)
    cols = [xp[:, kh:kh + HO1, kw:kw + WP1]
            for kh in range(K1) for kw in range(K1)]
    p1 = jnp.stack(cols, axis=-1).reshape(n_pad, R1, K1 * K1)              # (n_pad, 780, 25)
    p1 = jnp.pad(p1, ((0, 0), (0, R1P - R1), (0, 0))).reshape(n_pad * R1P, K1 * K1)

    flops = n_pad * (2 * HO1 * WO1 * C1 * K1 * K1
                     + 2 * HO2 * WO2 * C2 * K2 * K2 * C1
                     + 2 * HO3 * WO3 * C3 * K3 * K3 * C2
                     + 2 * NFEAT * C3 * n_classes)
    weight_bytes = 4 * (w1p.size + b1p.size + w2p.size + b2p.size
                        + w3p.size + b3p.size + wfcp.size + bfcp.size)
    bytes_accessed = p1.size * 4 + weight_bytes + n_pad * LANES * 4

    out = pl.pallas_call(
        _fused_cnn_kernel,
        out_shape=jax.ShapeDtypeStruct((n_pad, LANES), jnp.float32),
        grid=(n_pad // B,),
        in_specs=[
            pl.BlockSpec((B * R1P, K1 * K1), lambda i: (i, 0)),            # p1 (batch tile)
            pl.BlockSpec((K1 * K1, LANES), lambda i: (0, 0)),              # w1
            pl.BlockSpec((1, LANES), lambda i: (0, 0)),                    # b1
            pl.BlockSpec((K2 * K2, C1, LANES), lambda i: (0, 0, 0)),       # w2
            pl.BlockSpec((1, LANES), lambda i: (0, 0)),                    # b2
            pl.BlockSpec((K3 * K3, C2, LANES), lambda i: (0, 0, 0)),       # w3
            pl.BlockSpec((1, LANES), lambda i: (0, 0)),                    # b3
            pl.BlockSpec((NFEAT, C3, LANES), lambda i: (0, 0, 0)),         # wfc
            pl.BlockSpec((1, LANES), lambda i: (0, 0)),                    # bfc
        ],
        out_specs=pl.BlockSpec((B, LANES), lambda i: (i, 0)),              # lane-dense output
        scratch_shapes=[
            pltpu.VMEM((R1P, LANES), jnp.float32),   # y1: conv1 output (per image)
            pltpu.VMEM((A2R, LANES), jnp.float32),   # a2: zero-padded pooled-1 grid
            pltpu.VMEM((Y2R, LANES), jnp.float32),   # y2: conv2 output
            pltpu.VMEM((A3R, LANES), jnp.float32),   # a3: zero-padded pooled-2 grid
            pltpu.VMEM((R3, LANES), jnp.float32),    # y3: conv3 output
            pltpu.VMEM((B * FSTRIDE, LANES), jnp.float32),  # f: pooled-3 features, all images
        ],
        compiler_params=pltpu.CompilerParams(
            dimension_semantics=("parallel",),
            vmem_limit_bytes=32 * 1024 * 1024),
        cost_estimate=pl.CostEstimate(flops=int(flops), transcendentals=0,
                                      bytes_accessed=int(bytes_accessed)),
    )(p1, w1p, b1p, w2p, b2p, w3p, b3p, wfcp, bfcp)
    return out[:N, :n_classes]


# ---------------------- pure-JAX reference (for checking) --------------------

def torch_ref_forward(x_nchw, params):
    def conv(x, w, b, pad):
        y = lax.conv_general_dilated(
            x, w, (1, 1), [(pad, pad), (pad, pad)],
            dimension_numbers=("NCHW", "OIHW", "NCHW"))
        return jax.nn.relu(y + b.reshape(1, -1, 1, 1))

    def pool(x):
        return lax.reduce_window(x, -jnp.inf, lax.max,
                                 (1, 1, 2, 2), (1, 1, 2, 2), "VALID")

    x = pool(conv(x_nchw, params["w1"], params["b1"], 1))
    x = pool(conv(x, params["w2"], params["b2"], 1))
    x = pool(conv(x, params["w3"], params["b3"], 1))
    x = x.reshape(x.shape[0], -1)
    return x @ params["wfc"].T + params["bfc"]


# ----------------------------------- main ------------------------------------

if __name__ == "__main__":
    # MNIST-sized input (the module's fc sizing only works out for 28x28):
    # 28 -conv5,p1-> 26 -pool-> 13 -conv4,p1-> 12 -pool-> 6 -conv3,p1-> 6 -pool-> 3
    # => fc input features = 3*3*32 = 288
    H = W = 28
    n_classes = 10
    batch = 10     # exercises both the batch-tile padding and a multi-step grid

    key = jax.random.PRNGKey(0)
    ks = jax.random.split(key, 9)
    params = {
        "w1": 0.10 * jax.random.normal(ks[0], (16, 1, 5, 5), jnp.float32),
        "b1": 0.10 * jax.random.normal(ks[1], (16,), jnp.float32),
        "w2": 0.05 * jax.random.normal(ks[2], (32, 16, 4, 4), jnp.float32),
        "b2": 0.10 * jax.random.normal(ks[3], (32,), jnp.float32),
        "w3": 0.05 * jax.random.normal(ks[4], (32, 32, 3, 3), jnp.float32),
        "b3": 0.10 * jax.random.normal(ks[5], (32,), jnp.float32),
        "wfc": 0.05 * jax.random.normal(ks[6], (n_classes, 3 * 3 * 32), jnp.float32),
        "bfc": 0.10 * jax.random.normal(ks[7], (n_classes,), jnp.float32),
    }
    x = jax.random.normal(ks[8], (batch, 1, H, W), jnp.float32)

    out = jax.block_until_ready(jax.jit(cnn_forward)(x, params))
    ref = jax.block_until_ready(torch_ref_forward(x, params))

    assert out.shape == (batch, n_classes)
    assert jnp.allclose(out, ref, rtol=1e-3, atol=1e-3)
    print("KERNEL_OK")
</pallas_src>

<mosaic_0001>
module attributes {stable_mosaic.version = 11 : i64} {
  func.func @_fused_cnn_kernel(%arg0: i32, %arg1: memref<6272x25xf32, #tpu.memory_space<vmem>>, %arg2: memref<25x128xf32, #tpu.memory_space<vmem>>, %arg3: memref<1x128xf32, #tpu.memory_space<vmem>>, %arg4: memref<16x16x128xf32, #tpu.memory_space<vmem>>, %arg5: memref<1x128xf32, #tpu.memory_space<vmem>>, %arg6: memref<9x32x128xf32, #tpu.memory_space<vmem>>, %arg7: memref<1x128xf32, #tpu.memory_space<vmem>>, %arg8: memref<9x32x128xf32, #tpu.memory_space<vmem>>, %arg9: memref<1x128xf32, #tpu.memory_space<vmem>>, %arg10: memref<8x128xf32, #tpu.memory_space<vmem>>, %arg11: memref<784x128xf32, #tpu.memory_space<vmem>>, %arg12: memref<232x128xf32, #tpu.memory_space<vmem>>, %arg13: memref<184x128xf32, #tpu.memory_space<vmem>>, %arg14: memref<72x128xf32, #tpu.memory_space<vmem>>, %arg15: memref<48x128xf32, #tpu.memory_space<vmem>>, %arg16: memref<128x128xf32, #tpu.memory_space<vmem>>) attributes {dimension_semantics = [#tpu.dimension_semantics<parallel>], iteration_bounds = array<i64: 2>, scalar_prefetch = 0 : i64, scratch_operands = 6 : i64, tpu.core_type = #tpu.core_type<tc>, window_params = [{transform_indices = @transform_0, window_bounds = array<i64: 6272, 25>}, {pipeline_mode = #tpu.pipeline_mode<synchronous>, transform_indices = @transform_1, window_bounds = array<i64: 25, 128>}, {pipeline_mode = #tpu.pipeline_mode<synchronous>, transform_indices = @transform_2, window_bounds = array<i64: 1, 128>}, {pipeline_mode = #tpu.pipeline_mode<synchronous>, transform_indices = @transform_3, window_bounds = array<i64: 16, 16, 128>}, {pipeline_mode = #tpu.pipeline_mode<synchronous>, transform_indices = @transform_4, window_bounds = array<i64: 1, 128>}, {pipeline_mode = #tpu.pipeline_mode<synchronous>, transform_indices = @transform_5, window_bounds = array<i64: 9, 32, 128>}, {pipeline_mode = #tpu.pipeline_mode<synchronous>, transform_indices = @transform_6, window_bounds = array<i64: 1, 128>}, {pipeline_mode = #tpu.pipeline_mode<synchronous>, transform_indices = @transform_7, window_bounds = array<i64: 9, 32, 128>}, {pipeline_mode = #tpu.pipeline_mode<synchronous>, transform_indices = @transform_8, window_bounds = array<i64: 1, 128>}, {transform_indices = @transform_9, window_bounds = array<i64: 8, 128>}]} {
    %cst = arith.constant 0.000000e+00 : f32
    %0 = vector.broadcast %cst : f32 to vector<232x128xf32>
    %c0 = arith.constant 0 : index
    %c0_0 = arith.constant 0 : index
    %1 = vector.load %arg12[%c0, %c0_0] : memref<232x128xf32, #tpu.memory_space<vmem>>, vector<232x128xf32>
    tpu.vector_store %arg12[%c0, %c0_0], %0 {strides = array<i32>} : memref<232x128xf32, #tpu.memory_space<vmem>>, vector<232x128xf32>,
    %cst_1 = arith.constant 0.000000e+00 : f32
    %2 = vector.broadcast %cst_1 : f32 to vector<72x128xf32>
    %c0_2 = arith.constant 0 : index
    %c0_3 = arith.constant 0 : index
    %3 = vector.load %arg14[%c0_2, %c0_3] : memref<72x128xf32, #tpu.memory_space<vmem>>, vector<72x128xf32>
    tpu.vector_store %arg14[%c0_2, %c0_3], %2 {strides = array<i32>} : memref<72x128xf32, #tpu.memory_space<vmem>>, vector<72x128xf32>,
    %c0_4 = arith.constant 0 : index
    %c0_5 = arith.constant 0 : index
    %4 = vector.load %arg3[%c0_4, %c0_5] : memref<1x128xf32, #tpu.memory_space<vmem>>, vector<1x128xf32>
    %c0_6 = arith.constant 0 : index
    %c0_7 = arith.constant 0 : index
    %5 = vector.load %arg5[%c0_6, %c0_7] : memref<1x128xf32, #tpu.memory_space<vmem>>, vector<1x128xf32>
    %c0_8 = arith.constant 0 : index
    %c0_9 = arith.constant 0 : index
    %6 = vector.load %arg7[%c0_8, %c0_9] : memref<1x128xf32, #tpu.memory_space<vmem>>, vector<1x128xf32>
    %c0_i32 = arith.constant 0 : i32
    %c8_i32 = arith.constant 8 : i32
    %7 = arith.addi %c0_i32, %c8_i32 : i32
    %c1_i32 = arith.constant 1 : i32
    scf.for %arg17 = %c0_i32 to %7 step %c1_i32  : i32 {
      %c784_i32 = arith.constant 784 : i32
      %65 = arith.muli %arg17, %c784_i32 : i32
      %66 = tpu.assume_multiple %65, 8 : i32
      %c16_i32 = arith.constant 16 : i32
      %67 = arith.muli %arg17, %c16_i32 : i32
      %68 = tpu.assume_multiple %67, 8 : i32
      %69 = arith.index_cast %66 : i32 to index
      %c0_61 = arith.constant 0 : index
      %70 = vector.load %arg1[%69, %c0_61] : memref<6272x25xf32, #tpu.memory_space<vmem>>, vector<784x25xf32>
      %c0_62 = arith.constant 0 : index
      %c0_63 = arith.constant 0 : index
      %71 = vector.load %arg2[%c0_62, %c0_63] : memref<25x128xf32, #tpu.memory_space<vmem>>, vector<25x128xf32>
      %cst_64 = arith.constant dense<0.000000e+00> : vector<784x128xf32>
      %72 = tpu.matmul %70, %71, %cst_64 {dimension_numbers = #tpu.dot_dimension_numbers<[1], [0], [0], [1], [0, 0, 1, 1], [], []>} : vector<784x25xf32>, vector<25x128xf32>, vector<784x128xf32> -> vector<784x128xf32>
      %c0_65 = arith.constant 0 : index
      %c0_66 = arith.constant 0 : index
      %73 = vector.load %arg11[%c0_65, %c0_66] : memref<784x128xf32, #tpu.memory_space<vmem>>, vector<784x128xf32>
      tpu.vector_store %arg11[%c0_65, %c0_66], %72 {strides = array<i32>} : memref<784x128xf32, #tpu.memory_space<vmem>>, vector<784x128xf32>,
      %c0_67 = arith.constant 0 : index
      %c0_68 = arith.constant 0 : index
      %74 = tpu.strided_load %arg11[%c0_67, %c0_68] {strides = array<i32: 2, 1>} : memref<784x128xf32, #tpu.memory_space<vmem>>, vector<13x128xf32>
      %c1_69 = arith.constant 1 : index
      %c0_70 = arith.constant 0 : index
      %75 = tpu.strided_load %arg11[%c1_69, %c0_70] {strides = array<i32: 2, 1>} : memref<784x128xf32, #tpu.memory_space<vmem>>, vector<13x128xf32>
      %76 = arith.maximumf %74, %75 : vector<13x128xf32>
      %c30 = arith.constant 30 : index
      %c0_71 = arith.constant 0 : index
      %77 = tpu.strided_load %arg11[%c30, %c0_71] {strides = array<i32: 2, 1>} : memref<784x128xf32, #tpu.memory_space<vmem>>, vector<13x128xf32>
      %78 = arith.maximumf %76, %77 : vector<13x128xf32>
      %c31 = arith.constant 31 : index
      %c0_72 = arith.constant 0 : index
      %79 = tpu.strided_load %arg11[%c31, %c0_72] {strides = array<i32: 2, 1>} : memref<784x128xf32, #tpu.memory_space<vmem>>, vector<13x128xf32>
      %80 = arith.maximumf %78, %79 : vector<13x128xf32>
      %81 = vector.broadcast %4 : vector<1x128xf32> to vector<13x128xf32>
      %82 = arith.addf %80, %81 : vector<13x128xf32>
      %cst_73 = arith.constant 0.000000e+00 : f32
      %83 = vector.broadcast %cst_73 : f32 to vector<13x128xf32>
      %84 = arith.maximumf %82, %83 : vector<13x128xf32>
      %c16 = arith.constant 16 : index
      %c0_74 = arith.constant 0 : index
      %85 = vector.load %arg12[%c16, %c0_74] : memref<232x128xf32, #tpu.memory_space<vmem>>, vector<13x128xf32>
      tpu.vector_store %arg12[%c16, %c0_74], %84 {strides = array<i32>} : memref<232x128xf32, #tpu.memory_space<vmem>>, vector<13x128xf32>,
      %c60 = arith.constant 60 : index
      %c0_75 = arith.constant 0 : index
      %86 = tpu.strided_load %arg11[%c60, %c0_75] {strides = array<i32: 2, 1>} : memref<784x128xf32, #tpu.memory_space<vmem>>, vector<13x128xf32>
      %c61 = arith.constant 61 : index
      %c0_76 = arith.constant 0 : index
      %87 = tpu.strided_load %arg11[%c61, %c0_76] {strides = array<i32: 2, 1>} : memref<784x128xf32, #tpu.memory_space<vmem>>, vector<13x128xf32>
      %88 = arith.maximumf %86, %87 : vector<13x128xf32>
      %c90 = arith.constant 90 : index
      %c0_77 = arith.constant 0 : index
      %89 = tpu.strided_load %arg11[%c90, %c0_77] {strides = array<i32: 2, 1>} : memref<784x128xf32, #tpu.memory_space<vmem>>, vector<13x128xf32>
      %90 = arith.maximumf %88, %89 : vector<13x128xf32>
      %c91 = arith.constant 91 : index
      %c0_78 = arith.constant 0 : index
      %91 = tpu.strided_load %arg11[%c91, %c0_78] {strides = array<i32: 2, 1>} : memref<784x128xf32, #tpu.memory_space<vmem>>, vector<13x128xf32>
      %92 = arith.maximumf %90, %91 : vector<13x128xf32>
      %93 = vector.broadcast %4 : vector<1x128xf32> to vector<13x128xf32>
      %94 = arith.addf %92, %93 : vector<13x128xf32>
      %cst_79 = arith.constant 0.000000e+00 : f32
      %95 = vector.broadcast %cst_79 : f32 to vector<13x128xf32>
      %96 = arith.maximumf %94, %95 : vector<13x128xf32>
      %c31_80 = arith.constant 31 : index
      %c0_81 = arith.constant 0 : index
      %97 = vector.load %arg12[%c31_80, %c0_81] : memref<232x128xf32, #tpu.memory_space<vmem>>, vector<13x128xf32>
      tpu.vector_store %arg12[%c31_80, %c0_81], %96 {strides = array<i32>} : memref<232x128xf32, #tpu.memory_space<vmem>>, vector<13x128xf32>,
      %c120 = arith.constant 120 : index
      %c0_82 = arith.constant 0 : index
      %98 = tpu.strided_load %arg11[%c120, %c0_82] {strides = array<i32: 2, 1>} : memref<784x128xf32, #tpu.memory_space<vmem>>, vector<13x128xf32>
      %c121 = arith.constant 121 : index
      %c0_83 = arith.constant 0 : index
      %99 = tpu.strided_load %arg11[%c121, %c0_83] {strides = array<i32: 2, 1>} : memref<784x128xf32, #tpu.memory_space<vmem>>, vector<13x128xf32>
      %100 = arith.maximumf %98, %99 : vector<13x128xf32>
      %c150 = arith.constant 150 : index
      %c0_84 = arith.constant 0 : index
      %101 = tpu.strided_load %arg11[%c150, %c0_84] {strides = array<i32: 2, 1>} : memref<784x128xf32, #tpu.memory_space<vmem>>, vector<13x128xf32>
      %102 = arith.maximumf %100, %101 : vector<13x128xf32>
      %c151 = arith.constant 151 : index
      %c0_85 = arith.constant 0 : index
      %103 = tpu.strided_load %arg11[%c151, %c0_85] {strides = array<i32: 2, 1>} : memref<784x128xf32, #tpu.memory_space<vmem>>, vector<13x128xf32>
      %104 = arith.maximumf %102, %103 : vector<13x128xf32>
      %105 = vector.broadcast %4 : vector<1x128xf32> to vector<13x128xf32>
      %106 = arith.addf %104, %105 : vector<13x128xf32>
      %cst_86 = arith.constant 0.000000e+00 : f32
      %107 = vector.broadcast %cst_86 : f32 to vector<13x128xf32>
      %108 = arith.maximumf %106, %107 : vector<13x128xf32>
      %c46 = arith.constant 46 : index
      %c0_87 = arith.constant 0 : index
      %109 = vector.load %arg12[%c46, %c0_87] : memref<232x128xf32, #tpu.memory_space<vmem>>, vector<13x128xf32>
      tpu.vector_store %arg12[%c46, %c0_87], %108 {strides = array<i32>} : memref<232x128xf32, #tpu.memory_space<vmem>>, vector<13x128xf32>,
      %c180 = arith.constant 180 : index
      %c0_88 = arith.constant 0 : index
      %110 = tpu.strided_load %arg11[%c180, %c0_88] {strides = array<i32: 2, 1>} : memref<784x128xf32, #tpu.memory_space<vmem>>, vector<13x128xf32>
      %c181 = arith.constant 181 : index
      %c0_89 = arith.constant 0 : index
      %111 = tpu.strided_load %arg11[%c181, %c0_89] {strides = array<i32: 2, 1>} : memref<784x128xf32, #tpu.memory_space<vmem>>, vector<13x128xf32>
      %112 = arith.maximumf %110, %111 : vector<13x128xf32>
      %c210 = arith.constant 210 : index
      %c0_90 = arith.constant 0 : index
      %113 = tpu.strided_load %arg11[%c210, %c0_90] {strides = array<i32: 2, 1>} : memref<784x128xf32, #tpu.memory_space<vmem>>, vector<13x128xf32>
      %114 = arith.maximumf %112, %113 : vector<13x128xf32>
      %c211 = arith.constant 211 : index
      %c0_91 = arith.constant 0 : index
      %115 = tpu.strided_load %arg11[%c211, %c0_91] {strides = array<i32: 2, 1>} : memref<784x128xf32, #tpu.memory_space<vmem>>, vector<13x128xf32>
      %116 = arith.maximumf %114, %115 : vector<13x128xf32>
      %117 = vector.broadcast %4 : vector<1x128xf32> to vector<13x128xf32>
      %118 = arith.addf %116, %117 : vector<13x128xf32>
      %cst_92 = arith.constant 0.000000e+00 : f32
      %119 = vector.broadcast %cst_92 : f32 to vector<13x128xf32>
      %120 = arith.maximumf %118, %119 : vector<13x128xf32>
      %c61_93 = arith.constant 61 : index
      %c0_94 = arith.constant 0 : index
      %121 = vector.load %arg12[%c61_93, %c0_94] : memref<232x128xf32, #tpu.memory_space<vmem>>, vector<13x128xf32>
      tpu.vector_store %arg12[%c61_93, %c0_94], %120 {strides = array<i32>} : memref<232x128xf32, #tpu.memory_space<vmem>>, vector<13x128xf32>,
      %c240 = arith.constant 240 : index
      %c0_95 = arith.constant 0 : index
      %122 = tpu.strided_load %arg11[%c240, %c0_95] {strides = array<i32: 2, 1>} : memref<784x128xf32, #tpu.memory_space<vmem>>, vector<13x128xf32>
      %c241 = arith.constant 241 : index
      %c0_96 = arith.constant 0 : index
      %123 = tpu.strided_load %arg11[%c241, %c0_96] {strides = array<i32: 2, 1>} : memref<784x128xf32, #tpu.memory_space<vmem>>, vector<13x128xf32>
      %124 = arith.maximumf %122, %123 : vector<13x128xf32>
      %c270 = arith.constant 270 : index
      %c0_97 = arith.constant 0 : index
      %125 = tpu.strided_load %arg11[%c270, %c0_97] {strides = array<i32: 2, 1>} : memref<784x128xf32, #tpu.memory_space<vmem>>, vector<13x128xf32>
      %126 = arith.maximumf %124, %125 : vector<13x128xf32>
      %c271 = arith.constant 271 : index
      %c0_98 = arith.constant 0 : index
      %127 = tpu.strided_load %arg11[%c271, %c0_98] {strides = array<i32: 2, 1>} : memref<784x128xf32, #tpu.memory_space<vmem>>, vector<13x128xf32>
      %128 = arith.maximumf %126, %127 : vector<13x128xf32>
      %129 = vector.broadcast %4 : vector<1x128xf32> to vector<13x128xf32>
      %130 = arith.addf %128, %129 : vector<13x128xf32>
      %cst_99 = arith.constant 0.000000e+00 : f32
      %131 = vector.broadcast %cst_99 : f32 to vector<13x128xf32>
      %132 = arith.maximumf %130, %131 : vector<13x128xf32>
      %c76 = arith.constant 76 : index
      %c0_100 = arith.constant 0 : index
      %133 = vector.load %arg12[%c76, %c0_100] : memref<232x128xf32, #tpu.memory_space<vmem>>, vector<13x128xf32>
      tpu.vector_store %arg12[%c76, %c0_100], %132 {strides = array<i32>} : memref<232x128xf32, #tpu.memory_space<vmem>>, vector<13x128xf32>,
      %c300 = arith.constant 300 : index
      %c0_101 = arith.constant 0 : index
      %134 = tpu.strided_load %arg11[%c300, %c0_101] {strides = array<i32: 2, 1>} : memref<784x128xf32, #tpu.memory_space<vmem>>, vector<13x128xf32>
      %c301 = arith.constant 301 : index
      %c0_102 = arith.constant 0 : index
      %135 = tpu.strided_load %arg11[%c301, %c0_102] {strides = array<i32: 2, 1>} : memref<784x128xf32, #tpu.memory_space<vmem>>, vector<13x128xf32>
      %136 = arith.maximumf %134, %135 : vector<13x128xf32>
      %c330 = arith.constant 330 : index
      %c0_103 = arith.constant 0 : index
      %137 = tpu.strided_load %arg11[%c330, %c0_103] {strides = array<i32: 2, 1>} : memref<784x128xf32, #tpu.memory_space<vmem>>, vector<13x128xf32>
      %138 = arith.maximumf %136, %137 : vector<13x128xf32>
      %c331 = arith.constant 331 : index
      %c0_104 = arith.constant 0 : index
      %139 = tpu.strided_load %arg11[%c331, %c0_104] {strides = array<i32: 2, 1>} : memref<784x128xf32, #tpu.memory_space<vmem>>, vector<13x128xf32>
      %140 = arith.maximumf %138, %139 : vector<13x128xf32>
      %141 = vector.broadcast %4 : vector<1x128xf32> to vector<13x128xf32>
      %142 = arith.addf %140, %141 : vector<13x128xf32>
      %cst_105 = arith.constant 0.000000e+00 : f32
      %143 = vector.broadcast %cst_105 : f32 to vector<13x128xf32>
      %144 = arith.maximumf %142, %143 : vector<13x128xf32>
      %c91_106 = arith.constant 91 : index
      %c0_107 = arith.constant 0 : index
      %145 = vector.load %arg12[%c91_106, %c0_107] : memref<232x128xf32, #tpu.memory_space<vmem>>, vector<13x128xf32>
      tpu.vector_store %arg12[%c91_106, %c0_107], %144 {strides = array<i32>} : memref<232x128xf32, #tpu.memory_space<vmem>>, vector<13x128xf32>,
      %c360 = arith.constant 360 : index
      %c0_108 = arith.constant 0 : index
      %146 = tpu.strided_load %arg11[%c360, %c0_108] {strides = array<i32: 2, 1>} : memref<784x128xf32, #tpu.memory_space<vmem>>, vector<13x128xf32>
      %c361 = arith.constant 361 : index
      %c0_109 = arith.constant 0 : index
      %147 = tpu.strided_load %arg11[%c361, %c0_109] {strides = array<i32: 2, 1>} : memref<784x128xf32, #tpu.memory_space<vmem>>, vector<13x128xf32>
      %148 = arith.maximumf %146, %147 : vector<13x128xf32>
      %c390 = arith.constant 390 : index
      %c0_110 = arith.constant 0 : index
      %149 = tpu.strided_load %arg11[%c390, %c0_110] {strides = array<i32: 2, 1>} : memref<784x128xf32, #tpu.memory_space<vmem>>, vector<13x128xf32>
      %150 = arith.maximumf %148, %149 : vector<13x128xf32>
      %c391 = arith.constant 391 : index
      %c0_111 = arith.constant 0 : index
      %151 = tpu.strided_load %arg11[%c391, %c0_111] {strides = array<i32: 2, 1>} : memref<784x128xf32, #tpu.memory_space<vmem>>, vector<13x128xf32>
      %152 = arith.maximumf %150, %151 : vector<13x128xf32>
      %153 = vector.broadcast %4 : vector<1x128xf32> to vector<13x128xf32>
      %154 = arith.addf %152, %153 : vector<13x128xf32>
      %cst_112 = arith.constant 0.000000e+00 : f32
      %155 = vector.broadcast %cst_112 : f32 to vector<13x128xf32>
      %156 = arith.maximumf %154, %155 : vector<13x128xf32>
      %c106 = arith.constant 106 : index
      %c0_113 = arith.constant 0 : index
      %157 = vector.load %arg12[%c106, %c0_113] : memref<232x128xf32, #tpu.memory_space<vmem>>, vector<13x128xf32>
      tpu.vector_store %arg12[%c106, %c0_113], %156 {strides = array<i32>} : memref<232x128xf32, #tpu.memory_space<vmem>>, vector<13x128xf32>,
      %c420 = arith.constant 420 : index
      %c0_114 = arith.constant 0 : index
      %158 = tpu.strided_load %arg11[%c420, %c0_114] {strides = array<i32: 2, 1>} : memref<784x128xf32, #tpu.memory_space<vmem>>, vector<13x128xf32>
      %c421 = arith.constant 421 : index
      %c0_115 = arith.constant 0 : index
      %159 = tpu.strided_load %arg11[%c421, %c0_115] {strides = array<i32: 2, 1>} : memref<784x128xf32, #tpu.memory_space<vmem>>, vector<13x128xf32>
      %160 = arith.maximumf %158, %159 : vector<13x128xf32>
      %c450 = arith.constant 450 : index
      %c0_116 = arith.constant 0 : index
      %161 = tpu.strided_load %arg11[%c450, %c0_116] {strides = array<i32: 2, 1>} : memref<784x128xf32, #tpu.memory_space<vmem>>, vector<13x128xf32>
      %162 = arith.maximumf %160, %161 : vector<13x128xf32>
      %c451 = arith.constant 451 : index
      %c0_117 = arith.constant 0 : index
      %163 = tpu.strided_load %arg11[%c451, %c0_117] {strides = array<i32: 2, 1>} : memref<784x128xf32, #tpu.memory_space<vmem>>, vector<13x128xf32>
      %164 = arith.maximumf %162, %163 : vector<13x128xf32>
      %165 = vector.broadcast %4 : vector<1x128xf32> to vector<13x128xf32>
      %166 = arith.addf %164, %165 : vector<13x128xf32>
      %cst_118 = arith.constant 0.000000e+00 : f32
      %167 = vector.broadcast %cst_118 : f32 to vector<13x128xf32>
      %168 = arith.maximumf %166, %167 : vector<13x128xf32>
      %c121_119 = arith.constant 121 : index
      %c0_120 = arith.constant 0 : index
      %169 = vector.load %arg12[%c121_119, %c0_120] : memref<232x128xf32, #tpu.memory_space<vmem>>, vector<13x128xf32>
      tpu.vector_store %arg12[%c121_119, %c0_120], %168 {strides = array<i32>} : memref<232x128xf32, #tpu.memory_space<vmem>>, vector<13x128xf32>,
      %c480 = arith.constant 480 : index
      %c0_121 = arith.constant 0 : index
      %170 = tpu.strided_load %arg11[%c480, %c0_121] {strides = array<i32: 2, 1>} : memref<784x128xf32, #tpu.memory_space<vmem>>, vector<13x128xf32>
      %c481 = arith.constant 481 : index
      %c0_122 = arith.constant 0 : index
      %171 = tpu.strided_load %arg11[%c481, %c0_122] {strides = array<i32: 2, 1>} : memref<784x128xf32, #tpu.memory_space<vmem>>, vector<13x128xf32>
      %172 = arith.maximumf %170, %171 : vector<13x128xf32>
      %c510 = arith.constant 510 : index
      %c0_123 = arith.constant 0 : index
      %173 = tpu.strided_load %arg11[%c510, %c0_123] {strides = array<i32: 2, 1>} : memref<784x128xf32, #tpu.memory_space<vmem>>, vector<13x128xf32>
      %174 = arith.maximumf %172, %173 : vector<13x128xf32>
      %c511 = arith.constant 511 : index
      %c0_124 = arith.constant 0 : index
      %175 = tpu.strided_load %arg11[%c511, %c0_124] {strides = array<i32: 2, 1>} : memref<784x128xf32, #tpu.memory_space<vmem>>, vector<13x128xf32>
      %176 = arith.maximumf %174, %175 : vector<13x128xf32>
      %177 = vector.broadcast %4 : vector<1x128xf32> to vector<13x128xf32>
      %178 = arith.addf %176, %177 : vector<13x128xf32>
      %cst_125 = arith.constant 0.000000e+00 : f32
      %179 = vector.broadcast %cst_125 : f32 to vector<13x128xf32>
      %180 = arith.maximumf %178, %179 : vector<13x128xf32>
      %c136 = arith.constant 136 : index
      %c0_126 = arith.constant 0 : index
      %181 = vector.load %arg12[%c136, %c0_126] : memref<232x128xf32, #tpu.memory_space<vmem>>, vector<13x128xf32>
      tpu.vector_store %arg12[%c136, %c0_126], %180 {strides = array<i32>} : memref<232x128xf32, #tpu.memory_space<vmem>>, vector<13x128xf32>,
      %c540 = arith.constant 540 : index
      %c0_127 = arith.constant 0 : index
      %182 = tpu.strided_load %arg11[%c540, %c0_127] {strides = array<i32: 2, 1>} : memref<784x128xf32, #tpu.memory_space<vmem>>, vector<13x128xf32>
      %c541 = arith.constant 541 : index
      %c0_128 = arith.constant 0 : index
      %183 = tpu.strided_load %arg11[%c541, %c0_128] {strides = array<i32: 2, 1>} : memref<784x128xf32, #tpu.memory_space<vmem>>, vector<13x128xf32>
      %184 = arith.maximumf %182, %183 : vector<13x128xf32>
      %c570 = arith.constant 570 : index
      %c0_129 = arith.constant 0 : index
      %185 = tpu.strided_load %arg11[%c570, %c0_129] {strides = array<i32: 2, 1>} : memref<784x128xf32, #tpu.memory_space<vmem>>, vector<13x128xf32>
      %186 = arith.maximumf %184, %185 : vector<13x128xf32>
      %c571 = arith.constant 571 : index
      %c0_130 = arith.constant 0 : index
      %187 = tpu.strided_load %arg11[%c571, %c0_130] {strides = array<i32: 2, 1>} : memref<784x128xf32, #tpu.memory_space<vmem>>, vector<13x128xf32>
      %188 = arith.maximumf %186, %187 : vector<13x128xf32>
      %189 = vector.broadcast %4 : vector<1x128xf32> to vector<13x128xf32>
      %190 = arith.addf %188, %189 : vector<13x128xf32>
      %cst_131 = arith.constant 0.000000e+00 : f32
      %191 = vector.broadcast %cst_131 : f32 to vector<13x128xf32>
      %192 = arith.maximumf %190, %191 : vector<13x128xf32>
      %c151_132 = arith.constant 151 : index
      %c0_133 = arith.constant 0 : index
      %193 = vector.load %arg12[%c151_132, %c0_133] : memref<232x128xf32, #tpu.memory_space<vmem>>, vector<13x128xf32>
      tpu.vector_store %arg12[%c151_132, %c0_133], %192 {strides = array<i32>} : memref<232x128xf32, #tpu.memory_space<vmem>>, vector<13x128xf32>,
      %c600 = arith.constant 600 : index
      %c0_134 = arith.constant 0 : index
      %194 = tpu.strided_load %arg11[%c600, %c0_134] {strides = array<i32: 2, 1>} : memref<784x128xf32, #tpu.memory_space<vmem>>, vector<13x128xf32>
      %c601 = arith.constant 601 : index
      %c0_135 = arith.constant 0 : index
      %195 = tpu.strided_load %arg11[%c601, %c0_135] {strides = array<i32: 2, 1>} : memref<784x128xf32, #tpu.memory_space<vmem>>, vector<13x128xf32>
      %196 = arith.maximumf %194, %195 : vector<13x128xf32>
      %c630 = arith.constant 630 : index
      %c0_136 = arith.constant 0 : index
      %197 = tpu.strided_load %arg11[%c630, %c0_136] {strides = array<i32: 2, 1>} : memref<784x128xf32, #tpu.memory_space<vmem>>, vector<13x128xf32>
      %198 = arith.maximumf %196, %197 : vector<13x128xf32>
      %c631 = arith.constant 631 : index
      %c0_137 = arith.constant 0 : index
      %199 = tpu.strided_load %arg11[%c631, %c0_137] {strides = array<i32: 2, 1>} : memref<784x128xf32, #tpu.memory_space<vmem>>, vector<13x128xf32>
      %200 = arith.maximumf %198, %199 : vector<13x128xf32>
      %201 = vector.broadcast %4 : vector<1x128xf32> to vector<13x128xf32>
      %202 = arith.addf %200, %201 : vector<13x128xf32>
      %cst_138 = arith.constant 0.000000e+00 : f32
      %203 = vector.broadcast %cst_138 : f32 to vector<13x128xf32>
      %204 = arith.maximumf %202, %203 : vector<13x128xf32>
      %c166 = arith.constant 166 : index
      %c0_139 = arith.constant 0 : index
      %205 = vector.load %arg12[%c166, %c0_139] : memref<232x128xf32, #tpu.memory_space<vmem>>, vector<13x128xf32>
      tpu.vector_store %arg12[%c166, %c0_139], %204 {strides = array<i32>} : memref<232x128xf32, #tpu.memory_space<vmem>>, vector<13x128xf32>,
      %c660 = arith.constant 660 : index
      %c0_140 = arith.constant 0 : index
      %206 = tpu.strided_load %arg11[%c660, %c0_140] {strides = array<i32: 2, 1>} : memref<784x128xf32, #tpu.memory_space<vmem>>, vector<13x128xf32>
      %c661 = arith.constant 661 : index
      %c0_141 = arith.constant 0 : index
      %207 = tpu.strided_load %arg11[%c661, %c0_141] {strides = array<i32: 2, 1>} : memref<784x128xf32, #tpu.memory_space<vmem>>, vector<13x128xf32>
      %208 = arith.maximumf %206, %207 : vector<13x128xf32>
      %c690 = arith.constant 690 : index
      %c0_142 = arith.constant 0 : index
      %209 = tpu.strided_load %arg11[%c690, %c0_142] {strides = array<i32: 2, 1>} : memref<784x128xf32, #tpu.memory_space<vmem>>, vector<13x128xf32>
      %210 = arith.maximumf %208, %209 : vector<13x128xf32>
      %c691 = arith.constant 691 : index
      %c0_143 = arith.constant 0 : index
      %211 = tpu.strided_load %arg11[%c691, %c0_143] {strides = array<i32: 2, 1>} : memref<784x128xf32, #tpu.memory_space<vmem>>, vector<13x128xf32>
      %212 = arith.maximumf %210, %211 : vector<13x128xf32>
      %213 = vector.broadcast %4 : vector<1x128xf32> to vector<13x128xf32>
      %214 = arith.addf %212, %213 : vector<13x128xf32>
      %cst_144 = arith.constant 0.000000e+00 : f32
      %215 = vector.broadcast %cst_144 : f32 to vector<13x128xf32>
      %216 = arith.maximumf %214, %215 : vector<13x128xf32>
      %c181_145 = arith.constant 181 : index
      %c0_146 = arith.constant 0 : index
      %217 = vector.load %arg12[%c181_145, %c0_146] : memref<232x128xf32, #tpu.memory_space<vmem>>, vector<13x128xf32>
      tpu.vector_store %arg12[%c181_145, %c0_146], %216 {strides = array<i32>} : memref<232x128xf32, #tpu.memory_space<vmem>>, vector<13x128xf32>,
      %c720 = arith.constant 720 : index
      %c0_147 = arith.constant 0 : index
      %218 = tpu.strided_load %arg11[%c720, %c0_147] {strides = array<i32: 2, 1>} : memref<784x128xf32, #tpu.memory_space<vmem>>, vector<13x128xf32>
      %c721 = arith.constant 721 : index
      %c0_148 = arith.constant 0 : index
      %219 = tpu.strided_load %arg11[%c721, %c0_148] {strides = array<i32: 2, 1>} : memref<784x128xf32, #tpu.memory_space<vmem>>, vector<13x128xf32>
      %220 = arith.maximumf %218, %219 : vector<13x128xf32>
      %c750 = arith.constant 750 : index
      %c0_149 = arith.constant 0 : index
      %221 = tpu.strided_load %arg11[%c750, %c0_149] {strides = array<i32: 2, 1>} : memref<784x128xf32, #tpu.memory_space<vmem>>, vector<13x128xf32>
      %222 = arith.maximumf %220, %221 : vector<13x128xf32>
      %c751 = arith.constant 751 : index
      %c0_150 = arith.constant 0 : index
      %223 = tpu.strided_load %arg11[%c751, %c0_150] {strides = array<i32: 2, 1>} : memref<784x128xf32, #tpu.memory_space<vmem>>, vector<13x128xf32>
      %224 = arith.maximumf %222, %223 : vector<13x128xf32>
      %225 = vector.broadcast %4 : vector<1x128xf32> to vector<13x128xf32>
      %226 = arith.addf %224, %225 : vector<13x128xf32>
      %cst_151 = arith.constant 0.000000e+00 : f32
      %227 = vector.broadcast %cst_151 : f32 to vector<13x128xf32>
      %228 = arith.maximumf %226, %227 : vector<13x128xf32>
      %c196 = arith.constant 196 : index
      %c0_152 = arith.constant 0 : index
      %229 = vector.load %arg12[%c196, %c0_152] : memref<232x128xf32, #tpu.memory_space<vmem>>, vector<13x128xf32>
      tpu.vector_store %arg12[%c196, %c0_152], %228 {strides = array<i32>} : memref<232x128xf32, #tpu.memory_space<vmem>>, vector<13x128xf32>,
      %c0_153 = arith.constant 0 : index
      %c0_154 = arith.constant 0 : index
      %230 = vector.load %arg12[%c0_153, %c0_154] : memref<232x128xf32, #tpu.memory_space<vmem>>, vector<96x128xf32>
      %231 = vector.extract_strided_slice %230 {offsets = [0, 0], sizes = [96, 16], strides = [1, 1]} : vector<96x128xf32> to vector<96x16xf32>
      %c0_155 = arith.constant 0 : index
      %c0_156 = arith.constant 0 : index
      %c0_157 = arith.constant 0 : index
      %232 = vector.load %arg4[%c0_155, %c0_156, %c0_157] : memref<16x16x128xf32, #tpu.memory_space<vmem>>, vector<1x16x128xf32>
      %233 = vector.shape_cast %232 : vector<1x16x128xf32> to vector<16x128xf32>
      %cst_158 = arith.constant dense<0.000000e+00> : vector<96x128xf32>
      %234 = tpu.matmul %231, %233, %cst_158 {dimension_numbers = #tpu.dot_dimension_numbers<[1], [0], [0], [1], [0, 0, 1, 1], [], []>} : vector<96x16xf32>, vector<16x128xf32>, vector<96x128xf32> -> vector<96x128xf32>
      %c1_159 = arith.constant 1 : index
      %c0_160 = arith.constant 0 : index
      %235 = vector.load %arg12[%c1_159, %c0_160] : memref<232x128xf32, #tpu.memory_space<vmem>>, vector<96x128xf32>
      %236 = vector.extract_strided_slice %235 {offsets = [0, 0], sizes = [96, 16], strides = [1, 1]} : vector<96x128xf32> to vector<96x16xf32>
      %c1_161 = arith.constant 1 : index
      %c0_162 = arith.constant 0 : index
      %c0_163 = arith.constant 0 : index
      %237 = vector.load %arg4[%c1_161, %c0_162, %c0_163] : memref<16x16x128xf32, #tpu.memory_space<vmem>>, vector<1x16x128xf32>
      %238 = vector.shape_cast %237 : vector<1x16x128xf32> to vector<16x128xf32>
      %cst_164 = arith.constant dense<0.000000e+00> : vector<96x128xf32>
      %239 = tpu.matmul %236, %238, %cst_164 {dimension_numbers = #tpu.dot_dimension_numbers<[1], [0], [0], [1], [0, 0, 1, 1], [], []>} : vector<96x16xf32>, vector<16x128xf32>, vector<96x128xf32> -> vector<96x128xf32>
      %240 = arith.addf %234, %239 : vector<96x128xf32>
      %c2_165 = arith.constant 2 : index
      %c0_166 = arith.constant 0 : index
      %241 = vector.load %arg12[%c2_165, %c0_166] : memref<232x128xf32, #tpu.memory_space<vmem>>, vector<96x128xf32>
      %242 = vector.extract_strided_slice %241 {offsets = [0, 0], sizes = [96, 16], strides = [1, 1]} : vector<96x128xf32> to vector<96x16xf32>
      %c2_167 = arith.constant 2 : index
      %c0_168 = arith.constant 0 : index
      %c0_169 = arith.constant 0 : index
      %243 = vector.load %arg4[%c2_167, %c0_168, %c0_169] : memref<16x16x128xf32, #tpu.memory_space<vmem>>, vector<1x16x128xf32>
      %244 = vector.shape_cast %243 : vector<1x16x128xf32> to vector<16x128xf32>
      %cst_170 = arith.constant dense<0.000000e+00> : vector<96x128xf32>
      %245 = tpu.matmul %242, %244, %cst_170 {dimension_numbers = #tpu.dot_dimension_numbers<[1], [0], [0], [1], [0, 0, 1, 1], [], []>} : vector<96x16xf32>, vector<16x128xf32>, vector<96x128xf32> -> vector<96x128xf32>
      %246 = arith.addf %240, %245 : vector<96x128xf32>
      %c3_171 = arith.constant 3 : index
      %c0_172 = arith.constant 0 : index
      %247 = vector.load %arg12[%c3_171, %c0_172] : memref<232x128xf32, #tpu.memory_space<vmem>>, vector<96x128xf32>
      %248 = vector.extract_strided_slice %247 {offsets = [0, 0], sizes = [96, 16], strides = [1, 1]} : vector<96x128xf32> to vector<96x16xf32>
      %c3_173 = arith.constant 3 : index
      %c0_174 = arith.constant 0 : index
      %c0_175 = arith.constant 0 : index
      %249 = vector.load %arg4[%c3_173, %c0_174, %c0_175] : memref<16x16x128xf32, #tpu.memory_space<vmem>>, vector<1x16x128xf32>
      %250 = vector.shape_cast %249 : vector<1x16x128xf32> to vector<16x128xf32>
      %cst_176 = arith.constant dense<0.000000e+00> : vector<96x128xf32>
      %251 = tpu.matmul %248, %250, %cst_176 {dimension_numbers = #tpu.dot_dimension_numbers<[1], [0], [0], [1], [0, 0, 1, 1], [], []>} : vector<96x16xf32>, vector<16x128xf32>, vector<96x128xf32> -> vector<96x128xf32>
      %252 = arith.addf %246, %251 : vector<96x128xf32>
      %c15 = arith.constant 15 : index
      %c0_177 = arith.constant 0 : index
      %253 = vector.load %arg12[%c15, %c0_177] : memref<232x128xf32, #tpu.memory_space<vmem>>, vector<96x128xf32>
      %254 = vector.extract_strided_slice %253 {offsets = [0, 0], sizes = [96, 16], strides = [1, 1]} : vector<96x128xf32> to vector<96x16xf32>
      %c4_178 = arith.constant 4 : index
      %c0_179 = arith.constant 0 : index
      %c0_180 = arith.constant 0 : index
      %255 = vector.load %arg4[%c4_178, %c0_179, %c0_180] : memref<16x16x128xf32, #tpu.memory_space<vmem>>, vector<1x16x128xf32>
      %256 = vector.shape_cast %255 : vector<1x16x128xf32> to vector<16x128xf32>
      %cst_181 = arith.constant dense<0.000000e+00> : vector<96x128xf32>
      %257 = tpu.matmul %254, %256, %cst_181 {dimension_numbers = #tpu.dot_dimension_numbers<[1], [0], [0], [1], [0, 0, 1, 1], [], []>} : vector<96x16xf32>, vector<16x128xf32>, vector<96x128xf32> -> vector<96x128xf32>
      %258 = arith.addf %252, %257 : vector<96x128xf32>
      %c16_182 = arith.constant 16 : index
      %c0_183 = arith.constant 0 : index
      %259 = vector.load %arg12[%c16_182, %c0_183] : memref<232x128xf32, #tpu.memory_space<vmem>>, vector<96x128xf32>
      %260 = vector.extract_strided_slice %259 {offsets = [0, 0], sizes = [96, 16], strides = [1, 1]} : vector<96x128xf32> to vector<96x16xf32>
      %c5_184 = arith.constant 5 : index
      %c0_185 = arith.constant 0 : index
      %c0_186 = arith.constant 0 : index
      %261 = vector.load %arg4[%c5_184, %c0_185, %c0_186] : memref<16x16x128xf32, #tpu.memory_space<vmem>>, vector<1x16x128xf32>
      %262 = vector.shape_cast %261 : vector<1x16x128xf32> to vector<16x128xf32>
      %cst_187 = arith.constant dense<0.000000e+00> : vector<96x128xf32>
      %263 = tpu.matmul %260, %262, %cst_187 {dimension_numbers = #tpu.dot_dimension_numbers<[1], [0], [0], [1], [0, 0, 1, 1], [], []>} : vector<96x16xf32>, vector<16x128xf32>, vector<96x128xf32> -> vector<96x128xf32>
      %264 = arith.addf %258, %263 : vector<96x128xf32>
      %c17 = arith.constant 17 : index
      %c0_188 = arith.constant 0 : index
      %265 = vector.load %arg12[%c17, %c0_188] : memref<232x128xf32, #tpu.memory_space<vmem>>, vector<96x128xf32>
      %266 = vector.extract_strided_slice %265 {offsets = [0, 0], sizes = [96, 16], strides = [1, 1]} : vector<96x128xf32> to vector<96x16xf32>
      %c6_189 = arith.constant 6 : index
      %c0_190 = arith.constant 0 : index
      %c0_191 = arith.constant 0 : index
      %267 = vector.load %arg4[%c6_189, %c0_190, %c0_191] : memref<16x16x128xf32, #tpu.memory_space<vmem>>, vector<1x16x128xf32>
      %268 = vector.shape_cast %267 : vector<1x16x128xf32> to vector<16x128xf32>
      %cst_192 = arith.constant dense<0.000000e+00> : vector<96x128xf32>
      %269 = tpu.matmul %266, %268, %cst_192 {dimension_numbers = #tpu.dot_dimension_numbers<[1], [0], [0], [1], [0, 0, 1, 1], [], []>} : vector<96x16xf32>, vector<16x128xf32>, vector<96x128xf32> -> vector<96x128xf32>
      %270 = arith.addf %264, %269 : vector<96x128xf32>
      %c18 = arith.constant 18 : index
      %c0_193 = arith.constant 0 : index
      %271 = vector.load %arg12[%c18, %c0_193] : memref<232x128xf32, #tpu.memory_space<vmem>>, vector<96x128xf32>
      %272 = vector.extract_strided_slice %271 {offsets = [0, 0], sizes = [96, 16], strides = [1, 1]} : vector<96x128xf32> to vector<96x16xf32>
      %c7_194 = arith.constant 7 : index
      %c0_195 = arith.constant 0 : index
      %c0_196 = arith.constant 0 : index
      %273 = vector.load %arg4[%c7_194, %c0_195, %c0_196] : memref<16x16x128xf32, #tpu.memory_space<vmem>>, vector<1x16x128xf32>
      %274 = vector.shape_cast %273 : vector<1x16x128xf32> to vector<16x128xf32>
      %cst_197 = arith.constant dense<0.000000e+00> : vector<96x128xf32>
      %275 = tpu.matmul %272, %274, %cst_197 {dimension_numbers = #tpu.dot_dimension_numbers<[1], [0], [0], [1], [0, 0, 1, 1], [], []>} : vector<96x16xf32>, vector<16x128xf32>, vector<96x128xf32> -> vector<96x128xf32>
      %276 = arith.addf %270, %275 : vector<96x128xf32>
      %c30_198 = arith.constant 30 : index
      %c0_199 = arith.constant 0 : index
      %277 = vector.load %arg12[%c30_198, %c0_199] : memref<232x128xf32, #tpu.memory_space<vmem>>, vector<96x128xf32>
      %278 = vector.extract_strided_slice %277 {offsets = [0, 0], sizes = [96, 16], strides = [1, 1]} : vector<96x128xf32> to vector<96x16xf32>
      %c8_200 = arith.constant 8 : index
      %c0_201 = arith.constant 0 : index
      %c0_202 = arith.constant 0 : index
      %279 = vector.load %arg4[%c8_200, %c0_201, %c0_202] : memref<16x16x128xf32, #tpu.memory_space<vmem>>, vector<1x16x128xf32>
      %280 = vector.shape_cast %279 : vector<1x16x128xf32> to vector<16x128xf32>
      %cst_203 = arith.constant dense<0.000000e+00> : vector<96x128xf32>
      %281 = tpu.matmul %278, %280, %cst_203 {dimension_numbers = #tpu.dot_dimension_numbers<[1], [0], [0], [1], [0, 0, 1, 1], [], []>} : vector<96x16xf32>, vector<16x128xf32>, vector<96x128xf32> -> vector<96x128xf32>
      %282 = arith.addf %276, %281 : vector<96x128xf32>
      %c31_204 = arith.constant 31 : index
      %c0_205 = arith.constant 0 : index
      %283 = vector.load %arg12[%c31_204, %c0_205] : memref<232x128xf32, #tpu.memory_space<vmem>>, vector<96x128xf32>
      %284 = vector.extract_strided_slice %283 {offsets = [0, 0], sizes = [96, 16], strides = [1, 1]} : vector<96x128xf32> to vector<96x16xf32>
      %c9 = arith.constant 9 : index
      %c0_206 = arith.constant 0 : index
      %c0_207 = arith.constant 0 : index
      %285 = vector.load %arg4[%c9, %c0_206, %c0_207] : memref<16x16x128xf32, #tpu.memory_space<vmem>>, vector<1x16x128xf32>
      %286 = vector.shape_cast %285 : vector<1x16x128xf32> to vector<16x128xf32>
      %cst_208 = arith.constant dense<0.000000e+00> : vector<96x128xf32>
      %287 = tpu.matmul %284, %286, %cst_208 {dimension_numbers = #tpu.dot_dimension_numbers<[1], [0], [0], [1], [0, 0, 1, 1], [], []>} : vector<96x16xf32>, vector<16x128xf32>, vector<96x128xf32> -> vector<96x128xf32>
      %288 = arith.addf %282, %287 : vector<96x128xf32>
      %c32 = arith.constant 32 : index
      %c0_209 = arith.constant 0 : index
      %289 = vector.load %arg12[%c32, %c0_209] : memref<232x128xf32, #tpu.memory_space<vmem>>, vector<96x128xf32>
      %290 = vector.extract_strided_slice %289 {offsets = [0, 0], sizes = [96, 16], strides = [1, 1]} : vector<96x128xf32> to vector<96x16xf32>
      %c10 = arith.constant 10 : index
      %c0_210 = arith.constant 0 : index
      %c0_211 = arith.constant 0 : index
      %291 = vector.load %arg4[%c10, %c0_210, %c0_211] : memref<16x16x128xf32, #tpu.memory_space<vmem>>, vector<1x16x128xf32>
      %292 = vector.shape_cast %291 : vector<1x16x128xf32> to vector<16x128xf32>
      %cst_212 = arith.constant dense<0.000000e+00> : vector<96x128xf32>
      %293 = tpu.matmul %290, %292, %cst_212 {dimension_numbers = #tpu.dot_dimension_numbers<[1], [0], [0], [1], [0, 0, 1, 1], [], []>} : vector<96x16xf32>, vector<16x128xf32>, vector<96x128xf32> -> vector<96x128xf32>
      %294 = arith.addf %288, %293 : vector<96x128xf32>
      %c33 = arith.constant 33 : index
      %c0_213 = arith.constant 0 : index
      %295 = vector.load %arg12[%c33, %c0_213] : memref<232x128xf32, #tpu.memory_space<vmem>>, vector<96x128xf32>
      %296 = vector.extract_strided_slice %295 {offsets = [0, 0], sizes = [96, 16], strides = [1, 1]} : vector<96x128xf32> to vector<96x16xf32>
      %c11 = arith.constant 11 : index
      %c0_214 = arith.constant 0 : index
      %c0_215 = arith.constant 0 : index
      %297 = vector.load %arg4[%c11, %c0_214, %c0_215] : memref<16x16x128xf32, #tpu.memory_space<vmem>>, vector<1x16x128xf32>
      %298 = vector.shape_cast %297 : vector<1x16x128xf32> to vector<16x128xf32>
      %cst_216 = arith.constant dense<0.000000e+00> : vector<96x128xf32>
      %299 = tpu.matmul %296, %298, %cst_216 {dimension_numbers = #tpu.dot_dimension_numbers<[1], [0], [0], [1], [0, 0, 1, 1], [], []>} : vector<96x16xf32>, vector<16x128xf32>, vector<96x128xf32> -> vector<96x128xf32>
      %300 = arith.addf %294, %299 : vector<96x128xf32>
      %c45 = arith.constant 45 : index
      %c0_217 = arith.constant 0 : index
      %301 = vector.load %arg12[%c45, %c0_217] : memref<232x128xf32, #tpu.memory_space<vmem>>, vector<96x128xf32>
      %302 = vector.extract_strided_slice %301 {offsets = [0, 0], sizes = [96, 16], strides = [1, 1]} : vector<96x128xf32> to vector<96x16xf32>
      %c12 = arith.constant 12 : index
      %c0_218 = arith.constant 0 : index
      %c0_219 = arith.constant 0 : index
      %303 = vector.load %arg4[%c12, %c0_218, %c0_219] : memref<16x16x128xf32, #tpu.memory_space<vmem>>, vector<1x16x128xf32>
      %304 = vector.shape_cast %303 : vector<1x16x128xf32> to vector<16x128xf32>
      %cst_220 = arith.constant dense<0.000000e+00> : vector<96x128xf32>
      %305 = tpu.matmul %302, %304, %cst_220 {dimension_numbers = #tpu.dot_dimension_numbers<[1], [0], [0], [1], [0, 0, 1, 1], [], []>} : vector<96x16xf32>, vector<16x128xf32>, vector<96x128xf32> -> vector<96x128xf32>
      %306 = arith.addf %300, %305 : vector<96x128xf32>
      %c46_221 = arith.constant 46 : index
      %c0_222 = arith.constant 0 : index
      %307 = vector.load %arg12[%c46_221, %c0_222] : memref<232x128xf32, #tpu.memory_space<vmem>>, vector<96x128xf32>
      %308 = vector.extract_strided_slice %307 {offsets = [0, 0], sizes = [96, 16], strides = [1, 1]} : vector<96x128xf32> to vector<96x16xf32>
      %c13 = arith.constant 13 : index
      %c0_223 = arith.constant 0 : index
      %c0_224 = arith.constant 0 : index
      %309 = vector.load %arg4[%c13, %c0_223, %c0_224] : memref<16x16x128xf32, #tpu.memory_space<vmem>>, vector<1x16x128xf32>
      %310 = vector.shape_cast %309 : vector<1x16x128xf32> to vector<16x128xf32>
      %cst_225 = arith.constant dense<0.000000e+00> : vector<96x128xf32>
      %311 = tpu.matmul %308, %310, %cst_225 {dimension_numbers = #tpu.dot_dimension_numbers<[1], [0], [0], [1], [0, 0, 1, 1], [], []>} : vector<96x16xf32>, vector<16x128xf32>, vector<96x128xf32> -> vector<96x128xf32>
      %312 = arith.addf %306, %311 : vector<96x128xf32>
      %c47 = arith.constant 47 : index
      %c0_226 = arith.constant 0 : index
      %313 = vector.load %arg12[%c47, %c0_226] : memref<232x128xf32, #tpu.memory_space<vmem>>, vector<96x128xf32>
      %314 = vector.extract_strided_slice %313 {offsets = [0, 0], sizes = [96, 16], strides = [1, 1]} : vector<96x128xf32> to vector<96x16xf32>
      %c14 = arith.constant 14 : index
      %c0_227 = arith.constant 0 : index
      %c0_228 = arith.constant 0 : index
      %315 = vector.load %arg4[%c14, %c0_227, %c0_228] : memref<16x16x128xf32, #tpu.memory_space<vmem>>, vector<1x16x128xf32>
      %316 = vector.shape_cast %315 : vector<1x16x128xf32> to vector<16x128xf32>
      %cst_229 = arith.constant dense<0.000000e+00> : vector<96x128xf32>
      %317 = tpu.matmul %314, %316, %cst_229 {dimension_numbers = #tpu.dot_dimension_numbers<[1], [0], [0], [1], [0, 0, 1, 1], [], []>} : vector<96x16xf32>, vector<16x128xf32>, vector<96x128xf32> -> vector<96x128xf32>
      %318 = arith.addf %312, %317 : vector<96x128xf32>
      %c48 = arith.constant 48 : index
      %c0_230 = arith.constant 0 : index
      %319 = vector.load %arg12[%c48, %c0_230] : memref<232x128xf32, #tpu.memory_space<vmem>>, vector<96x128xf32>
      %320 = vector.extract_strided_slice %319 {offsets = [0, 0], sizes = [96, 16], strides = [1, 1]} : vector<96x128xf32> to vector<96x16xf32>
      %c15_231 = arith.constant 15 : index
      %c0_232 = arith.constant 0 : index
      %c0_233 = arith.constant 0 : index
      %321 = vector.load %arg4[%c15_231, %c0_232, %c0_233] : memref<16x16x128xf32, #tpu.memory_space<vmem>>, vector<1x16x128xf32>
      %322 = vector.shape_cast %321 : vector<1x16x128xf32> to vector<16x128xf32>
      %cst_234 = arith.constant dense<0.000000e+00> : vector<96x128xf32>
      %323 = tpu.matmul %320, %322, %cst_234 {dimension_numbers = #tpu.dot_dimension_numbers<[1], [0], [0], [1], [0, 0, 1, 1], [], []>} : vector<96x16xf32>, vector<16x128xf32>, vector<96x128xf32> -> vector<96x128xf32>
      %324 = arith.addf %318, %323 : vector<96x128xf32>
      %c0_235 = arith.constant 0 : index
      %c0_236 = arith.constant 0 : index
      %325 = vector.load %arg13[%c0_235, %c0_236] : memref<184x128xf32, #tpu.memory_space<vmem>>, vector<96x128xf32>
      tpu.vector_store %arg13[%c0_235, %c0_236], %324 {strides = array<i32>} : memref<184x128xf32, #tpu.memory_space<vmem>>, vector<96x128xf32>,
      %c96 = arith.constant 96 : index
      %c0_237 = arith.constant 0 : index
      %326 = vector.load %arg12[%c96, %c0_237] : memref<232x128xf32, #tpu.memory_space<vmem>>, vector<84x128xf32>
      %327 = vector.extract_strided_slice %326 {offsets = [0, 0], sizes = [84, 16], strides = [1, 1]} : vector<84x128xf32> to vector<84x16xf32>
      %c0_238 = arith.constant 0 : index
      %c0_239 = arith.constant 0 : index
      %c0_240 = arith.constant 0 : index
      %328 = vector.load %arg4[%c0_238, %c0_239, %c0_240] : memref<16x16x128xf32, #tpu.memory_space<vmem>>, vector<1x16x128xf32>
      %329 = vector.shape_cast %328 : vector<1x16x128xf32> to vector<16x128xf32>
      %cst_241 = arith.constant dense<0.000000e+00> : vector<84x128xf32>
      %330 = tpu.matmul %327, %329, %cst_241 {dimension_numbers = #tpu.dot_dimension_numbers<[1], [0], [0], [1], [0, 0, 1, 1], [], []>} : vector<84x16xf32>, vector<16x128xf32>, vector<84x128xf32> -> vector<84x128xf32>
      %c97 = arith.constant 97 : index
      %c0_242 = arith.constant 0 : index
      %331 = vector.load %arg12[%c97, %c0_242] : memref<232x128xf32, #tpu.memory_space<vmem>>, vector<84x128xf32>
      %332 = vector.extract_strided_slice %331 {offsets = [0, 0], sizes = [84, 16], strides = [1, 1]} : vector<84x128xf32> to vector<84x16xf32>
      %c1_243 = arith.constant 1 : index
      %c0_244 = arith.constant 0 : index
      %c0_245 = arith.constant 0 : index
      %333 = vector.load %arg4[%c1_243, %c0_244, %c0_245] : memref<16x16x128xf32, #tpu.memory_space<vmem>>, vector<1x16x128xf32>
      %334 = vector.shape_cast %333 : vector<1x16x128xf32> to vector<16x128xf32>
      %cst_246 = arith.constant dense<0.000000e+00> : vector<84x128xf32>
      %335 = tpu.matmul %332, %334, %cst_246 {dimension_numbers = #tpu.dot_dimension_numbers<[1], [0], [0], [1], [0, 0, 1, 1], [], []>} : vector<84x16xf32>, vector<16x128xf32>, vector<84x128xf32> -> vector<84x128xf32>
      %336 = arith.addf %330, %335 : vector<84x128xf32>
      %c98 = arith.constant 98 : index
      %c0_247 = arith.constant 0 : index
      %337 = vector.load %arg12[%c98, %c0_247] : memref<232x128xf32, #tpu.memory_space<vmem>>, vector<84x128xf32>
      %338 = vector.extract_strided_slice %337 {offsets = [0, 0], sizes = [84, 16], strides = [1, 1]} : vector<84x128xf32> to vector<84x16xf32>
      %c2_248 = arith.constant 2 : index
      %c0_249 = arith.constant 0 : index
      %c0_250 = arith.constant 0 : index
      %339 = vector.load %arg4[%c2_248, %c0_249, %c0_250] : memref<16x16x128xf32, #tpu.memory_space<vmem>>, vector<1x16x128xf32>
      %340 = vector.shape_cast %339 : vector<1x16x128xf32> to vector<16x128xf32>
      %cst_251 = arith.constant dense<0.000000e+00> : vector<84x128xf32>
      %341 = tpu.matmul %338, %340, %cst_251 {dimension_numbers = #tpu.dot_dimension_numbers<[1], [0], [0], [1], [0, 0, 1, 1], [], []>} : vector<84x16xf32>, vector<16x128xf32>, vector<84x128xf32> -> vector<84x128xf32>
      %342 = arith.addf %336, %341 : vector<84x128xf32>
      %c99 = arith.constant 99 : index
      %c0_252 = arith.constant 0 : index
      %343 = vector.load %arg12[%c99, %c0_252] : memref<232x128xf32, #tpu.memory_space<vmem>>, vector<84x128xf32>
      %344 = vector.extract_strided_slice %343 {offsets = [0, 0], sizes = [84, 16], strides = [1, 1]} : vector<84x128xf32> to vector<84x16xf32>
      %c3_253 = arith.constant 3 : index
      %c0_254 = arith.constant 0 : index
      %c0_255 = arith.constant 0 : index
      %345 = vector.load %arg4[%c3_253, %c0_254, %c0_255] : memref<16x16x128xf32, #tpu.memory_space<vmem>>, vector<1x16x128xf32>
      %346 = vector.shape_cast %345 : vector<1x16x128xf32> to vector<16x128xf32>
      %cst_256 = arith.constant dense<0.000000e+00> : vector<84x128xf32>
      %347 = tpu.matmul %344, %346, %cst_256 {dimension_numbers = #tpu.dot_dimension_numbers<[1], [0], [0], [1], [0, 0, 1, 1], [], []>} : vector<84x16xf32>, vector<16x128xf32>, vector<84x128xf32> -> vector<84x128xf32>
      %348 = arith.addf %342, %347 : vector<84x128xf32>
      %c111 = arith.constant 111 : index
      %c0_257 = arith.constant 0 : index
      %349 = vector.load %arg12[%c111, %c0_257] : memref<232x128xf32, #tpu.memory_space<vmem>>, vector<84x128xf32>
      %350 = vector.extract_strided_slice %349 {offsets = [0, 0], sizes = [84, 16], strides = [1, 1]} : vector<84x128xf32> to vector<84x16xf32>
      %c4_258 = arith.constant 4 : index
      %c0_259 = arith.constant 0 : index
      %c0_260 = arith.constant 0 : index
      %351 = vector.load %arg4[%c4_258, %c0_259, %c0_260] : memref<16x16x128xf32, #tpu.memory_space<vmem>>, vector<1x16x128xf32>
      %352 = vector.shape_cast %351 : vector<1x16x128xf32> to vector<16x128xf32>
      %cst_261 = arith.constant dense<0.000000e+00> : vector<84x128xf32>
      %353 = tpu.matmul %350, %352, %cst_261 {dimension_numbers = #tpu.dot_dimension_numbers<[1], [0], [0], [1], [0, 0, 1, 1], [], []>} : vector<84x16xf32>, vector<16x128xf32>, vector<84x128xf32> -> vector<84x128xf32>
      %354 = arith.addf %348, %353 : vector<84x128xf32>
      %c112 = arith.constant 112 : index
      %c0_262 = arith.constant 0 : index
      %355 = vector.load %arg12[%c112, %c0_262] : memref<232x128xf32, #tpu.memory_space<vmem>>, vector<84x128xf32>
      %356 = vector.extract_strided_slice %355 {offsets = [0, 0], sizes = [84, 16], strides = [1, 1]} : vector<84x128xf32> to vector<84x16xf32>
      %c5_263 = arith.constant 5 : index
      %c0_264 = arith.constant 0 : index
      %c0_265 = arith.constant 0 : index
      %357 = vector.load %arg4[%c5_263, %c0_264, %c0_265] : memref<16x16x128xf32, #tpu.memory_space<vmem>>, vector<1x16x128xf32>
      %358 = vector.shape_cast %357 : vector<1x16x128xf32> to vector<16x128xf32>
      %cst_266 = arith.constant dense<0.000000e+00> : vector<84x128xf32>
      %359 = tpu.matmul %356, %358, %cst_266 {dimension_numbers = #tpu.dot_dimension_numbers<[1], [0], [0], [1], [0, 0, 1, 1], [], []>} : vector<84x16xf32>, vector<16x128xf32>, vector<84x128xf32> -> vector<84x128xf32>
      %360 = arith.addf %354, %359 : vector<84x128xf32>
      %c113 = arith.constant 113 : index
      %c0_267 = arith.constant 0 : index
      %361 = vector.load %arg12[%c113, %c0_267] : memref<232x128xf32, #tpu.memory_space<vmem>>, vector<84x128xf32>
      %362 = vector.extract_strided_slice %361 {offsets = [0, 0], sizes = [84, 16], strides = [1, 1]} : vector<84x128xf32> to vector<84x16xf32>
      %c6_268 = arith.constant 6 : index
      %c0_269 = arith.constant 0 : index
      %c0_270 = arith.constant 0 : index
      %363 = vector.load %arg4[%c6_268, %c0_269, %c0_270] : memref<16x16x128xf32, #tpu.memory_space<vmem>>, vector<1x16x128xf32>
      %364 = vector.shape_cast %363 : vector<1x16x128xf32> to vector<16x128xf32>
      %cst_271 = arith.constant dense<0.000000e+00> : vector<84x128xf32>
      %365 = tpu.matmul %362, %364, %cst_271 {dimension_numbers = #tpu.dot_dimension_numbers<[1], [0], [0], [1], [0, 0, 1, 1], [], []>} : vector<84x16xf32>, vector<16x128xf32>, vector<84x128xf32> -> vector<84x128xf32>
      %366 = arith.addf %360, %365 : vector<84x128xf32>
      %c114 = arith.constant 114 : index
      %c0_272 = arith.constant 0 : index
      %367 = vector.load %arg12[%c114, %c0_272] : memref<232x128xf32, #tpu.memory_space<vmem>>, vector<84x128xf32>
      %368 = vector.extract_strided_slice %367 {offsets = [0, 0], sizes = [84, 16], strides = [1, 1]} : vector<84x128xf32> to vector<84x16xf32>
      %c7_273 = arith.constant 7 : index
      %c0_274 = arith.constant 0 : index
      %c0_275 = arith.constant 0 : index
      %369 = vector.load %arg4[%c7_273, %c0_274, %c0_275] : memref<16x16x128xf32, #tpu.memory_space<vmem>>, vector<1x16x128xf32>
      %370 = vector.shape_cast %369 : vector<1x16x128xf32> to vector<16x128xf32>
      %cst_276 = arith.constant dense<0.000000e+00> : vector<84x128xf32>
      %371 = tpu.matmul %368, %370, %cst_276 {dimension_numbers = #tpu.dot_dimension_numbers<[1], [0], [0], [1], [0, 0, 1, 1], [], []>} : vector<84x16xf32>, vector<16x128xf32>, vector<84x128xf32> -> vector<84x128xf32>
      %372 = arith.addf %366, %371 : vector<84x128xf32>
      %c126 = arith.constant 126 : index
      %c0_277 = arith.constant 0 : index
      %373 = vector.load %arg12[%c126, %c0_277] : memref<232x128xf32, #tpu.memory_space<vmem>>, vector<84x128xf32>
      %374 = vector.extract_strided_slice %373 {offsets = [0, 0], sizes = [84, 16], strides = [1, 1]} : vector<84x128xf32> to vector<84x16xf32>
      %c8_278 = arith.constant 8 : index
      %c0_279 = arith.constant 0 : index
      %c0_280 = arith.constant 0 : index
      %375 = vector.load %arg4[%c8_278, %c0_279, %c0_280] : memref<16x16x128xf32, #tpu.memory_space<vmem>>, vector<1x16x128xf32>
      %376 = vector.shape_cast %375 : vector<1x16x128xf32> to vector<16x128xf32>
      %cst_281 = arith.constant dense<0.000000e+00> : vector<84x128xf32>
      %377 = tpu.matmul %374, %376, %cst_281 {dimension_numbers = #tpu.dot_dimension_numbers<[1], [0], [0], [1], [0, 0, 1, 1], [], []>} : vector<84x16xf32>, vector<16x128xf32>, vector<84x128xf32> -> vector<84x128xf32>
      %378 = arith.addf %372, %377 : vector<84x128xf32>
      %c127 = arith.constant 127 : index
      %c0_282 = arith.constant 0 : index
      %379 = vector.load %arg12[%c127, %c0_282] : memref<232x128xf32, #tpu.memory_space<vmem>>, vector<84x128xf32>
      %380 = vector.extract_strided_slice %379 {offsets = [0, 0], sizes = [84, 16], strides = [1, 1]} : vector<84x128xf32> to vector<84x16xf32>
      %c9_283 = arith.constant 9 : index
      %c0_284 = arith.constant 0 : index
      %c0_285 = arith.constant 0 : index
      %381 = vector.load %arg4[%c9_283, %c0_284, %c0_285] : memref<16x16x128xf32, #tpu.memory_space<vmem>>, vector<1x16x128xf32>
      %382 = vector.shape_cast %381 : vector<1x16x128xf32> to vector<16x128xf32>
      %cst_286 = arith.constant dense<0.000000e+00> : vector<84x128xf32>
      %383 = tpu.matmul %380, %382, %cst_286 {dimension_numbers = #tpu.dot_dimension_numbers<[1], [0], [0], [1], [0, 0, 1, 1], [], []>} : vector<84x16xf32>, vector<16x128xf32>, vector<84x128xf32> -> vector<84x128xf32>
      %384 = arith.addf %378, %383 : vector<84x128xf32>
      %c128 = arith.constant 128 : index
      %c0_287 = arith.constant 0 : index
      %385 = vector.load %arg12[%c128, %c0_287] : memref<232x128xf32, #tpu.memory_space<vmem>>, vector<84x128xf32>
      %386 = vector.extract_strided_slice %385 {offsets = [0, 0], sizes = [84, 16], strides = [1, 1]} : vector<84x128xf32> to vector<84x16xf32>
      %c10_288 = arith.constant 10 : index
      %c0_289 = arith.constant 0 : index
      %c0_290 = arith.constant 0 : index
      %387 = vector.load %arg4[%c10_288, %c0_289, %c0_290] : memref<16x16x128xf32, #tpu.memory_space<vmem>>, vector<1x16x128xf32>
      %388 = vector.shape_cast %387 : vector<1x16x128xf32> to vector<16x128xf32>
      %cst_291 = arith.constant dense<0.000000e+00> : vector<84x128xf32>
      %389 = tpu.matmul %386, %388, %cst_291 {dimension_numbers = #tpu.dot_dimension_numbers<[1], [0], [0], [1], [0, 0, 1, 1], [], []>} : vector<84x16xf32>, vector<16x128xf32>, vector<84x128xf32> -> vector<84x128xf32>
      %390 = arith.addf %384, %389 : vector<84x128xf32>
      %c129 = arith.constant 129 : index
      %c0_292 = arith.constant 0 : index
      %391 = vector.load %arg12[%c129, %c0_292] : memref<232x128xf32, #tpu.memory_space<vmem>>, vector<84x128xf32>
      %392 = vector.extract_strided_slice %391 {offsets = [0, 0], sizes = [84, 16], strides = [1, 1]} : vector<84x128xf32> to vector<84x16xf32>
      %c11_293 = arith.constant 11 : index
      %c0_294 = arith.constant 0 : index
      %c0_295 = arith.constant 0 : index
      %393 = vector.load %arg4[%c11_293, %c0_294, %c0_295] : memref<16x16x128xf32, #tpu.memory_space<vmem>>, vector<1x16x128xf32>
      %394 = vector.shape_cast %393 : vector<1x16x128xf32> to vector<16x128xf32>
      %cst_296 = arith.constant dense<0.000000e+00> : vector<84x128xf32>
      %395 = tpu.matmul %392, %394, %cst_296 {dimension_numbers = #tpu.dot_dimension_numbers<[1], [0], [0], [1], [0, 0, 1, 1], [], []>} : vector<84x16xf32>, vector<16x128xf32>, vector<84x128xf32> -> vector<84x128xf32>
      %396 = arith.addf %390, %395 : vector<84x128xf32>
      %c141 = arith.constant 141 : index
      %c0_297 = arith.constant 0 : index
      %397 = vector.load %arg12[%c141, %c0_297] : memref<232x128xf32, #tpu.memory_space<vmem>>, vector<84x128xf32>
      %398 = vector.extract_strided_slice %397 {offsets = [0, 0], sizes = [84, 16], strides = [1, 1]} : vector<84x128xf32> to vector<84x16xf32>
      %c12_298 = arith.constant 12 : index
      %c0_299 = arith.constant 0 : index
      %c0_300 = arith.constant 0 : index
      %399 = vector.load %arg4[%c12_298, %c0_299, %c0_300] : memref<16x16x128xf32, #tpu.memory_space<vmem>>, vector<1x16x128xf32>
      %400 = vector.shape_cast %399 : vector<1x16x128xf32> to vector<16x128xf32>
      %cst_301 = arith.constant dense<0.000000e+00> : vector<84x128xf32>
      %401 = tpu.matmul %398, %400, %cst_301 {dimension_numbers = #tpu.dot_dimension_numbers<[1], [0], [0], [1], [0, 0, 1, 1], [], []>} : vector<84x16xf32>, vector<16x128xf32>, vector<84x128xf32> -> vector<84x128xf32>
      %402 = arith.addf %396, %401 : vector<84x128xf32>
      %c142 = arith.constant 142 : index
      %c0_302 = arith.constant 0 : index
      %403 = vector.load %arg12[%c142, %c0_302] : memref<232x128xf32, #tpu.memory_space<vmem>>, vector<84x128xf32>
      %404 = vector.extract_strided_slice %403 {offsets = [0, 0], sizes = [84, 16], strides = [1, 1]} : vector<84x128xf32> to vector<84x16xf32>
      %c13_303 = arith.constant 13 : index
      %c0_304 = arith.constant 0 : index
      %c0_305 = arith.constant 0 : index
      %405 = vector.load %arg4[%c13_303, %c0_304, %c0_305] : memref<16x16x128xf32, #tpu.memory_space<vmem>>, vector<1x16x128xf32>
      %406 = vector.shape_cast %405 : vector<1x16x128xf32> to vector<16x128xf32>
      %cst_306 = arith.constant dense<0.000000e+00> : vector<84x128xf32>
      %407 = tpu.matmul %404, %406, %cst_306 {dimension_numbers = #tpu.dot_dimension_numbers<[1], [0], [0], [1], [0, 0, 1, 1], [], []>} : vector<84x16xf32>, vector<16x128xf32>, vector<84x128xf32> -> vector<84x128xf32>
      %408 = arith.addf %402, %407 : vector<84x128xf32>
      %c143 = arith.constant 143 : index
      %c0_307 = arith.constant 0 : index
      %409 = vector.load %arg12[%c143, %c0_307] : memref<232x128xf32, #tpu.memory_space<vmem>>, vector<84x128xf32>
      %410 = vector.extract_strided_slice %409 {offsets = [0, 0], sizes = [84, 16], strides = [1, 1]} : vector<84x128xf32> to vector<84x16xf32>
      %c14_308 = arith.constant 14 : index
      %c0_309 = arith.constant 0 : index
      %c0_310 = arith.constant 0 : index
      %411 = vector.load %arg4[%c14_308, %c0_309, %c0_310] : memref<16x16x128xf32, #tpu.memory_space<vmem>>, vector<1x16x128xf32>
      %412 = vector.shape_cast %411 : vector<1x16x128xf32> to vector<16x128xf32>
      %cst_311 = arith.constant dense<0.000000e+00> : vector<84x128xf32>
      %413 = tpu.matmul %410, %412, %cst_311 {dimension_numbers = #tpu.dot_dimension_numbers<[1], [0], [0], [1], [0, 0, 1, 1], [], []>} : vector<84x16xf32>, vector<16x128xf32>, vector<84x128xf32> -> vector<84x128xf32>
      %414 = arith.addf %408, %413 : vector<84x128xf32>
      %c144 = arith.constant 144 : index
      %c0_312 = arith.constant 0 : index
      %415 = vector.load %arg12[%c144, %c0_312] : memref<232x128xf32, #tpu.memory_space<vmem>>, vector<84x128xf32>
      %416 = vector.extract_strided_slice %415 {offsets = [0, 0], sizes = [84, 16], strides = [1, 1]} : vector<84x128xf32> to vector<84x16xf32>
      %c15_313 = arith.constant 15 : index
      %c0_314 = arith.constant 0 : index
      %c0_315 = arith.constant 0 : index
      %417 = vector.load %arg4[%c15_313, %c0_314, %c0_315] : memref<16x16x128xf32, #tpu.memory_space<vmem>>, vector<1x16x128xf32>
      %418 = vector.shape_cast %417 : vector<1x16x128xf32> to vector<16x128xf32>
      %cst_316 = arith.constant dense<0.000000e+00> : vector<84x128xf32>
      %419 = tpu.matmul %416, %418, %cst_316 {dimension_numbers = #tpu.dot_dimension_numbers<[1], [0], [0], [1], [0, 0, 1, 1], [], []>} : vector<84x16xf32>, vector<16x128xf32>, vector<84x128xf32> -> vector<84x128xf32>
      %420 = arith.addf %414, %419 : vector<84x128xf32>
      %c96_317 = arith.constant 96 : index
      %c0_318 = arith.constant 0 : index
      %421 = vector.load %arg13[%c96_317, %c0_318] : memref<184x128xf32, #tpu.memory_space<vmem>>, vector<84x128xf32>
      tpu.vector_store %arg13[%c96_317, %c0_318], %420 {strides = array<i32>} : memref<184x128xf32, #tpu.memory_space<vmem>>, vector<84x128xf32>,
      %c0_319 = arith.constant 0 : index
      %c0_320 = arith.constant 0 : index
      %422 = tpu.strided_load %arg13[%c0_319, %c0_320] {strides = array<i32: 2, 1>} : memref<184x128xf32, #tpu.memory_space<vmem>>, vector<6x128xf32>
      %c1_321 = arith.constant 1 : index
      %c0_322 = arith.constant 0 : index
      %423 = tpu.strided_load %arg13[%c1_321, %c0_322] {strides = array<i32: 2, 1>} : memref<184x128xf32, #tpu.memory_space<vmem>>, vector<6x128xf32>
      %424 = arith.maximumf %422, %423 : vector<6x128xf32>
      %c15_323 = arith.constant 15 : index
      %c0_324 = arith.constant 0 : index
      %425 = tpu.strided_load %arg13[%c15_323, %c0_324] {strides = array<i32: 2, 1>} : memref<184x128xf32, #tpu.memory_space<vmem>>, vector<6x128xf32>
      %426 = arith.maximumf %424, %425 : vector<6x128xf32>
      %c16_325 = arith.constant 16 : index
      %c0_326 = arith.constant 0 : index
      %427 = tpu.strided_load %arg13[%c16_325, %c0_326] {strides = array<i32: 2, 1>} : memref<184x128xf32, #tpu.memory_space<vmem>>, vector<6x128xf32>
      %428 = arith.maximumf %426, %427 : vector<6x128xf32>
      %429 = vector.broadcast %5 : vector<1x128xf32> to vector<6x128xf32>
      %430 = arith.addf %428, %429 : vector<6x128xf32>
      %cst_327 = arith.constant 0.000000e+00 : f32
      %431 = vector.broadcast %cst_327 : f32 to vector<6x128xf32>
      %432 = arith.maximumf %430, %431 : vector<6x128xf32>
      %c9_328 = arith.constant 9 : index
      %c0_329 = arith.constant 0 : index
      %433 = vector.load %arg14[%c9_328, %c0_329] : memref<72x128xf32, #tpu.memory_space<vmem>>, vector<6x128xf32>
      tpu.vector_store %arg14[%c9_328, %c0_329], %432 {strides = array<i32>} : memref<72x128xf32, #tpu.memory_space<vmem>>, vector<6x128xf32>,
      %c30_330 = arith.constant 30 : index
      %c0_331 = arith.constant 0 : index
      %434 = tpu.strided_load %arg13[%c30_330, %c0_331] {strides = array<i32: 2, 1>} : memref<184x128xf32, #tpu.memory_space<vmem>>, vector<6x128xf32>
      %c31_332 = arith.constant 31 : index
      %c0_333 = arith.constant 0 : index
      %435 = tpu.strided_load %arg13[%c31_332, %c0_333] {strides = array<i32: 2, 1>} : memref<184x128xf32, #tpu.memory_space<vmem>>, vector<6x128xf32>
      %436 = arith.maximumf %434, %435 : vector<6x128xf32>
      %c45_334 = arith.constant 45 : index
      %c0_335 = arith.constant 0 : index
      %437 = tpu.strided_load %arg13[%c45_334, %c0_335] {strides = array<i32: 2, 1>} : memref<184x128xf32, #tpu.memory_space<vmem>>, vector<6x128xf32>
      %438 = arith.maximumf %436, %437 : vector<6x128xf32>
      %c46_336 = arith.constant 46 : index
      %c0_337 = arith.constant 0 : index
      %439 = tpu.strided_load %arg13[%c46_336, %c0_337] {strides = array<i32: 2, 1>} : memref<184x128xf32, #tpu.memory_space<vmem>>, vector<6x128xf32>
      %440 = arith.maximumf %438, %439 : vector<6x128xf32>
      %441 = vector.broadcast %5 : vector<1x128xf32> to vector<6x128xf32>
      %442 = arith.addf %440, %441 : vector<6x128xf32>
      %cst_338 = arith.constant 0.000000e+00 : f32
      %443 = vector.broadcast %cst_338 : f32 to vector<6x128xf32>
      %444 = arith.maximumf %442, %443 : vector<6x128xf32>
      %c17_339 = arith.constant 17 : index
      %c0_340 = arith.constant 0 : index
      %445 = vector.load %arg14[%c17_339, %c0_340] : memref<72x128xf32, #tpu.memory_space<vmem>>, vector<6x128xf32>
      tpu.vector_store %arg14[%c17_339, %c0_340], %444 {strides = array<i32>} : memref<72x128xf32, #tpu.memory_space<vmem>>, vector<6x128xf32>,
      %c60_341 = arith.constant 60 : index
      %c0_342 = arith.constant 0 : index
      %446 = tpu.strided_load %arg13[%c60_341, %c0_342] {strides = array<i32: 2, 1>} : memref<184x128xf32, #tpu.memory_space<vmem>>, vector<6x128xf32>
      %c61_343 = arith.constant 61 : index
      %c0_344 = arith.constant 0 : index
      %447 = tpu.strided_load %arg13[%c61_343, %c0_344] {strides = array<i32: 2, 1>} : memref<184x128xf32, #tpu.memory_space<vmem>>, vector<6x128xf32>
      %448 = arith.maximumf %446, %447 : vector<6x128xf32>
      %c75 = arith.constant 75 : index
      %c0_345 = arith.constant 0 : index
      %449 = tpu.strided_load %arg13[%c75, %c0_345] {strides = array<i32: 2, 1>} : memref<184x128xf32, #tpu.memory_space<vmem>>, vector<6x128xf32>
      %450 = arith.maximumf %448, %449 : vector<6x128xf32>
      %c76_346 = arith.constant 76 : index
      %c0_347 = arith.constant 0 : index
      %451 = tpu.strided_load %arg13[%c76_346, %c0_347] {strides = array<i32: 2, 1>} : memref<184x128xf32, #tpu.memory_space<vmem>>, vector<6x128xf32>
      %452 = arith.maximumf %450, %451 : vector<6x128xf32>
      %453 = vector.broadcast %5 : vector<1x128xf32> to vector<6x128xf32>
      %454 = arith.addf %452, %453 : vector<6x128xf32>
      %cst_348 = arith.constant 0.000000e+00 : f32
      %455 = vector.broadcast %cst_348 : f32 to vector<6x128xf32>
      %456 = arith.maximumf %454, %455 : vector<6x128xf32>
      %c25 = arith.constant 25 : index
      %c0_349 = arith.constant 0 : index
      %457 = vector.load %arg14[%c25, %c0_349] : memref<72x128xf32, #tpu.memory_space<vmem>>, vector<6x128xf32>
      tpu.vector_store %arg14[%c25, %c0_349], %456 {strides = array<i32>} : memref<72x128xf32, #tpu.memory_space<vmem>>, vector<6x128xf32>,
      %c90_350 = arith.constant 90 : index
      %c0_351 = arith.constant 0 : index
      %458 = tpu.strided_load %arg13[%c90_350, %c0_351] {strides = array<i32: 2, 1>} : memref<184x128xf32, #tpu.memory_space<vmem>>, vector<6x128xf32>
      %c91_352 = arith.constant 91 : index
      %c0_353 = arith.constant 0 : index
      %459 = tpu.strided_load %arg13[%c91_352, %c0_353] {strides = array<i32: 2, 1>} : memref<184x128xf32, #tpu.memory_space<vmem>>, vector<6x128xf32>
      %460 = arith.maximumf %458, %459 : vector<6x128xf32>
      %c105 = arith.constant 105 : index
      %c0_354 = arith.constant 0 : index
      %461 = tpu.strided_load %arg13[%c105, %c0_354] {strides = array<i32: 2, 1>} : memref<184x128xf32, #tpu.memory_space<vmem>>, vector<6x128xf32>
      %462 = arith.maximumf %460, %461 : vector<6x128xf32>
      %c106_355 = arith.constant 106 : index
      %c0_356 = arith.constant 0 : index
      %463 = tpu.strided_load %arg13[%c106_355, %c0_356] {strides = array<i32: 2, 1>} : memref<184x128xf32, #tpu.memory_space<vmem>>, vector<6x128xf32>
      %464 = arith.maximumf %462, %463 : vector<6x128xf32>
      %465 = vector.broadcast %5 : vector<1x128xf32> to vector<6x128xf32>
      %466 = arith.addf %464, %465 : vector<6x128xf32>
      %cst_357 = arith.constant 0.000000e+00 : f32
      %467 = vector.broadcast %cst_357 : f32 to vector<6x128xf32>
      %468 = arith.maximumf %466, %467 : vector<6x128xf32>
      %c33_358 = arith.constant 33 : index
      %c0_359 = arith.constant 0 : index
      %469 = vector.load %arg14[%c33_358, %c0_359] : memref<72x128xf32, #tpu.memory_space<vmem>>, vector<6x128xf32>
      tpu.vector_store %arg14[%c33_358, %c0_359], %468 {strides = array<i32>} : memref<72x128xf32, #tpu.memory_space<vmem>>, vector<6x128xf32>,
      %c120_360 = arith.constant 120 : index
      %c0_361 = arith.constant 0 : index
      %470 = tpu.strided_load %arg13[%c120_360, %c0_361] {strides = array<i32: 2, 1>} : memref<184x128xf32, #tpu.memory_space<vmem>>, vector<6x128xf32>
      %c121_362 = arith.constant 121 : index
      %c0_363 = arith.constant 0 : index
      %471 = tpu.strided_load %arg13[%c121_362, %c0_363] {strides = array<i32: 2, 1>} : memref<184x128xf32, #tpu.memory_space<vmem>>, vector<6x128xf32>
      %472 = arith.maximumf %470, %471 : vector<6x128xf32>
      %c135 = arith.constant 135 : index
      %c0_364 = arith.constant 0 : index
      %473 = tpu.strided_load %arg13[%c135, %c0_364] {strides = array<i32: 2, 1>} : memref<184x128xf32, #tpu.memory_space<vmem>>, vector<6x128xf32>
      %474 = arith.maximumf %472, %473 : vector<6x128xf32>
      %c136_365 = arith.constant 136 : index
      %c0_366 = arith.constant 0 : index
      %475 = tpu.strided_load %arg13[%c136_365, %c0_366] {strides = array<i32: 2, 1>} : memref<184x128xf32, #tpu.memory_space<vmem>>, vector<6x128xf32>
      %476 = arith.maximumf %474, %475 : vector<6x128xf32>
      %477 = vector.broadcast %5 : vector<1x128xf32> to vector<6x128xf32>
      %478 = arith.addf %476, %477 : vector<6x128xf32>
      %cst_367 = arith.constant 0.000000e+00 : f32
      %479 = vector.broadcast %cst_367 : f32 to vector<6x128xf32>
      %480 = arith.maximumf %478, %479 : vector<6x128xf32>
      %c41 = arith.constant 41 : index
      %c0_368 = arith.constant 0 : index
      %481 = vector.load %arg14[%c41, %c0_368] : memref<72x128xf32, #tpu.memory_space<vmem>>, vector<6x128xf32>
      tpu.vector_store %arg14[%c41, %c0_368], %480 {strides = array<i32>} : memref<72x128xf32, #tpu.memory_space<vmem>>, vector<6x128xf32>,
      %c150_369 = arith.constant 150 : index
      %c0_370 = arith.constant 0 : index
      %482 = tpu.strided_load %arg13[%c150_369, %c0_370] {strides = array<i32: 2, 1>} : memref<184x128xf32, #tpu.memory_space<vmem>>, vector<6x128xf32>
      %c151_371 = arith.constant 151 : index
      %c0_372 = arith.constant 0 : index
      %483 = tpu.strided_load %arg13[%c151_371, %c0_372] {strides = array<i32: 2, 1>} : memref<184x128xf32, #tpu.memory_space<vmem>>, vector<6x128xf32>
      %484 = arith.maximumf %482, %483 : vector<6x128xf32>
      %c165 = arith.constant 165 : index
      %c0_373 = arith.constant 0 : index
      %485 = tpu.strided_load %arg13[%c165, %c0_373] {strides = array<i32: 2, 1>} : memref<184x128xf32, #tpu.memory_space<vmem>>, vector<6x128xf32>
      %486 = arith.maximumf %484, %485 : vector<6x128xf32>
      %c166_374 = arith.constant 166 : index
      %c0_375 = arith.constant 0 : index
      %487 = tpu.strided_load %arg13[%c166_374, %c0_375] {strides = array<i32: 2, 1>} : memref<184x128xf32, #tpu.memory_space<vmem>>, vector<6x128xf32>
      %488 = arith.maximumf %486, %487 : vector<6x128xf32>
      %489 = vector.broadcast %5 : vector<1x128xf32> to vector<6x128xf32>
      %490 = arith.addf %488, %489 : vector<6x128xf32>
      %cst_376 = arith.constant 0.000000e+00 : f32
      %491 = vector.broadcast %cst_376 : f32 to vector<6x128xf32>
      %492 = arith.maximumf %490, %491 : vector<6x128xf32>
      %c49 = arith.constant 49 : index
      %c0_377 = arith.constant 0 : index
      %493 = vector.load %arg14[%c49, %c0_377] : memref<72x128xf32, #tpu.memory_space<vmem>>, vector<6x128xf32>
      tpu.vector_store %arg14[%c49, %c0_377], %492 {strides = array<i32>} : memref<72x128xf32, #tpu.memory_space<vmem>>, vector<6x128xf32>,
      %c0_378 = arith.constant 0 : index
      %c0_379 = arith.constant 0 : index
      %494 = vector.load %arg14[%c0_378, %c0_379] : memref<72x128xf32, #tpu.memory_space<vmem>>, vector<48x128xf32>
      %495 = vector.extract_strided_slice %494 {offsets = [0, 0], sizes = [48, 32], strides = [1, 1]} : vector<48x128xf32> to vector<48x32xf32>
      %c0_380 = arith.constant 0 : index
      %c0_381 = arith.constant 0 : index
      %c0_382 = arith.constant 0 : index
      %496 = vector.load %arg6[%c0_380, %c0_381, %c0_382] : memref<9x32x128xf32, #tpu.memory_space<vmem>>, vector<1x32x128xf32>
      %497 = vector.shape_cast %496 : vector<1x32x128xf32> to vector<32x128xf32>
      %cst_383 = arith.constant dense<0.000000e+00> : vector<48x128xf32>
      %498 = tpu.matmul %495, %497, %cst_383 {dimension_numbers = #tpu.dot_dimension_numbers<[1], [0], [0], [1], [0, 0, 1, 1], [], []>} : vector<48x32xf32>, vector<32x128xf32>, vector<48x128xf32> -> vector<48x128xf32>
      %c1_384 = arith.constant 1 : index
      %c0_385 = arith.constant 0 : index
      %499 = vector.load %arg14[%c1_384, %c0_385] : memref<72x128xf32, #tpu.memory_space<vmem>>, vector<48x128xf32>
      %500 = vector.extract_strided_slice %499 {offsets = [0, 0], sizes = [48, 32], strides = [1, 1]} : vector<48x128xf32> to vector<48x32xf32>
      %c1_386 = arith.constant 1 : index
      %c0_387 = arith.constant 0 : index
      %c0_388 = arith.constant 0 : index
      %501 = vector.load %arg6[%c1_386, %c0_387, %c0_388] : memref<9x32x128xf32, #tpu.memory_space<vmem>>, vector<1x32x128xf32>
      %502 = vector.shape_cast %501 : vector<1x32x128xf32> to vector<32x128xf32>
      %cst_389 = arith.constant dense<0.000000e+00> : vector<48x128xf32>
      %503 = tpu.matmul %500, %502, %cst_389 {dimension_numbers = #tpu.dot_dimension_numbers<[1], [0], [0], [1], [0, 0, 1, 1], [], []>} : vector<48x32xf32>, vector<32x128xf32>, vector<48x128xf32> -> vector<48x128xf32>
      %504 = arith.addf %498, %503 : vector<48x128xf32>
      %c2_390 = arith.constant 2 : index
      %c0_391 = arith.constant 0 : index
      %505 = vector.load %arg14[%c2_390, %c0_391] : memref<72x128xf32, #tpu.memory_space<vmem>>, vector<48x128xf32>
      %506 = vector.extract_strided_slice %505 {offsets = [0, 0], sizes = [48, 32], strides = [1, 1]} : vector<48x128xf32> to vector<48x32xf32>
      %c2_392 = arith.constant 2 : index
      %c0_393 = arith.constant 0 : index
      %c0_394 = arith.constant 0 : index
      %507 = vector.load %arg6[%c2_392, %c0_393, %c0_394] : memref<9x32x128xf32, #tpu.memory_space<vmem>>, vector<1x32x128xf32>
      %508 = vector.shape_cast %507 : vector<1x32x128xf32> to vector<32x128xf32>
      %cst_395 = arith.constant dense<0.000000e+00> : vector<48x128xf32>
      %509 = tpu.matmul %506, %508, %cst_395 {dimension_numbers = #tpu.dot_dimension_numbers<[1], [0], [0], [1], [0, 0, 1, 1], [], []>} : vector<48x32xf32>, vector<32x128xf32>, vector<48x128xf32> -> vector<48x128xf32>
      %510 = arith.addf %504, %509 : vector<48x128xf32>
      %c8_396 = arith.constant 8 : index
      %c0_397 = arith.constant 0 : index
      %511 = vector.load %arg14[%c8_396, %c0_397] : memref<72x128xf32, #tpu.memory_space<vmem>>, vector<48x128xf32>
      %512 = vector.extract_strided_slice %511 {offsets = [0, 0], sizes = [48, 32], strides = [1, 1]} : vector<48x128xf32> to vector<48x32xf32>
      %c3_398 = arith.constant 3 : index
      %c0_399 = arith.constant 0 : index
      %c0_400 = arith.constant 0 : index
      %513 = vector.load %arg6[%c3_398, %c0_399, %c0_400] : memref<9x32x128xf32, #tpu.memory_space<vmem>>, vector<1x32x128xf32>
      %514 = vector.shape_cast %513 : vector<1x32x128xf32> to vector<32x128xf32>
      %cst_401 = arith.constant dense<0.000000e+00> : vector<48x128xf32>
      %515 = tpu.matmul %512, %514, %cst_401 {dimension_numbers = #tpu.dot_dimension_numbers<[1], [0], [0], [1], [0, 0, 1, 1], [], []>} : vector<48x32xf32>, vector<32x128xf32>, vector<48x128xf32> -> vector<48x128xf32>
      %516 = arith.addf %510, %515 : vector<48x128xf32>
      %c9_402 = arith.constant 9 : index
      %c0_403 = arith.constant 0 : index
      %517 = vector.load %arg14[%c9_402, %c0_403] : memref<72x128xf32, #tpu.memory_space<vmem>>, vector<48x128xf32>
      %518 = vector.extract_strided_slice %517 {offsets = [0, 0], sizes = [48, 32], strides = [1, 1]} : vector<48x128xf32> to vector<48x32xf32>
      %c4_404 = arith.constant 4 : index
      %c0_405 = arith.constant 0 : index
      %c0_406 = arith.constant 0 : index
      %519 = vector.load %arg6[%c4_404, %c0_405, %c0_406] : memref<9x32x128xf32, #tpu.memory_space<vmem>>, vector<1x32x128xf32>
      %520 = vector.shape_cast %519 : vector<1x32x128xf32> to vector<32x128xf32>
      %cst_407 = arith.constant dense<0.000000e+00> : vector<48x128xf32>
      %521 = tpu.matmul %518, %520, %cst_407 {dimension_numbers = #tpu.dot_dimension_numbers<[1], [0], [0], [1], [0, 0, 1, 1], [], []>} : vector<48x32xf32>, vector<32x128xf32>, vector<48x128xf32> -> vector<48x128xf32>
      %522 = arith.addf %516, %521 : vector<48x128xf32>
      %c10_408 = arith.constant 10 : index
      %c0_409 = arith.constant 0 : index
      %523 = vector.load %arg14[%c10_408, %c0_409] : memref<72x128xf32, #tpu.memory_space<vmem>>, vector<48x128xf32>
      %524 = vector.extract_strided_slice %523 {offsets = [0, 0], sizes = [48, 32], strides = [1, 1]} : vector<48x128xf32> to vector<48x32xf32>
      %c5_410 = arith.constant 5 : index
      %c0_411 = arith.constant 0 : index
      %c0_412 = arith.constant 0 : index
      %525 = vector.load %arg6[%c5_410, %c0_411, %c0_412] : memref<9x32x128xf32, #tpu.memory_space<vmem>>, vector<1x32x128xf32>
      %526 = vector.shape_cast %525 : vector<1x32x128xf32> to vector<32x128xf32>
      %cst_413 = arith.constant dense<0.000000e+00> : vector<48x128xf32>
      %527 = tpu.matmul %524, %526, %cst_413 {dimension_numbers = #tpu.dot_dimension_numbers<[1], [0], [0], [1], [0, 0, 1, 1], [], []>} : vector<48x32xf32>, vector<32x128xf32>, vector<48x128xf32> -> vector<48x128xf32>
      %528 = arith.addf %522, %527 : vector<48x128xf32>
      %c16_414 = arith.constant 16 : index
      %c0_415 = arith.constant 0 : index
      %529 = vector.load %arg14[%c16_414, %c0_415] : memref<72x128xf32, #tpu.memory_space<vmem>>, vector<48x128xf32>
      %530 = vector.extract_strided_slice %529 {offsets = [0, 0], sizes = [48, 32], strides = [1, 1]} : vector<48x128xf32> to vector<48x32xf32>
      %c6_416 = arith.constant 6 : index
      %c0_417 = arith.constant 0 : index
      %c0_418 = arith.constant 0 : index
      %531 = vector.load %arg6[%c6_416, %c0_417, %c0_418] : memref<9x32x128xf32, #tpu.memory_space<vmem>>, vector<1x32x128xf32>
      %532 = vector.shape_cast %531 : vector<1x32x128xf32> to vector<32x128xf32>
      %cst_419 = arith.constant dense<0.000000e+00> : vector<48x128xf32>
      %533 = tpu.matmul %530, %532, %cst_419 {dimension_numbers = #tpu.dot_dimension_numbers<[1], [0], [0], [1], [0, 0, 1, 1], [], []>} : vector<48x32xf32>, vector<32x128xf32>, vector<48x128xf32> -> vector<48x128xf32>
      %534 = arith.addf %528, %533 : vector<48x128xf32>
      %c17_420 = arith.constant 17 : index
      %c0_421 = arith.constant 0 : index
      %535 = vector.load %arg14[%c17_420, %c0_421] : memref<72x128xf32, #tpu.memory_space<vmem>>, vector<48x128xf32>
      %536 = vector.extract_strided_slice %535 {offsets = [0, 0], sizes = [48, 32], strides = [1, 1]} : vector<48x128xf32> to vector<48x32xf32>
      %c7_422 = arith.constant 7 : index
      %c0_423 = arith.constant 0 : index
      %c0_424 = arith.constant 0 : index
      %537 = vector.load %arg6[%c7_422, %c0_423, %c0_424] : memref<9x32x128xf32, #tpu.memory_space<vmem>>, vector<1x32x128xf32>
      %538 = vector.shape_cast %537 : vector<1x32x128xf32> to vector<32x128xf32>
      %cst_425 = arith.constant dense<0.000000e+00> : vector<48x128xf32>
      %539 = tpu.matmul %536, %538, %cst_425 {dimension_numbers = #tpu.dot_dimension_numbers<[1], [0], [0], [1], [0, 0, 1, 1], [], []>} : vector<48x32xf32>, vector<32x128xf32>, vector<48x128xf32> -> vector<48x128xf32>
      %540 = arith.addf %534, %539 : vector<48x128xf32>
      %c18_426 = arith.constant 18 : index
      %c0_427 = arith.constant 0 : index
      %541 = vector.load %arg14[%c18_426, %c0_427] : memref<72x128xf32, #tpu.memory_space<vmem>>, vector<48x128xf32>
      %542 = vector.extract_strided_slice %541 {offsets = [0, 0], sizes = [48, 32], strides = [1, 1]} : vector<48x128xf32> to vector<48x32xf32>
      %c8_428 = arith.constant 8 : index
      %c0_429 = arith.constant 0 : index
      %c0_430 = arith.constant 0 : index
      %543 = vector.load %arg6[%c8_428, %c0_429, %c0_430] : memref<9x32x128xf32, #tpu.memory_space<vmem>>, vector<1x32x128xf32>
      %544 = vector.shape_cast %543 : vector<1x32x128xf32> to vector<32x128xf32>
      %cst_431 = arith.constant dense<0.000000e+00> : vector<48x128xf32>
      %545 = tpu.matmul %542, %544, %cst_431 {dimension_numbers = #tpu.dot_dimension_numbers<[1], [0], [0], [1], [0, 0, 1, 1], [], []>} : vector<48x32xf32>, vector<32x128xf32>, vector<48x128xf32> -> vector<48x128xf32>
      %546 = arith.addf %540, %545 : vector<48x128xf32>
      %c0_432 = arith.constant 0 : index
      %c0_433 = arith.constant 0 : index
      %547 = vector.load %arg15[%c0_432, %c0_433] : memref<48x128xf32, #tpu.memory_space<vmem>>, vector<48x128xf32>
      tpu.vector_store %arg15[%c0_432, %c0_433], %546 {strides = array<i32>} : memref<48x128xf32, #tpu.memory_space<vmem>>, vector<48x128xf32>,
      %c0_434 = arith.constant 0 : index
      %c0_435 = arith.constant 0 : index
      %548 = tpu.strided_load %arg15[%c0_434, %c0_435] {strides = array<i32: 2, 1>} : memref<48x128xf32, #tpu.memory_space<vmem>>, vector<3x128xf32>
      %c1_436 = arith.constant 1 : index
      %c0_437 = arith.constant 0 : index
      %549 = tpu.strided_load %arg15[%c1_436, %c0_437] {strides = array<i32: 2, 1>} : memref<48x128xf32, #tpu.memory_space<vmem>>, vector<3x128xf32>
      %550 = arith.maximumf %548, %549 : vector<3x128xf32>
      %c8_438 = arith.constant 8 : index
      %c0_439 = arith.constant 0 : index
      %551 = tpu.strided_load %arg15[%c8_438, %c0_439] {strides = array<i32: 2, 1>} : memref<48x128xf32, #tpu.memory_space<vmem>>, vector<3x128xf32>
      %552 = arith.maximumf %550, %551 : vector<3x128xf32>
      %c9_440 = arith.constant 9 : index
      %c0_441 = arith.constant 0 : index
      %553 = tpu.strided_load %arg15[%c9_440, %c0_441] {strides = array<i32: 2, 1>} : memref<48x128xf32, #tpu.memory_space<vmem>>, vector<3x128xf32>
      %554 = arith.maximumf %552, %553 : vector<3x128xf32>
      %555 = vector.broadcast %6 : vector<1x128xf32> to vector<3x128xf32>
      %556 = arith.addf %554, %555 : vector<3x128xf32>
      %cst_442 = arith.constant 0.000000e+00 : f32
      %557 = vector.broadcast %cst_442 : f32 to vector<3x128xf32>
      %558 = arith.maximumf %556, %557 : vector<3x128xf32>
      %c0_i32_443 = arith.constant 0 : i32
      %559 = arith.addi %68, %c0_i32_443 : i32
      %c0_i32_444 = arith.constant 0 : i32
      %560 = arith.addi %559, %c0_i32_444 : i32
      %561 = arith.index_cast %560 : i32 to index
      %c0_445 = arith.constant 0 : index
      %562 = vector.load %arg16[%561, %c0_445] : memref<128x128xf32, #tpu.memory_space<vmem>>, vector<3x128xf32>
      tpu.vector_store %arg16[%561, %c0_445], %558 {strides = array<i32>} : memref<128x128xf32, #tpu.memory_space<vmem>>, vector<3x128xf32>,
      %c16_446 = arith.constant 16 : index
      %c0_447 = arith.constant 0 : index
      %563 = tpu.strided_load %arg15[%c16_446, %c0_447] {strides = array<i32: 2, 1>} : memref<48x128xf32, #tpu.memory_space<vmem>>, vector<3x128xf32>
      %c17_448 = arith.constant 17 : index
      %c0_449 = arith.constant 0 : index
      %564 = tpu.strided_load %arg15[%c17_448, %c0_449] {strides = array<i32: 2, 1>} : memref<48x128xf32, #tpu.memory_space<vmem>>, vector<3x128xf32>
      %565 = arith.maximumf %563, %564 : vector<3x128xf32>
      %c24 = arith.constant 24 : index
      %c0_450 = arith.constant 0 : index
      %566 = tpu.strided_load %arg15[%c24, %c0_450] {strides = array<i32: 2, 1>} : memref<48x128xf32, #tpu.memory_space<vmem>>, vector<3x128xf32>
      %567 = arith.maximumf %565, %566 : vector<3x128xf32>
      %c25_451 = arith.constant 25 : index
      %c0_452 = arith.constant 0 : index
      %568 = tpu.strided_load %arg15[%c25_451, %c0_452] {strides = array<i32: 2, 1>} : memref<48x128xf32, #tpu.memory_space<vmem>>, vector<3x128xf32>
      %569 = arith.maximumf %567, %568 : vector<3x128xf32>
      %570 = vector.broadcast %6 : vector<1x128xf32> to vector<3x128xf32>
      %571 = arith.addf %569, %570 : vector<3x128xf32>
      %cst_453 = arith.constant 0.000000e+00 : f32
      %572 = vector.broadcast %cst_453 : f32 to vector<3x128xf32>
      %573 = arith.maximumf %571, %572 : vector<3x128xf32>
      %c3_i32 = arith.constant 3 : i32
      %574 = arith.addi %68, %c3_i32 : i32
      %c0_i32_454 = arith.constant 0 : i32
      %575 = arith.addi %574, %c0_i32_454 : i32
      %576 = arith.index_cast %575 : i32 to index
      %c0_455 = arith.constant 0 : index
      %577 = vector.load %arg16[%576, %c0_455] : memref<128x128xf32, #tpu.memory_space<vmem>>, vector<3x128xf32>
      tpu.vector_store %arg16[%576, %c0_455], %573 {strides = array<i32>} : memref<128x128xf32, #tpu.memory_space<vmem>>, vector<3x128xf32>,
      %c32_456 = arith.constant 32 : index
      %c0_457 = arith.constant 0 : index
      %578 = tpu.strided_load %arg15[%c32_456, %c0_457] {strides = array<i32: 2, 1>} : memref<48x128xf32, #tpu.memory_space<vmem>>, vector<3x128xf32>
      %c33_458 = arith.constant 33 : index
      %c0_459 = arith.constant 0 : index
      %579 = tpu.strided_load %arg15[%c33_458, %c0_459] {strides = array<i32: 2, 1>} : memref<48x128xf32, #tpu.memory_space<vmem>>, vector<3x128xf32>
      %580 = arith.maximumf %578, %579 : vector<3x128xf32>
      %c40 = arith.constant 40 : index
      %c0_460 = arith.constant 0 : index
      %581 = tpu.strided_load %arg15[%c40, %c0_460] {strides = array<i32: 2, 1>} : memref<48x128xf32, #tpu.memory_space<vmem>>, vector<3x128xf32>
      %582 = arith.maximumf %580, %581 : vector<3x128xf32>
      %c41_461 = arith.constant 41 : index
      %c0_462 = arith.constant 0 : index
      %583 = tpu.strided_load %arg15[%c41_461, %c0_462] {strides = array<i32: 2, 1>} : memref<48x128xf32, #tpu.memory_space<vmem>>, vector<3x128xf32>
      %584 = arith.maximumf %582, %583 : vector<3x128xf32>
      %585 = vector.broadcast %6 : vector<1x128xf32> to vector<3x128xf32>
      %586 = arith.addf %584, %585 : vector<3x128xf32>
      %cst_463 = arith.constant 0.000000e+00 : f32
      %587 = vector.broadcast %cst_463 : f32 to vector<3x128xf32>
      %588 = arith.maximumf %586, %587 : vector<3x128xf32>
      %c6_i32 = arith.constant 6 : i32
      %589 = arith.addi %68, %c6_i32 : i32
      %c0_i32_464 = arith.constant 0 : i32
      %590 = arith.addi %589, %c0_i32_464 : i32
      %591 = arith.index_cast %590 : i32 to index
      %c0_465 = arith.constant 0 : index
      %592 = vector.load %arg16[%591, %c0_465] : memref<128x128xf32, #tpu.memory_space<vmem>>, vector<3x128xf32>
      tpu.vector_store %arg16[%591, %c0_465], %588 {strides = array<i32>} : memref<128x128xf32, #tpu.memory_space<vmem>>, vector<3x128xf32>,
    }
    %c8_i32_10 = arith.constant 8 : i32
    %c0_11 = arith.constant 0 : index
    %c0_12 = arith.constant 0 : index
    %8 = tpu.strided_load %arg16[%c0_11, %c0_12] {strides = array<i32: 16, 1>} : memref<128x128xf32, #tpu.memory_space<vmem>>, vector<8x128xf32>
    %9 = vector.extract_strided_slice %8 {offsets = [0, 0], sizes = [8, 32], strides = [1, 1]} : vector<8x128xf32> to vector<8x32xf32>
    %c0_13 = arith.constant 0 : index
    %c0_14 = arith.constant 0 : index
    %c0_15 = arith.constant 0 : index
    %10 = vector.load %arg8[%c0_13, %c0_14, %c0_15] : memref<9x32x128xf32, #tpu.memory_space<vmem>>, vector<1x32x128xf32>
    %11 = vector.shape_cast %10 : vector<1x32x128xf32> to vector<32x128xf32>
    %cst_16 = arith.constant dense<0.000000e+00> : vector<8x128xf32>
    %12 = tpu.matmul %9, %11, %cst_16 {dimension_numbers = #tpu.dot_dimension_numbers<[1], [0], [0], [1], [0, 0, 1, 1], [], []>} : vector<8x32xf32>, vector<32x128xf32>, vector<8x128xf32> -> vector<8x128xf32>
    %c1 = arith.constant 1 : index
    %c0_17 = arith.constant 0 : index
    %13 = tpu.strided_load %arg16[%c1, %c0_17] {strides = array<i32: 16, 1>} : memref<128x128xf32, #tpu.memory_space<vmem>>, vector<8x128xf32>
    %14 = vector.extract_strided_slice %13 {offsets = [0, 0], sizes = [8, 32], strides = [1, 1]} : vector<8x128xf32> to vector<8x32xf32>
    %c1_18 = arith.constant 1 : index
    %c0_19 = arith.constant 0 : index
    %c0_20 = arith.constant 0 : index
    %15 = vector.load %arg8[%c1_18, %c0_19, %c0_20] : memref<9x32x128xf32, #tpu.memory_space<vmem>>, vector<1x32x128xf32>
    %16 = vector.shape_cast %15 : vector<1x32x128xf32> to vector<32x128xf32>
    %cst_21 = arith.constant dense<0.000000e+00> : vector<8x128xf32>
    %17 = tpu.matmul %14, %16, %cst_21 {dimension_numbers = #tpu.dot_dimension_numbers<[1], [0], [0], [1], [0, 0, 1, 1], [], []>} : vector<8x32xf32>, vector<32x128xf32>, vector<8x128xf32> -> vector<8x128xf32>
    %c2 = arith.constant 2 : index
    %c0_22 = arith.constant 0 : index
    %18 = tpu.strided_load %arg16[%c2, %c0_22] {strides = array<i32: 16, 1>} : memref<128x128xf32, #tpu.memory_space<vmem>>, vector<8x128xf32>
    %19 = vector.extract_strided_slice %18 {offsets = [0, 0], sizes = [8, 32], strides = [1, 1]} : vector<8x128xf32> to vector<8x32xf32>
    %c2_23 = arith.constant 2 : index
    %c0_24 = arith.constant 0 : index
    %c0_25 = arith.constant 0 : index
    %20 = vector.load %arg8[%c2_23, %c0_24, %c0_25] : memref<9x32x128xf32, #tpu.memory_space<vmem>>, vector<1x32x128xf32>
    %21 = vector.shape_cast %20 : vector<1x32x128xf32> to vector<32x128xf32>
    %cst_26 = arith.constant dense<0.000000e+00> : vector<8x128xf32>
    %22 = tpu.matmul %19, %21, %cst_26 {dimension_numbers = #tpu.dot_dimension_numbers<[1], [0], [0], [1], [0, 0, 1, 1], [], []>} : vector<8x32xf32>, vector<32x128xf32>, vector<8x128xf32> -> vector<8x128xf32>
    %c3 = arith.constant 3 : index
    %c0_27 = arith.constant 0 : index
    %23 = tpu.strided_load %arg16[%c3, %c0_27] {strides = array<i32: 16, 1>} : memref<128x128xf32, #tpu.memory_space<vmem>>, vector<8x128xf32>
    %24 = vector.extract_strided_slice %23 {offsets = [0, 0], sizes = [8, 32], strides = [1, 1]} : vector<8x128xf32> to vector<8x32xf32>
    %c3_28 = arith.constant 3 : index
    %c0_29 = arith.constant 0 : index
    %c0_30 = arith.constant 0 : index
    %25 = vector.load %arg8[%c3_28, %c0_29, %c0_30] : memref<9x32x128xf32, #tpu.memory_space<vmem>>, vector<1x32x128xf32>
    %26 = vector.shape_cast %25 : vector<1x32x128xf32> to vector<32x128xf32>
    %cst_31 = arith.constant dense<0.000000e+00> : vector<8x128xf32>
    %27 = tpu.matmul %24, %26, %cst_31 {dimension_numbers = #tpu.dot_dimension_numbers<[1], [0], [0], [1], [0, 0, 1, 1], [], []>} : vector<8x32xf32>, vector<32x128xf32>, vector<8x128xf32> -> vector<8x128xf32>
    %28 = arith.addf %12, %27 : vector<8x128xf32>
    %c4 = arith.constant 4 : index
    %c0_32 = arith.constant 0 : index
    %29 = tpu.strided_load %arg16[%c4, %c0_32] {strides = array<i32: 16, 1>} : memref<128x128xf32, #tpu.memory_space<vmem>>, vector<8x128xf32>
    %30 = vector.extract_strided_slice %29 {offsets = [0, 0], sizes = [8, 32], strides = [1, 1]} : vector<8x128xf32> to vector<8x32xf32>
    %c4_33 = arith.constant 4 : index
    %c0_34 = arith.constant 0 : index
    %c0_35 = arith.constant 0 : index
    %31 = vector.load %arg8[%c4_33, %c0_34, %c0_35] : memref<9x32x128xf32, #tpu.memory_space<vmem>>, vector<1x32x128xf32>
    %32 = vector.shape_cast %31 : vector<1x32x128xf32> to vector<32x128xf32>
    %cst_36 = arith.constant dense<0.000000e+00> : vector<8x128xf32>
    %33 = tpu.matmul %30, %32, %cst_36 {dimension_numbers = #tpu.dot_dimension_numbers<[1], [0], [0], [1], [0, 0, 1, 1], [], []>} : vector<8x32xf32>, vector<32x128xf32>, vector<8x128xf32> -> vector<8x128xf32>
    %34 = arith.addf %17, %33 : vector<8x128xf32>
    %c5 = arith.constant 5 : index
    %c0_37 = arith.constant 0 : index
    %35 = tpu.strided_load %arg16[%c5, %c0_37] {strides = array<i32: 16, 1>} : memref<128x128xf32, #tpu.memory_space<vmem>>, vector<8x128xf32>
    %36 = vector.extract_strided_slice %35 {offsets = [0, 0], sizes = [8, 32], strides = [1, 1]} : vector<8x128xf32> to vector<8x32xf32>
    %c5_38 = arith.constant 5 : index
    %c0_39 = arith.constant 0 : index
    %c0_40 = arith.constant 0 : index
    %37 = vector.load %arg8[%c5_38, %c0_39, %c0_40] : memref<9x32x128xf32, #tpu.memory_space<vmem>>, vector<1x32x128xf32>
    %38 = vector.shape_cast %37 : vector<1x32x128xf32> to vector<32x128xf32>
    %cst_41 = arith.constant dense<0.000000e+00> : vector<8x128xf32>
    %39 = tpu.matmul %36, %38, %cst_41 {dimension_numbers = #tpu.dot_dimension_numbers<[1], [0], [0], [1], [0, 0, 1, 1], [], []>} : vector<8x32xf32>, vector<32x128xf32>, vector<8x128xf32> -> vector<8x128xf32>
    %40 = arith.addf %22, %39 : vector<8x128xf32>
    %c6 = arith.constant 6 : index
    %c0_42 = arith.constant 0 : index
    %41 = tpu.strided_load %arg16[%c6, %c0_42] {strides = array<i32: 16, 1>} : memref<128x128xf32, #tpu.memory_space<vmem>>, vector<8x128xf32>
    %42 = vector.extract_strided_slice %41 {offsets = [0, 0], sizes = [8, 32], strides = [1, 1]} : vector<8x128xf32> to vector<8x32xf32>
    %c6_43 = arith.constant 6 : index
    %c0_44 = arith.constant 0 : index
    %c0_45 = arith.constant 0 : index
    %43 = vector.load %arg8[%c6_43, %c0_44, %c0_45] : memref<9x32x128xf32, #tpu.memory_space<vmem>>, vector<1x32x128xf32>
    %44 = vector.shape_cast %43 : vector<1x32x128xf32> to vector<32x128xf32>
    %cst_46 = arith.constant dense<0.000000e+00> : vector<8x128xf32>
    %45 = tpu.matmul %42, %44, %cst_46 {dimension_numbers = #tpu.dot_dimension_numbers<[1], [0], [0], [1], [0, 0, 1, 1], [], []>} : vector<8x32xf32>, vector<32x128xf32>, vector<8x128xf32> -> vector<8x128xf32>
    %46 = arith.addf %28, %45 : vector<8x128xf32>
    %c7 = arith.constant 7 : index
    %c0_47 = arith.constant 0 : index
    %47 = tpu.strided_load %arg16[%c7, %c0_47] {strides = array<i32: 16, 1>} : memref<128x128xf32, #tpu.memory_space<vmem>>, vector<8x128xf32>
    %48 = vector.extract_strided_slice %47 {offsets = [0, 0], sizes = [8, 32], strides = [1, 1]} : vector<8x128xf32> to vector<8x32xf32>
    %c7_48 = arith.constant 7 : index
    %c0_49 = arith.constant 0 : index
    %c0_50 = arith.constant 0 : index
    %49 = vector.load %arg8[%c7_48, %c0_49, %c0_50] : memref<9x32x128xf32, #tpu.memory_space<vmem>>, vector<1x32x128xf32>
    %50 = vector.shape_cast %49 : vector<1x32x128xf32> to vector<32x128xf32>
    %cst_51 = arith.constant dense<0.000000e+00> : vector<8x128xf32>
    %51 = tpu.matmul %48, %50, %cst_51 {dimension_numbers = #tpu.dot_dimension_numbers<[1], [0], [0], [1], [0, 0, 1, 1], [], []>} : vector<8x32xf32>, vector<32x128xf32>, vector<8x128xf32> -> vector<8x128xf32>
    %52 = arith.addf %34, %51 : vector<8x128xf32>
    %c8 = arith.constant 8 : index
    %c0_52 = arith.constant 0 : index
    %53 = tpu.strided_load %arg16[%c8, %c0_52] {strides = array<i32: 16, 1>} : memref<128x128xf32, #tpu.memory_space<vmem>>, vector<8x128xf32>
    %54 = vector.extract_strided_slice %53 {offsets = [0, 0], sizes = [8, 32], strides = [1, 1]} : vector<8x128xf32> to vector<8x32xf32>
    %c8_53 = arith.constant 8 : index
    %c0_54 = arith.constant 0 : index
    %c0_55 = arith.constant 0 : index
    %55 = vector.load %arg8[%c8_53, %c0_54, %c0_55] : memref<9x32x128xf32, #tpu.memory_space<vmem>>, vector<1x32x128xf32>
    %56 = vector.shape_cast %55 : vector<1x32x128xf32> to vector<32x128xf32>
    %cst_56 = arith.constant dense<0.000000e+00> : vector<8x128xf32>
    %57 = tpu.matmul %54, %56, %cst_56 {dimension_numbers = #tpu.dot_dimension_numbers<[1], [0], [0], [1], [0, 0, 1, 1], [], []>} : vector<8x32xf32>, vector<32x128xf32>, vector<8x128xf32> -> vector<8x128xf32>
    %58 = arith.addf %40, %57 : vector<8x128xf32>
    %59 = arith.addf %46, %52 : vector<8x128xf32>
    %60 = arith.addf %59, %58 : vector<8x128xf32>
    %c0_57 = arith.constant 0 : index
    %c0_58 = arith.constant 0 : index
    %61 = vector.load %arg9[%c0_57, %c0_58] : memref<1x128xf32, #tpu.memory_space<vmem>>, vector<1x128xf32>
    %62 = vector.broadcast %61 : vector<1x128xf32> to vector<8x128xf32>
    %63 = arith.addf %60, %62 : vector<8x128xf32>
    %c0_59 = arith.constant 0 : index
    %c0_60 = arith.constant 0 : index
    %64 = vector.load %arg10[%c0_59, %c0_60] : memref<8x128xf32, #tpu.memory_space<vmem>>, vector<8x128xf32>
    tpu.vector_store %arg10[%c0_59, %c0_60], %63 {strides = array<i32>} : memref<8x128xf32, #tpu.memory_space<vmem>>, vector<8x128xf32>,
    return
  }
  func.func @transform_0(%arg0: i32) -> (i32, i32) {
    %c0_i32 = arith.constant 0 : i32
    %c0_i32_0 = arith.constant 0 : i32
    return %arg0, %c0_i32 : i32, i32
  }
  func.func @transform_1(%arg0: i32) -> (i32, i32) {
    %c0_i32 = arith.constant 0 : i32
    %c0_i32_0 = arith.constant 0 : i32
    %c0_i32_1 = arith.constant 0 : i32
    return %c0_i32, %c0_i32_0 : i32, i32
  }
  func.func @transform_2(%arg0: i32) -> (i32, i32) {
    %c0_i32 = arith.constant 0 : i32
    %c0_i32_0 = arith.constant 0 : i32
    %c0_i32_1 = arith.constant 0 : i32
    return %c0_i32, %c0_i32_0 : i32, i32
  }
  func.func @transform_3(%arg0: i32) -> (i32, i32, i32) {
    %c0_i32 = arith.constant 0 : i32
    %c0_i32_0 = arith.constant 0 : i32
    %c0_i32_1 = arith.constant 0 : i32
    %c0_i32_2 = arith.constant 0 : i32
    return %c0_i32, %c0_i32_0, %c0_i32_1 : i32, i32, i32
  }
  func.func @transform_4(%arg0: i32) -> (i32, i32) {
    %c0_i32 = arith.constant 0 : i32
    %c0_i32_0 = arith.constant 0 : i32
    %c0_i32_1 = arith.constant 0 : i32
    return %c0_i32, %c0_i32_0 : i32, i32
  }
  func.func @transform_5(%arg0: i32) -> (i32, i32, i32) {
    %c0_i32 = arith.constant 0 : i32
    %c0_i32_0 = arith.constant 0 : i32
    %c0_i32_1 = arith.constant 0 : i32
    %c0_i32_2 = arith.constant 0 : i32
    return %c0_i32, %c0_i32_0, %c0_i32_1 : i32, i32, i32
  }
  func.func @transform_6(%arg0: i32) -> (i32, i32) {
    %c0_i32 = arith.constant 0 : i32
    %c0_i32_0 = arith.constant 0 : i32
    %c0_i32_1 = arith.constant 0 : i32
    return %c0_i32, %c0_i32_0 : i32, i32
  }
  func.func @transform_7(%arg0: i32) -> (i32, i32, i32) {
    %c0_i32 = arith.constant 0 : i32
    %c0_i32_0 = arith.constant 0 : i32
    %c0_i32_1 = arith.constant 0 : i32
    %c0_i32_2 = arith.constant 0 : i32
    return %c0_i32, %c0_i32_0, %c0_i32_1 : i32, i32, i32
  }
  func.func @transform_8(%arg0: i32) -> (i32, i32) {
    %c0_i32 = arith.constant 0 : i32
    %c0_i32_0 = arith.constant 0 : i32
    %c0_i32_1 = arith.constant 0 : i32
    return %c0_i32, %c0_i32_0 : i32, i32
  }
  func.func @transform_9(%arg0: i32) -> (i32, i32) {
    %c0_i32 = arith.constant 0 : i32
    %c0_i32_0 = arith.constant 0 : i32
    return %arg0, %c0_i32 : i32, i32
  }
}

</mosaic_0001>

<bundles_post_ra>
// kernel: cnn_forward.1
= control target key start
LH: loop header
LB: loop body
LE: loop exit
PB: predicated region body
PF: predicated region fallthrough
CT: control target
= control target key end

     0   :  { %s15703_s0 = inlined_call_operand.vmem [shape: f32[12544,25], index: 0, kind: input, shape index: {}]   ;;  %s15704_s1 = inlined_call_operand.vmem [shape: f32[25,128], index: 1, kind: input, shape index: {}]   ;;  %s15705_s2 = inlined_call_operand.vmem [shape: f32[1,128], index: 2, kind: input, shape index: {}]   ;;  %s15706_s3 = inlined_call_operand.vmem [shape: f32[16,16,128], index: 3, kind: input, shape index: {}]   ;;  %s15707_s4 = inlined_call_operand.vmem [shape: f32[1,128], index: 4, kind: input, shape index: {}]   ;;  %s15708_s5 = inlined_call_operand.vmem [shape: f32[9,32,128], index: 5, kind: input, shape index: {}]   ;;  %s15709_s6 = inlined_call_operand.vmem [shape: f32[1,128], index: 6, kind: input, shape index: {}]   ;;  %s15710_s7 = inlined_call_operand.vmem [shape: f32[9,32,128], index: 7, kind: input, shape index: {}]   ;;  %s15711_s8 = inlined_call_operand.vmem [shape: f32[1,128], index: 8, kind: input, shape index: {}]   ;;  %s15712_s9 = inlined_call_operand.hbm [shape: f32[16,128], index: 9, kind: output, shape index: {}]  }
   0x1   :  { %15714 = sst [smem:[#allocation11_spill]] %s15703_s0 }
   0x2   :  { %14 = vsyncpa [#allocation9], 0 }
   0x3   :  { %16 = vsyncpa [#allocation9 + $0x1], 0  ;;  %s13486_s30 = smov 0   ;;  %s13488_s10 = smov 0  }
   0x4   :  { %s13490_s11 = smov 0   ;;  %s13492_s12 = smov 0  }
   0x5 LB: > { %s13507_s13 = sadd.s32 4294967295, %s13422_s12   ;;  %s9803_s14 = sadd.s32 4294967294, %s13422_s12   ;;  %s13422_s12 = sphi %s13492_s12, %s15724_s12   ;;  %s13418_s11 = sphi %s13490_s11, %s15723_s11   ;;  %s13414_s10 = sphi %s13488_s10, %s15722_s10   ;;  %s13410_s30 = sphi %s13486_s30, %s15721_s30  }
   0x6   : > { %s13511_s15 = sadd.s32 1, %s13422_s12   ;;  %s223_s16 = sadd.s32 1, %s13418_s11 }
   0x7   : > { %s220_s17 = ssub.s32 %s13422_s12, %s13511_s15  ;;  %p233_p0 = scmp.ne.s32.totalorder %s13418_s11, %s13414_s10 }
   0x8   : > { %p221_p1 = scmp.eq.s32.totalorder %s220_s17, 0  ;;  %p234_p2 = scmp.eq.s32.totalorder %s13507_s13, 1 }
   0x9   : > { %p239_p3 = scmp.ne.s32.totalorder %s13414_s10, %s13410_s30  ;;  %p240_p4 = scmp.eq.s32.totalorder %s9803_s14, 1 }
   0xa   : > { %s13522_s18 = scalar_select %p221_p1, %s13418_s11, %s223_s16  }
   0xb   : > { %p13524_p5 = por %p234_p2, %p233_p0  ;;  %p13528_p6 = por %p240_p4, %p239_p3 }
   0xc   : > { %p9806_p7 = scmp.ge.s32.totalorder %s13422_s12, 1  ;;  %p291_p8 = scmp.lt.s32.totalorder %s13422_s12, 3 }
   0xe   : > { %p292_p9 = pnand %p9806_p7, %p291_p8 }
   0xf   : > { %s15713_s21 = sand.u32 (!%p292_p9), 1, %s13414_s10   ;;  %s327_s22 = smul.u32 (!%p292_p9), 784, %s13507_s13  ;;  %v13539_v0 = vld [vmem:[%s15705_s2] ss:$0 sm:$0xff] (!%p292_p9)  ;;  %v13428_v1 = vmov (!%p292_p9), 0.0  }
  0x10   : > { %295 = sbr.rel (%p292_p9) target bundleno = 1940 (0x794), region = 56  ;;  %s13543_s25 = sshll.u32 (!%p292_p9), %s15713_s21, 3  ;;  %333 = vst [vmem:[#allocation3] sm:$0xff] (!%p292_p9), %v13428_v1  ;;  %334 = vst [vmem:[#allocation3 + $0x8] sm:$0xff] (!%p292_p9), %v13428_v1  ;;  %v13586_v2 = vld [vmem:[%s15707_s4] ss:$0 sm:$0xff] (!%p292_p9) }
  0x11   : > { %335 = vst [vmem:[#allocation3 + $0x10] sm:$0xff] (!%p292_p9), %v13428_v1  ;;  %336 = vst [vmem:[#allocation3 + $0x18] sm:$0xff] (!%p292_p9), %v13428_v1  ;;  %v13591_v3 = vld [vmem:[%s15709_s6] ss:$0 sm:$0xff] (!%p292_p9)  ;;  %p328_p10 = scmp.lt.s32.totalorder (!%p292_p9), %s327_s22, 1567  ;;  %s15717_s0 = sld [smem:[#allocation11_spill]] (!%p292_p9) }
  0x12   : > { %337 = vst [vmem:[#allocation3 + $0x20] sm:$0xff] (!%p292_p9), %v13428_v1  ;;  %338 = vst [vmem:[#allocation3 + $0x28] sm:$0xff] (!%p292_p9), %v13428_v1  ;;  %s13603_s21 = smov (!%p292_p9), 0  }
  0x13   : > { %339 = vst [vmem:[#allocation3 + $0x30] sm:$0xff] (!%p292_p9), %v13428_v1  ;;  %340 = vst [vmem:[#allocation3 + $0x38] sm:$0xff] (!%p292_p9), %v13428_v1 }
  0x14   : > { %341 = vst [vmem:[#allocation3 + $0x40] sm:$0xff] (!%p292_p9), %v13428_v1  ;;  %342 = vst [vmem:[#allocation3 + $0x48] sm:$0xff] (!%p292_p9), %v13428_v1 }
  0x15   : > { %343 = vst [vmem:[#allocation3 + $0x50] sm:$0xff] (!%p292_p9), %v13428_v1  ;;  %344 = vst [vmem:[#allocation3 + $0x58] sm:$0xff] (!%p292_p9), %v13428_v1 }
  0x16   : > { %345 = vst [vmem:[#allocation3 + $0x60] sm:$0xff] (!%p292_p9), %v13428_v1  ;;  %346 = vst [vmem:[#allocation3 + $0x68] sm:$0xff] (!%p292_p9), %v13428_v1 }
  0x17   : > { %347 = vst [vmem:[#allocation3 + $0x70] sm:$0xff] %v13428_v1  ;;  %348 = vst [vmem:[#allocation3 + $0x78] sm:$0xff] %v13428_v1  ;;  %s15726_s22 = smov (!%p328_p10, %s327_s22), 1567 }
  0x18   : > { %349 = vst [vmem:[#allocation3 + $0x80] sm:$0xff] %v13428_v1  ;;  %350 = vst [vmem:[#allocation3 + $0x88] sm:$0xff] %v13428_v1  ;;  %s9808_s14 = sshll.u32 %s15726_s22, 3 }
  0x19   : > { %351 = vst [vmem:[#allocation3 + $0x90] sm:$0xff] %v13428_v1  ;;  %352 = vst [vmem:[#allocation3 + $0x98] sm:$0xff] %v13428_v1  ;;  %s13600_s23 = scalar_lea.vmem %s15717_s0, %s9808_s14 }
  0x1a   : > { %353 = vst [vmem:[#allocation3 + $0xa0] sm:$0xff] %v13428_v1  ;;  %354 = vst [vmem:[#allocation3 + $0xa8] sm:$0xff] %v13428_v1 }
  0x1b   : > { %355 = vst [vmem:[#allocation3 + $0xb0] sm:$0xff] %v13428_v1  ;;  %356 = vst [vmem:[#allocation3 + $0xb8] sm:$0xff] %v13428_v1 }
  0x1c   : > { %357 = vst [vmem:[#allocation3 + $0xc0] sm:$0xff] %v13428_v1  ;;  %358 = vst [vmem:[#allocation3 + $0xc8] sm:$0xff] %v13428_v1 }
  0x1d   : > { %359 = vst [vmem:[#allocation3 + $0xd0] sm:$0xff] %v13428_v1  ;;  %360 = vst [vmem:[#allocation3 + $0xd8] sm:$0xff] %v13428_v1 }
  0x1e   : > { %361 = vst [vmem:[#allocation3 + $0xe0] sm:$0xff] %v13428_v1  ;;  %362 = vst [vmem:[#allocation5] sm:$0xff] %v13428_v1 }
  0x1f   : > { %363 = vst [vmem:[#allocation5 + $0x8] sm:$0xff] %v13428_v1  ;;  %364 = vst [vmem:[#allocation5 + $0x10] sm:$0xff] %v13428_v1 }
  0x20   : > { %365 = vst [vmem:[#allocation5 + $0x18] sm:$0xff] %v13428_v1  ;;  %366 = vst [vmem:[#allocation5 + $0x20] sm:$0xff] %v13428_v1 }
  0x21   : > { %367 = vst [vmem:[#allocation5 + $0x28] sm:$0xff] %v13428_v1  ;;  %368 = vst [vmem:[#allocation5 + $0x30] sm:$0xff] %v13428_v1 }
  0x22   : > { %369 = vst [vmem:[#allocation5 + $0x38] sm:$0xff] %v13428_v1  ;;  %370 = vst [vmem:[#allocation5 + $0x40] sm:$0xff] %v13428_v1 }
  0x23 LB: >> { %v481_v4 = vld [vmem:[%s15704_s1] sm:$0xff]  ;;  %v482_v5 = vld [vmem:[%s15704_s1 + $0x8] sm:$0xff]  ;;  %v483_v6 = vld [vmem:[%s15704_s1 + $0x10] sm:$0xff]  ;;  %vm780_vm0 = vcmask 1040384   ;;  %vm13429_vm1 = vmmov 1   ;;  %s380_s26 = smul.u32 784, %s13426_s21  ;;  %s13426_s21 = sphi %s13603_s21, %s379_s21  }
  0x24   : >> { %v12496_v7 = vpack.c.bf16 %v482_v5, %v481_v4  ;;  %v484_v8 = vld [vmem:[%s15704_s1 + $0x18] sm:$0x1]  ;;  %vm12501_vm2 = vmpackc.low %vm780_vm0, %vm13429_vm1  ;;  %vm485_vm3 = vcmask 203776   ;;  %vm1835_vm4 = vcmask 130048   ;;  %vm13431_vm5 = vmmov 0   ;;  %s9809_s29 = sshll.u32 %s13426_s21, 4 }
  0x25   : >> { %v12500_v9 = vpack.c.bf16 %v484_v8, %v483_v6  ;;  %s13622_s27 = scalar_lea.vmem %s13600_s23, %s380_s26  ;;  %vm7733_vm6 = vcmask 261120   ;;  %s8894_s14 = scalar_lea.vmem [#allocation7], %s9809_s29 }
  0x26   : >> { %12497 = vmatprep.subr.bf16.mxu1 %v12496_v7  ;;  %v383_v10 = vld [vmem:[%s13622_s27] sm:$0xff]  ;;  %v384_v11 = vld [vmem:[%s13622_s27 + $0x8] sm:$0xff]  ;;  %v385_v12 = vld [vmem:[%s13622_s27 + $0x10] sm:$0xff]  ;;  %s379_s21 = sadd.s32 1, %s13426_s21  }
  0x27   : >> { %12499 = vmatpush3.bf16.msra.mxu1 %v12496_v7  ;;  %11153 = vmatprep.mubr.msk.f32.mxu1 %vm485_vm3, %v383_v10  ;;  %v386_v13 = vld [vmem:[%s13622_s27 + $0x18] sm:$0xff]  ;;  %v387_v14 = vld [vmem:[%s13622_s27 + $0x20] sm:$0xff]  ;;  %v388_v15 = vld [vmem:[%s13622_s27 + $0x28] sm:$0xff]  ;;  %p376_p11 = scmp.ge.s32.totalorder %s379_s21, 8  }
  0x28   : >> { %12502 = vmatprep.subr.msk.bf16.mxu1 %vm12501_vm2, %v12500_v9  ;;  %v389_v16 = vld [vmem:[%s13622_s27 + $0x30] sm:$0xff]  ;;  %v390_v17 = vld [vmem:[%s13622_s27 + $0x38] sm:$0xff]  ;;  %v391_v18 = vld [vmem:[%s13622_s27 + $0x40] sm:$0xff]  ;;  %vm13434_vm7 = vmmov (%p376_p11), 0   ;;  %s10473_s26 = sshll.u32 (%p376_p11), %s13507_s13, 7  ;;  %s15718_s22 = scalar_lea.vmem (%p376_p11), [#allocation8], %s13543_s25 }
  0x29   : >> { %v392_v19 = vld [vmem:[%s13622_s27 + $0x48] sm:$0xff]  ;;  %v393_v20 = vld [vmem:[%s13622_s27 + $0x50] sm:$0xff]  ;;  %v394_v21 = vld [vmem:[%s13622_s27 + $0x58] sm:$0xff]  ;;  %s15657_s0 = scalar_lea.hbm (%p376_p11), %s15712_s9, %s10473_s26  ;;  %s15719_s23 = smov (%p376_p11), %s15718_s22 }
  0x2a   : >> { %v395_v22 = vld [vmem:[%s13622_s27 + $0x60] sm:$0xff]  ;;  %v396_v23 = vld [vmem:[%s13622_s27 + $0x68] sm:$0xff]  ;;  %v397_v24 = vld [vmem:[%s13622_s27 + $0x70] sm:$0xff]  ;;  %s15720_s24 = sand.u32 (%p376_p11), 1, %s13414_s10   ;;  %s13435_s13 = smov (%p376_p11), [#allocation8]  }
  0x2b   : >> { %12505 = vmatpush3.bf16.msk.msra.mxu1 %vm12501_vm2, %v12500_v9  ;;  %v398_v25 = vld [vmem:[%s13622_s27 + $0x78] sm:$0xff]  ;;  %v399_v26 = vld [vmem:[%s13622_s27 + $0x80] sm:$0xff]  ;;  %v400_v27 = vld [vmem:[%s13622_s27 + $0x88] sm:$0xff]  ;;  %s9716_s29 = scalar_lea.sflag (%p376_p11), [#allocation9], %s15720_s24  ;;  %s13360_s16 = sshll.u32 (%p376_p11), %s13435_s13, 4  ;;  %s13361_s16 = int_to_ptr.vmem [resolvable:$false] %s13360_s16 }
  0x2c   : >> { %v401_v28 = vld [vmem:[%s13622_s27 + $0x90] sm:$0xff]  ;;  %v402_v29 = vld [vmem:[%s13622_s27 + $0x98] sm:$0xff]  ;;  %v403_v30 = vld [vmem:[%s13622_s27 + $0xa0] sm:$0xff]  ;;  %s13362_s17 = scalar_lea.vmem (%p376_p11), %s13361_s16, 256 }
  0x2d   : >> { %v404_v31 = vld [vmem:[%s13622_s27 + $0xa8] sm:$0xff]  ;;  %v405_v32 = vld [vmem:[%s13622_s27 + $0xb0] sm:$0xff]  ;;  %v406_v33 = vld [vmem:[%s13622_s27 + $0xb8] sm:$0xff] }
  0x2e   : >> { %11154 = vmatmul.mubr.msk.f32.vlgmr.msra.gmra.mrb[0].mxu1 %vm485_vm3, %v384_v11  ;;  %v407_v34 = vld [vmem:[%s13622_s27 + $0xc0] sm:$0xff]  ;;  %v408_v35 = vld [vmem:[%s13622_s27 + $0xc8] sm:$0xff]  ;;  %v409_v36 = vld [vmem:[%s13622_s27 + $0xd0] sm:$0xff] }
  0x2f   : >> { %11156 = vmatprep.mubr.msk.f32.mxu1 %vm485_vm3, %v385_v12  ;;  %v410_v37 = vld [vmem:[%s13622_s27 + $0xd8] sm:$0xff]  ;;  %v411_v38 = vld [vmem:[%s13622_s27 + $0xe0] sm:$0xff]  ;;  %v412_v39 = vld [vmem:[%s13622_s27 + $0xe8] sm:$0xff] }
  0x30   : >> { %v413_v40 = vld [vmem:[%s13622_s27 + $0xf0] sm:$0xff]  ;;  %v414_v41 = vld [vmem:[%s13622_s27 + $0xf8] sm:$0xff]  ;;  %v415_v42 = vld [vmem:[%s13622_s27 + $0x100] sm:$0xff] }
  0x31   : >> { %v416_v43 = vld [vmem:[%s13622_s27 + $0x108] sm:$0xff]  ;;  %v417_v44 = vld [vmem:[%s13622_s27 + $0x110] sm:$0xff]  ;;  %v418_v45 = vld [vmem:[%s13622_s27 + $0x118] sm:$0xff] }
  0x32   : >> { %11157 = vmatmul.mubr.msk.f32.gmra.mrb[2].mxu1 %vm485_vm3, %v386_v13  ;;  %v419_v46 = vld [vmem:[%s13622_s27 + $0x120] sm:$0xff]  ;;  %v420_v47 = vld [vmem:[%s13622_s27 + $0x128] sm:$0xff]  ;;  %v421_v48 = vld [vmem:[%s13622_s27 + $0x130] sm:$0xff] }
  0x33   : >> { %11159 = vmatprep.mubr.msk.f32.mxu1 %vm485_vm3, %v387_v14  ;;  %v422_v49 = vld [vmem:[%s13622_s27 + $0x138] sm:$0xff]  ;;  %v423_v50 = vld [vmem:[%s13622_s27 + $0x140] sm:$0xff]  ;;  %v424_v51 = vld [vmem:[%s13622_s27 + $0x148] sm:$0xff] }
  0x34   : >> { %v425_v52 = vld [vmem:[%s13622_s27 + $0x150] sm:$0xff]  ;;  %v426_v53 = vld [vmem:[%s13622_s27 + $0x158] sm:$0xff]  ;;  %v427_v54 = vld [vmem:[%s13622_s27 + $0x160] sm:$0xff] }
  0x35   : >> { %v428_v55 = vld [vmem:[%s13622_s27 + $0x168] sm:$0xff]  ;;  %v429_v56 = vld [vmem:[%s13622_s27 + $0x170] sm:$0xff]  ;;  %v430_v57 = vld [vmem:[%s13622_s27 + $0x178] sm:$0xff] }
  0x36   : >> { %11160 = vmatmul.mubr.msk.f32.gmra.mrb[4].mxu1 %vm485_vm3, %v388_v15  ;;  %v431_v58 = vld [vmem:[%s13622_s27 + $0x180] sm:$0xff]  ;;  %v432_v59 = vld [vmem:[%s13622_s27 + $0x188] sm:$0xff]  ;;  %v433_v60 = vld [vmem:[%s13622_s27 + $0x190] sm:$0xff] }
  0x37   : >> { %11162 = vmatprep.mubr.msk.f32.mxu1 %vm485_vm3, %v389_v16  ;;  %v434_v61 = vld [vmem:[%s13622_s27 + $0x198] sm:$0xff]  ;;  %v435_v62 = vld [vmem:[%s13622_s27 + $0x1a0] sm:$0xff]  ;;  %v436_v63 = vld [vmem:[%s13622_s27 + $0x1a8] sm:$0xff] }
  0x38   : >> { %v437_v4 = vld [vmem:[%s13622_s27 + $0x1b0] sm:$0xff]  ;;  %v438_v5 = vld [vmem:[%s13622_s27 + $0x1b8] sm:$0xff]  ;;  %v439_v6 = vld [vmem:[%s13622_s27 + $0x1c0] sm:$0xff] }
  0x39   : >> { %v440_v7 = vld [vmem:[%s13622_s27 + $0x1c8] sm:$0xff]  ;;  %v441_v8 = vld [vmem:[%s13622_s27 + $0x1d0] sm:$0xff]  ;;  %v9911_v10 = vld [vmem:[%s15706_s3 + $0x18] sm:$0xff] }
  0x3a   : >> { %11163 = vmatmul.mubr.msk.f32.gmra.mrb[6].mxu1 %vm485_vm3, %v390_v17  ;;  %v9910_v9 = vld [vmem:[%s15706_s3 + $0x10] sm:$0xff]  ;;  %v442_v12 = vld [vmem:[%s13622_s27 + $0x1d8] sm:$0xff]  ;;  %v443_v13 = vld [vmem:[%s13622_s27 + $0x1e0] sm:$0xff] }
  0x3b   : >> { %11165 = vmatprep.mubr.msk.f32.mxu1 %vm485_vm3, %v391_v18  ;;  %v13747_v11 = vpack.c.bf16 %v9911_v10, %v9910_v9  ;;  %v444_v14 = vld [vmem:[%s13622_s27 + $0x1e8] sm:$0xff]  ;;  %v445_v15 = vld [vmem:[%s13622_s27 + $0x1f0] sm:$0xff]  ;;  %v446_v16 = vld [vmem:[%s13622_s27 + $0x1f8] sm:$0xff] }
  0x3c   : >> { %v447_v17 = vld [vmem:[%s13622_s27 + $0x200] sm:$0xff]  ;;  %v448_v18 = vld [vmem:[%s13622_s27 + $0x208] sm:$0xff] }
  0x3d   : >> { %12507 = vmatprep.subr.bf16.mxu1 %v13747_v11 }
  0x3e   : >> { %11166 = vmatmul.mubr.msk.f32.gmra.mrb[8].mxu1 %vm485_vm3, %v392_v19  ;;  %v449_v19 = vld [vmem:[%s13622_s27 + $0x210] sm:$0xff] }
  0x3f   : >> { %11168 = vmatprep.mubr.msk.f32.mxu1 %vm485_vm3, %v393_v20  ;;  %12509 = vmatpush3.bf16.msra.mxu1 %v13747_v11  ;;  %v450_v20 = vld [vmem:[%s13622_s27 + $0x218] sm:$0xff] }
  0x42   : >> { %11169 = vmatmul.mubr.msk.f32.gmra.mrb[10].mxu1 %vm485_vm3, %v394_v21  ;;  %v451_v21 = vld [vmem:[%s13622_s27 + $0x220] sm:$0xff] }
  0x43   : >> { %11171 = vmatprep.mubr.msk.f32.mxu1 %vm485_vm3, %v395_v22  ;;  %v452_v22 = vld [vmem:[%s13622_s27 + $0x228] sm:$0xff] }
  0x46   : >> { %11172 = vmatmul.mubr.msk.f32.gmra.mrb[12].mxu1 %vm485_vm3, %v396_v23  ;;  %v453_v23 = vld [vmem:[%s13622_s27 + $0x230] sm:$0xff] }
  0x47   : >> { %11174 = vmatprep.mubr.msk.f32.mxu1 %vm485_vm3, %v397_v24  ;;  %v454_v24 = vld [vmem:[%s13622_s27 + $0x238] sm:$0xff] }
  0x4a   : >> { %11175 = vmatmul.mubr.msk.f32.gmra.mrb[14].mxu1 %vm485_vm3, %v398_v25  ;;  %v455_v25 = vld [vmem:[%s13622_s27 + $0x240] sm:$0xff] }
  0x4b   : >> { %11177 = vmatprep.mubr.msk.f32.mxu1 %vm485_vm3, %v399_v26  ;;  %v456_v26 = vld [vmem:[%s13622_s27 + $0x248] sm:$0xff] }
  0x4e   : >> { %11178 = vmatmul.mubr.msk.f32.gmra.mrb[16].mxu1 %vm485_vm3, %v400_v27  ;;  %v457_v27 = vld [vmem:[%s13622_s27 + $0x250] sm:$0xff] }
  0x4f   : >> { %11180 = vmatprep.mubr.msk.f32.mxu1 %vm485_vm3, %v401_v28  ;;  %v458_v28 = vld [vmem:[%s13622_s27 + $0x258] sm:$0xff] }
  0x52   : >> { %11181 = vmatmul.mubr.msk.f32.gmra.mrb[18].mxu1 %vm485_vm3, %v402_v29  ;;  %v459_v29 = vld [vmem:[%s13622_s27 + $0x260] sm:$0xff] }
  0x53   : >> { %11183 = vmatprep.mubr.msk.f32.mxu1 %vm485_vm3, %v403_v30  ;;  %v460_v30 = vld [vmem:[%s13622_s27 + $0x268] sm:$0xff] }
  0x56   : >> { %11184 = vmatmul.mubr.msk.f32.gmra.mrb[20].mxu1 %vm485_vm3, %v404_v31  ;;  %v461_v31 = vld [vmem:[%s13622_s27 + $0x270] sm:$0xff] }
  0x57   : >> { %11186 = vmatprep.mubr.msk.f32.mxu1 %vm485_vm3, %v405_v32  ;;  %v462_v32 = vld [vmem:[%s13622_s27 + $0x278] sm:$0xff] }
  0x5a   : >> { %11187 = vmatmul.mubr.msk.f32.gmra.mrb[22].mxu1 %vm485_vm3, %v406_v33  ;;  %v463_v33 = vld [vmem:[%s13622_s27 + $0x280] sm:$0xff] }
  0x5b   : >> { %11189 = vmatprep.mubr.msk.f32.mxu1 %vm485_vm3, %v407_v34  ;;  %v464_v34 = vld [vmem:[%s13622_s27 + $0x288] sm:$0xff] }
  0x5e   : >> { %11190 = vmatmul.mubr.msk.f32.gmra.mrb[24].mxu1 %vm485_vm3, %v408_v35  ;;  %v465_v35 = vld [vmem:[%s13622_s27 + $0x290] sm:$0xff] }
  0x5f   : >> { %11192 = vmatprep.mubr.msk.f32.mxu1 %vm485_vm3, %v409_v36  ;;  %v466_v36 = vld [vmem:[%s13622_s27 + $0x298] sm:$0xff] }
  0x62   : >> { %11193 = vmatmul.mubr.msk.f32.gmra.mrb[26].mxu1 %vm485_vm3, %v410_v37  ;;  %v467_v37 = vld [vmem:[%s13622_s27 + $0x2a0] sm:$0xff] }
  0x63   : >> { %11195 = vmatprep.mubr.msk.f32.mxu1 %vm485_vm3, %v411_v38  ;;  %v468_v38 = vld [vmem:[%s13622_s27 + $0x2a8] sm:$0xff] }
  0x66   : >> { %11196 = vmatmul.mubr.msk.f32.gmra.mrb[28].mxu1 %vm485_vm3, %v412_v39  ;;  %v469_v39 = vld [vmem:[%s13622_s27 + $0x2b0] sm:$0xff] }
  0x67   : >> { %11198 = vmatprep.mubr.msk.f32.mxu1 %vm485_vm3, %v413_v40  ;;  %v470_v40 = vld [vmem:[%s13622_s27 + $0x2b8] sm:$0xff] }
  0x6a   : >> { %11199 = vmatmul.mubr.msk.f32.gmra.mrb[30].mxu1 %vm485_vm3, %v414_v41  ;;  %v471_v41 = vld [vmem:[%s13622_s27 + $0x2c0] sm:$0xff] }
  0x6b   : >> { %11201 = vmatprep.mubr.msk.f32.mxu1 %vm485_vm3, %v415_v42  ;;  %v472_v42 = vld [vmem:[%s13622_s27 + $0x2c8] sm:$0xff] }
  0x6e   : >> { %11202 = vmatmul.mubr.msk.f32.gmra.mrb[32].mxu1 %vm485_vm3, %v416_v43  ;;  %v473_v43 = vld [vmem:[%s13622_s27 + $0x2d0] sm:$0xff] }
  0x6f   : >> { %11204 = vmatprep.mubr.msk.f32.mxu1 %vm485_vm3, %v417_v44  ;;  %v474_v44 = vld [vmem:[%s13622_s27 + $0x2d8] sm:$0xff] }
  0x72   : >> { %11205 = vmatmul.mubr.msk.f32.gmra.mrb[34].mxu1 %vm485_vm3, %v418_v45  ;;  %v475_v45 = vld [vmem:[%s13622_s27 + $0x2e0] sm:$0xff] }
  0x73   : >> { %11207 = vmatprep.mubr.msk.f32.mxu1 %vm485_vm3, %v419_v46  ;;  %v476_v46 = vld [vmem:[%s13622_s27 + $0x2e8] sm:$0xff] }
  0x76   : >> { %11208 = vmatmul.mubr.msk.f32.gmra.mrb[36].mxu1 %vm485_vm3, %v420_v47  ;;  %v477_v47 = vld [vmem:[%s13622_s27 + $0x2f0] sm:$0xff] }
  0x77   : >> { %11210 = vmatprep.mubr.msk.f32.mxu1 %vm485_vm3, %v421_v48  ;;  %v478_v48 = vld [vmem:[%s13622_s27 + $0x2f8] sm:$0xff] }
  0x7a   : >> { %11211 = vmatmul.mubr.msk.f32.gmra.mrb[38].mxu1 %vm485_vm3, %v422_v49  ;;  %v479_v49 = vld [vmem:[%s13622_s27 + $0x300] sm:$0xff] }
  0x7b   : >> { %11213 = vmatprep.mubr.msk.f32.mxu1 %vm485_vm3, %v423_v50  ;;  %v480_v50 = vld [vmem:[%s13622_s27 + $0x308] sm:$0xff]  ;;  %s9729_s27 = sshll.u32 (%p376_p11), %s15718_s22, 4  ;;  %s15659_s27 = int_to_ptr.vmem [resolvable:$true] %s9729_s27 }
  0x7c   : > { %p13363_p1 = scmp.lt.s32.totalorder (%p376_p11), %s15659_s27, %s13361_s16 }
  0x7e   : >> { %11214 = vmatmul.mubr.msk.f32.gmra.mrb[40].mxu1 %vm485_vm3, %v424_v51  ;;  %v1820_v51 = vld [vmem:[#allocation3 + $0x1] sm:$0xff] }
  0x7f   : >> { %11216 = vmatprep.mubr.msk.f32.mxu1 %vm485_vm3, %v425_v52  ;;  %v1818_v52 = vld [vmem:[%s15706_s3] sm:$0xff] }
  0x82   : >> { %11217 = vmatmul.mubr.msk.f32.gmra.mrb[42].mxu1 %vm485_vm3, %v426_v53  ;;  %v1819_v53 = vld [vmem:[%s15706_s3 + $0x8] sm:$0xff] }
  0x83   : >> { %11219 = vmatprep.mubr.msk.f32.mxu1 %vm485_vm3, %v427_v54  ;;  %v13837_v54 = vpack.c.bf16 %v1819_v53, %v1818_v52 }
  0x85   : >> { %12511 = vmatprep.subr.bf16.mxu1 %v13837_v54 }
  0x86   : >> { %11220 = vmatmul.mubr.msk.f32.gmra.mrb[44].mxu1 %vm485_vm3, %v428_v55  ;;  %v13430_v55 = vmov 0.0|0.0  }
  0x87   : >> { %11222 = vmatprep.mubr.msk.f32.mxu1 %vm485_vm3, %v429_v56  ;;  %12570 = vmatprep.subr.bf16.mxu0 %v13430_v55  ;;  %v13432_v56 = vmov 0.0  }
  0x88   : >> { %12572 = vmatpush3.bf16.msra.mxu0 %v13747_v11  ;;  %11656 = vmatprep.mubr.msk.f32.mxu0 %vm13431_vm5, %v13432_v56 }
  0x89   : >> { %12573 = vmatprep.subr.bf16.mxu0 %v13430_v55 }
  0x8a   : >> { %11223 = vmatmul.mubr.msk.f32.gmra.mrb[46].mxu1 %vm485_vm3, %v430_v57 }
  0x8b   : >> { %11225 = vmatprep.mubr.msk.f32.mxu1 %vm485_vm3, %v431_v58 }
  0x8e   : >> { %11226 = vmatmul.mubr.msk.f32.gmra.mrb[48].mxu1 %vm485_vm3, %v432_v59 }
  0x8f   : >> { %11228 = vmatprep.mubr.msk.f32.mxu1 %vm485_vm3, %v433_v60 }
  0x92   : >> { %11229 = vmatmul.mubr.msk.f32.gmra.mrb[50].mxu1 %vm485_vm3, %v434_v61 }
  0x93   : >> { %11231 = vmatprep.mubr.msk.f32.mxu1 %vm485_vm3, %v435_v62 }
  0x96   : >> { %11232 = vmatmul.mubr.msk.f32.gmra.mrb[52].mxu1 %vm485_vm3, %v436_v63 }
  0x97   : >> { %11234 = vmatprep.mubr.msk.f32.mxu1 %vm485_vm3, %v437_v4 }
  0x9a   : >> { %11235 = vmatmul.mubr.msk.f32.gmra.mrb[54].mxu1 %vm485_vm3, %v438_v5 }
  0x9b   : >> { %11237 = vmatprep.mubr.msk.f32.mxu1 %vm485_vm3, %v439_v6 }
  0x9e   : >> { %11238 = vmatmul.mubr.msk.f32.gmra.mrb[56].mxu1 %vm485_vm3, %v440_v7 }
  0x9f   : >> { %11240 = vmatprep.mubr.msk.f32.mxu1 %vm485_vm3, %v441_v8 }
  0xa2   : >> { %11241 = vmatmul.mubr.msk.f32.gmra.mrb[58].mxu1 %vm485_vm3, %v442_v12 }
  0xa3   : >> { %11243 = vmatprep.mubr.msk.f32.mxu1 %vm485_vm3, %v443_v13 }
  0xa6   : >> { %11244 = vmatmul.mubr.msk.f32.gmra.mrb[60].mxu1 %vm485_vm3, %v444_v14 }
  0xa7   : >> { %11246 = vmatprep.mubr.msk.f32.mxu1 %vm485_vm3, %v445_v15 }
  0xaa   : >> { %11247 = vmatmul.mubr.msk.f32.gmra.mrb[62].mxu1 %vm485_vm3, %v446_v16 }
  0xab   : >> { %11249 = vmatprep.mubr.msk.f32.mxu1 %vm485_vm3, %v447_v17 }
  0xae   : >> { %11250 = vmatmul.mubr.msk.f32.gmra.mrb[64].mxu1 %vm485_vm3, %v448_v18 }
  0xaf   : >> { %11252 = vmatprep.mubr.msk.f32.mxu1 %vm485_vm3, %v449_v19 }
  0xb2   : >> { %11253 = vmatmul.mubr.msk.f32.gmra.mrb[66].mxu1 %vm485_vm3, %v450_v20 }
  0xb3   : >> { %11255 = vmatprep.mubr.msk.f32.mxu1 %vm485_vm3, %v451_v21 }
  0xb6   : >> { %11256 = vmatmul.mubr.msk.f32.gmra.mrb[68].mxu1 %vm485_vm3, %v452_v22 }
  0xb7   : >> { %11258 = vmatprep.mubr.msk.f32.mxu1 %vm485_vm3, %v453_v23 }
  0xba   : >> { %11259 = vmatmul.mubr.msk.f32.gmra.mrb[70].mxu1 %vm485_vm3, %v454_v24 }
  0xbb   : >> { %11261 = vmatprep.mubr.msk.f32.mxu1 %vm485_vm3, %v455_v25 }
  0xbe   : >> { %11262 = vmatmul.mubr.msk.f32.gmra.mrb[72].mxu1 %vm485_vm3, %v456_v26 }
  0xbf   : >> { %11264 = vmatprep.mubr.msk.f32.mxu1 %vm485_vm3, %v457_v27 }
  0xc2   : >> { %11265 = vmatmul.mubr.msk.f32.gmra.mrb[74].mxu1 %vm485_vm3, %v458_v28 }
  0xc3   : >> { %11267 = vmatprep.mubr.msk.f32.mxu1 %vm485_vm3, %v459_v29  ;;  %v9936_v29 = vld [vmem:[%s15706_s3 + $0x20] sm:$0xff] }
  0xc6   : >> { %11268 = vmatmul.mubr.msk.f32.gmra.mrb[76].mxu1 %vm485_vm3, %v460_v30  ;;  %v9937_v30 = vld [vmem:[%s15706_s3 + $0x28] sm:$0xff] }
  0xc7   : >> { %11270 = vmatprep.mubr.msk.f32.mxu1 %vm485_vm3, %v461_v31 }
  0xca   : >> { %11271 = vmatmul.mubr.msk.f32.gmra.mrb[78].mxu1 %vm485_vm3, %v462_v32 }
  0xcb   : >> { %11273 = vmatprep.mubr.msk.f32.mxu1 %vm485_vm3, %v463_v33 }
  0xce   : >> { %11274 = vmatmul.mubr.msk.f32.gmra.mrb[80].mxu1 %vm485_vm3, %v464_v34 }
  0xcf   : >> { %11276 = vmatprep.mubr.msk.f32.mxu1 %vm485_vm3, %v465_v35 }
  0xd2   : >> { %11277 = vmatmul.mubr.msk.f32.gmra.mrb[82].mxu1 %vm485_vm3, %v466_v36 }
  0xd3   : >> { %11279 = vmatprep.mubr.msk.f32.mxu1 %vm485_vm3, %v467_v37 }
  0xd6   : >> { %11280 = vmatmul.mubr.msk.f32.gmra.mrb[84].mxu1 %vm485_vm3, %v468_v38 }
  0xd7   : >> { %11282 = vmatprep.mubr.msk.f32.mxu1 %vm485_vm3, %v469_v39  ;;  %v13858_v39 = vpack.c.bf16 %v9937_v30, %v9936_v29 }
  0xda   : >> { %11283 = vmatmul.mubr.msk.f32.gmra.mrb[86].mxu1 %vm485_vm3, %v470_v40 }
  0xdb   : >> { %11285 = vmatprep.mubr.msk.f32.mxu1 %vm485_vm3, %v471_v41 }
  0xde   : >> { %11286 = vmatmul.mubr.msk.f32.gmra.mrb[88].mxu1 %vm485_vm3, %v472_v42 }
  0xdf   : >> { %11288 = vmatprep.mubr.msk.f32.mxu1 %vm485_vm3, %v473_v43 }
  0xe2   : >> { %11289 = vmatmul.mubr.msk.f32.gmra.mrb[90].mxu1 %vm485_vm3, %v474_v44 }
  0xe3   : >> { %11291 = vmatprep.mubr.msk.f32.mxu1 %vm485_vm3, %v475_v45 }
  0xe6   : >> { %11292 = vmatmul.mubr.msk.f32.gmra.mrb[92].mxu1 %vm485_vm3, %v476_v46 }
  0xe7   : >> { %11294 = vmatprep.mubr.msk.f32.mxu1 %vm485_vm3, %v477_v47 }
  0xea   : >> { %11295 = vmatmul.mubr.msk.f32.gmra.mrb[94].mxu1 %vm485_vm3, %v478_v48 }
  0xeb   : >> { %11297 = vmatprep.mubr.msk.f32.mxu1 %vm485_vm3, %v479_v49 }
  0xee   : >> { %11298 = vmatmul.mubr.msk.f32.gmra.mrb[96].mxu1 %vm485_vm3, %v480_v50 }
  0xef   : >> { %11304 = vmatprep.mubr.msk.f32.mxu1 %vm1835_vm4, %v1820_v51 }
 0x101   : >> { %v11155_v57 = vpop.f32.mrb[0].mxu1 }
 0x102   : >> { %1340 = vst [vmem:[#allocation2 + $0x8] sm:$0xff] %v11155_v57  ;;  %v850_v58 = vpop.f32.mrb[1].mxu1 }
 0x103   : >> { %1339 = vst [vmem:[#allocation2] sm:$0xff] %v850_v58 }
 0x105   : >> { %v11158_v59 = vpop.f32.mrb[2].mxu1 }
 0x106   : >> { %1342 = vst [vmem:[#allocation2 + $0x18] sm:$0xff] %v11158_v59  ;;  %v860_v60 = vpop.f32.mrb[3].mxu1 }
 0x107   : >> { %1341 = vst [vmem:[#allocation2 + $0x10] sm:$0xff] %v860_v60 }
 0x109   : >> { %v11161_v61 = vpop.f32.mrb[4].mxu1 }
 0x10a   : >> { %1344 = vst [vmem:[#allocation2 + $0x28] sm:$0xff] %v11161_v61  ;;  %v870_v62 = vpop.f32.mrb[5].mxu1  ;;  %v1437_v4 = vld [vmem:[#allocation2] ss:$2 sm:$0xff]  ;;  %v1441_v5 = vld [vmem:[#allocation2 + $0x1] ss:$2 sm:$0xff] }
 0x10b   : >> { %1343 = vst [vmem:[#allocation2 + $0x20] sm:$0xff] %v870_v62  ;;  %v1444_v7 = vmax.f32 %v1437_v4, %v1441_v5 }
 0x10d   : >> { %v11164_v63 = vpop.f32.mrb[6].mxu1 }
 0x10e   : >> { %1346 = vst [vmem:[#allocation2 + $0x38] sm:$0xff] %v11164_v63  ;;  %v880_v6 = vpop.f32.mrb[7].mxu1  ;;  %v1439_v11 = vld [vmem:[#allocation2 + $0x10] ss:$2 sm:$0x1f] }
 0x10f   : >> { %1345 = vst [vmem:[#allocation2 + $0x30] sm:$0xff] %v880_v6  ;;  %v1443_v12 = vld [vmem:[#allocation2 + $0x11] ss:$2 sm:$0x1f] }
 0x110   : >> { %v1445_v17 = vmax.f32 %v1439_v11, %v1443_v12 }
 0x111   : >> { %v11167_v8 = vpop.f32.mrb[8].mxu1 }
 0x112   : >> { %v1447_v9 = vld [vmem:[#allocation2 + $0x1e] ss:$2 sm:$0xff]  ;;  %1348 = vst [vmem:[#allocation2 + $0x48] sm:$0xff] %v11167_v8  ;;  %v890_v10 = vpop.f32.mrb[9].mxu1  ;;  %v1453_v14 = vld [vmem:[#allocation2 + $0x1f] ss:$2 sm:$0xff] }
 0x113   : >> { %v1450_v13 = vmax.f32 %v1444_v7, %v1447_v9  ;;  %1347 = vst [vmem:[#allocation2 + $0x40] sm:$0xff] %v890_v10 }
 0x115   : >> { %v1456_v15 = vmax.f32 %v1450_v13, %v1453_v14  ;;  %v11170_v16 = vpop.f32.mrb[10].mxu1 }
 0x116   : >> { %1350 = vst [vmem:[#allocation2 + $0x58] sm:$0xff] %v11170_v16  ;;  %v900_v18 = vpop.f32.mrb[11].mxu1  ;;  %v1449_v20 = vld [vmem:[#allocation2 + $0x2e] ss:$2 sm:$0x1f] }
 0x117   : >> { %v13846_v19 = vadd.f32 %v13539_v0, %v1456_v15  ;;  %1349 = vst [vmem:[#allocation2 + $0x50] sm:$0xff] %v900_v18  ;;  %v1451_v21 = vmax.f32 %v1445_v17, %v1449_v20  ;;  %v1455_v23 = vld [vmem:[#allocation2 + $0x2f] ss:$2 sm:$0x1f] }
 0x119   : >> { %v1466_v22 = vmax.f32 %v13846_v19, 0.0  ;;  %v11173_v24 = vpop.f32.mrb[12].mxu1  ;;  %v1457_v25 = vmax.f32 %v1451_v21, %v1455_v23 }
 0x11a   : >> { %1352 = vst [vmem:[#allocation2 + $0x68] sm:$0xff] %v11173_v24  ;;  %v910_v26 = vpop.f32.mrb[13].mxu1  ;;  %v1471_v32 = vld [vmem:[#allocation2 + $0x3c] ss:$2 sm:$0xff]  ;;  %v1475_v33 = vld [vmem:[#allocation2 + $0x3d] ss:$2 sm:$0xff] }
 0x11b   : >> { %1468 = vst [vmem:[#allocation3 + $0x10] sm:$0xff] %v1466_v22  ;;  %1351 = vst [vmem:[#allocation2 + $0x60] sm:$0xff] %v910_v26  ;;  %v1465_v27 = vadd.f32 %v13539_v0, %v1457_v25  ;;  %v1478_v36 = vmax.f32 %v1471_v32, %v1475_v33 }
 0x11d   : >> { %v11176_v28 = vpop.f32.mrb[14].mxu1  ;;  %v1467_v31 = vmax.f32 %v1465_v27, 0.0 }
 0x11e   : >> { %1354 = vst [vmem:[#allocation2 + $0x78] sm:$0xff] %v11176_v28  ;;  %v920_v34 = vpop.f32.mrb[15].mxu1  ;;  %v1473_v35 = vld [vmem:[#allocation2 + $0x4c] ss:$2 sm:$0x1f] }
 0x11f   : >> { %1353 = vst [vmem:[#allocation2 + $0x70] sm:$0xff] %v920_v34  ;;  %1469 = vst [vmem:[#allocation3 + $0x18] sm:$0x1f] %v1467_v31  ;;  %v1477_v37 = vld [vmem:[#allocation2 + $0x4d] ss:$2 sm:$0x1f] }
 0x120   : >> { %v1479_v45 = vmax.f32 %v1473_v35, %v1477_v37 }
 0x121   : >> { %v11179_v38 = vpop.f32.mrb[16].mxu1 }
 0x122   : >> { %v1481_v40 = vld [vmem:[#allocation2 + $0x5a] ss:$2 sm:$0xff]  ;;  %1356 = vst [vmem:[#allocation2 + $0x88] sm:$0xff] %v11179_v38  ;;  %v930_v41 = vpop.f32.mrb[17].mxu1  ;;  %v1487_v44 = vld [vmem:[#allocation2 + $0x5b] ss:$2 sm:$0xff] }
 0x123   : >> { %v1821_v42 = vld [vmem:[#allocation3 + $0x9] sm:$0xff]  ;;  %v1484_v43 = vmax.f32 %v1478_v36, %v1481_v40  ;;  %1355 = vst [vmem:[#allocation2 + $0x80] sm:$0xff] %v930_v41 }
 0x124   : >> { %11305 = vmatmul.mubr.msk.f32.vlgmr.msra.gmra.mrb[98].mxu1 %vm1835_vm4, %v1821_v42 }
 0x125   : >> { %12513 = vmatpush3.bf16.msra.mxu1 %v13837_v54  ;;  %v1490_v46 = vmax.f32 %v1484_v43, %v1487_v44  ;;  %v11182_v47 = vpop.f32.mrb[18].mxu1 }
 0x126   : >> { %12515 = vmatprep.subr.bf16.mxu1 %v13858_v39  ;;  %v1483_v48 = vld [vmem:[#allocation2 + $0x6a] ss:$2 sm:$0x1f]  ;;  %1358 = vst [vmem:[#allocation2 + $0x98] sm:$0xff] %v11182_v47  ;;  %v940_v51 = vpop.f32.mrb[19].mxu1  ;;  %v1822_v52 = vld [vmem:[#allocation3 + $0x11] sm:$0xff] }
 0x127   : >> { %v1492_v49 = vadd.f32 %v13539_v0, %v1490_v46  ;;  %v1485_v50 = vmax.f32 %v1479_v45, %v1483_v48  ;;  %v1489_v53 = vld [vmem:[#allocation2 + $0x6b] ss:$2 sm:$0x1f]  ;;  %1357 = vst [vmem:[#allocation2 + $0x90] sm:$0xff] %v940_v51  ;;  %11307 = vmatprep.mubr.msk.f32.mxu1 %vm1835_vm4, %v1822_v52 }
 0x129   : >> { %v1494_v57 = vmax.f32 %v1492_v49, 0.0  ;;  %v1491_v58 = vmax.f32 %v1485_v50, %v1489_v53  ;;  %v11185_v59 = vpop.f32.mrb[20].mxu1 }
 0x12a   : >> { %1360 = vst [vmem:[#allocation2 + $0xa8] sm:$0xff] %v11185_v59  ;;  %v950_v60 = vpop.f32.mrb[21].mxu1  ;;  %v1499_v4 = vld [vmem:[#allocation2 + $0x78] ss:$2 sm:$0xff]  ;;  %v1503_v5 = vld [vmem:[#allocation2 + $0x79] ss:$2 sm:$0xff] }
 0x12b   : >> { %1496 = vst [vmem:[#allocation3 + $0x1f] sm:$0xff] %v1494_v57  ;;  %v1493_v61 = vadd.f32 %v13539_v0, %v1491_v58  ;;  %1359 = vst [vmem:[#allocation2 + $0xa0] sm:$0xff] %v950_v60  ;;  %v1506_v9 = vmax.f32 %v1499_v4, %v1503_v5 }
 0x12d   : >> { %v1495_v62 = vmax.f32 %v1493_v61, 0.0  ;;  %v11188_v63 = vpop.f32.mrb[22].mxu1 }
 0x12e   : >> { %1362 = vst [vmem:[#allocation2 + $0xb8] sm:$0xff] %v11188_v63  ;;  %v960_v6 = vpop.f32.mrb[23].mxu1  ;;  %v1501_v7 = vld [vmem:[#allocation2 + $0x88] ss:$2 sm:$0x1f] }
 0x12f   : >> { %1497 = vst [vmem:[#allocation3 + $0x27] sm:$0x1f] %v1495_v62  ;;  %v1505_v8 = vld [vmem:[#allocation2 + $0x89] ss:$2 sm:$0x1f]  ;;  %1361 = vst [vmem:[#allocation2 + $0xb0] sm:$0xff] %v960_v6 }
 0x130   : >> { %v1507_v10 = vmax.f32 %v1501_v7, %v1505_v8 }
 0x131   : >> { %v11191_v11 = vpop.f32.mrb[24].mxu1 }
 0x132   : >> { %v1509_v12 = vld [vmem:[#allocation2 + $0x96] ss:$2 sm:$0xff]  ;;  %v1511_v13 = vld [vmem:[#allocation2 + $0xa6] ss:$2 sm:$0x1f]  ;;  %1364 = vst [vmem:[#allocation2 + $0xc8] sm:$0xff] %v11191_v11 }
 0x133   : >> { %v970_v14 = vpop.f32.mrb[25].mxu1  ;;  %v1512_v15 = vmax.f32 %v1506_v9, %v1509_v12  ;;  %v1513_v16 = vmax.f32 %v1507_v10, %v1511_v13  ;;  %v1823_v17 = vld [vmem:[#allocation3 + $0x19] sm:$0xff]  ;;  %v1515_v18 = vld [vmem:[#allocation2 + $0x97] ss:$2 sm:$0xff] }
 0x134   : >> { %1363 = vst [vmem:[#allocation2 + $0xc0] sm:$0xff] %v970_v14  ;;  %v1517_v20 = vld [vmem:[#allocation2 + $0xa7] ss:$2 sm:$0x1f]  ;;  %11308 = vmatmul.mubr.msk.f32.gmra.mrb[100].mxu1 %vm1835_vm4, %v1823_v17 }
 0x135   : >> { %v1518_v21 = vmax.f32 %v1512_v15, %v1515_v18  ;;  %v1519_v23 = vmax.f32 %v1513_v16, %v1517_v20  ;;  %v11194_v24 = vpop.f32.mrb[26].mxu1 }
 0x136   : >> { %1366 = vst [vmem:[#allocation2 + $0xd8] sm:$0xff] %v11194_v24  ;;  %v980_v25 = vpop.f32.mrb[27].mxu1  ;;  %v1824_v26 = vld [vmem:[#allocation3 + $0x21] sm:$0xff] }
 0x137   : >> { %v1520_v27 = vadd.f32 %v13539_v0, %v1518_v21  ;;  %v1521_v28 = vadd.f32 %v13539_v0, %v1519_v23  ;;  %1365 = vst [vmem:[#allocation2 + $0xd0] sm:$0xff] %v980_v25  ;;  %11310 = vmatprep.mubr.msk.f32.mxu1 %vm1835_vm4, %v1824_v26  ;;  %v13937_v19 = vld [vmem:[#allocation3 + $0x20] sm:$0xff] }
 0x139   : >> { %v1522_v29 = vmax.f32 %v1520_v27, 0.0  ;;  %v1523_v30 = vmax.f32 %v1521_v28, 0.0  ;;  %v11197_v31 = vpop.f32.mrb[28].mxu1 }
 0x13a   : >> { %1368 = vst [vmem:[#allocation2 + $0xe8] sm:$0xff] %v11197_v31  ;;  %v990_v32 = vpop.f32.mrb[29].mxu1 }
 0x13b   : >> { %1524 = vst [vmem:[#allocation3 + $0x2e] sm:$0xff] %v1522_v29  ;;  %1525 = vst [vmem:[#allocation3 + $0x36] sm:$0x1f] %v1523_v30  ;;  %v1527_v33 = vld [vmem:[#allocation2 + $0xb4] ss:$2 sm:$0xff] }
 0x13c   : >> { %1367 = vst [vmem:[#allocation2 + $0xe0] sm:$0xff] %v990_v32  ;;  %v1529_v34 = vld [vmem:[#allocation2 + $0xc4] ss:$2 sm:$0x1f]  ;;  %v1531_v36 = vld [vmem:[#allocation2 + $0xb5] ss:$2 sm:$0xff] }
 0x13d   : >> { %v11200_v35 = vpop.f32.mrb[30].mxu1  ;;  %v1533_v37 = vld [vmem:[#allocation2 + $0xc5] ss:$2 sm:$0x1f]  ;;  %v1534_v40 = vmax.f32 %v1527_v33, %v1531_v36 }
 0x13e   : >> { %1370 = vst [vmem:[#allocation2 + $0xf8] sm:$0xff] %v11200_v35  ;;  %v1000_v38 = vpop.f32.mrb[31].mxu1  ;;  %v1535_v41 = vmax.f32 %v1529_v34, %v1533_v37 }
 0x13f   : >> { %1369 = vst [vmem:[#allocation2 + $0xf0] sm:$0xff] %v1000_v38 }
 0x141   : >> { %v11203_v42 = vpop.f32.mrb[32].mxu1 }
 0x142   : >> { %1372 = vst [vmem:[#allocation2 + $0x108] sm:$0xff] %v11203_v42  ;;  %v1010_v45 = vpop.f32.mrb[33].mxu1  ;;  %v1825_v48 = vld [vmem:[#allocation3 + $0x29] sm:$0xff]  ;;  %v1826_v51 = vld [vmem:[#allocation3 + $0x31] sm:$0xff] }
 0x143   : >> { %v1537_v43 = vld [vmem:[#allocation2 + $0xd2] ss:$2 sm:$0xff]  ;;  %v1539_v44 = vld [vmem:[#allocation2 + $0xe2] ss:$2 sm:$0x1f]  ;;  %1371 = vst [vmem:[#allocation2 + $0x100] sm:$0xff] %v1010_v45  ;;  %11311 = vmatmul.mubr.msk.f32.gmra.mrb[102].mxu1 %vm1835_vm4, %v1825_v48 }
 0x144   : >> { %v1540_v46 = vmax.f32 %v1534_v40, %v1537_v43  ;;  %v1541_v47 = vmax.f32 %v1535_v41, %v1539_v44  ;;  %v1543_v49 = vld [vmem:[#allocation2 + $0xd3] ss:$2 sm:$0xff]  ;;  %v1545_v50 = vld [vmem:[#allocation2 + $0xe3] ss:$2 sm:$0x1f]  ;;  %11313 = vmatprep.mubr.msk.f32.mxu1 %vm1835_vm4, %v1826_v51 }
 0x145   : >> { %v11206_v57 = vpop.f32.mrb[34].mxu1 }
 0x146   : >> { %v1546_v52 = vmax.f32 %v1540_v46, %v1543_v49  ;;  %v1547_v53 = vmax.f32 %v1541_v47, %v1545_v50  ;;  %1374 = vst [vmem:[#allocation2 + $0x118] sm:$0xff] %v11206_v57  ;;  %v1020_v58 = vpop.f32.mrb[35].mxu1  ;;  %v1555_v4 = vld [vmem:[#allocation2 + $0xf0] ss:$2 sm:$0xff]  ;;  %v1559_v5 = vld [vmem:[#allocation2 + $0xf1] ss:$2 sm:$0xff] }
 0x147   : >> { %1373 = vst [vmem:[#allocation2 + $0x110] sm:$0xff] %v1020_v58  ;;  %v1562_v7 = vmax.f32 %v1555_v4, %v1559_v5 }
 0x148   : >> { %v1548_v59 = vadd.f32 %v13539_v0, %v1546_v52  ;;  %v1549_v60 = vadd.f32 %v13539_v0, %v1547_v53 }
 0x149   : >> { %v11209_v63 = vpop.f32.mrb[36].mxu1 }
 0x14a   : >> { %v1550_v61 = vmax.f32 %v1548_v59, 0.0  ;;  %v1551_v62 = vmax.f32 %v1549_v60, 0.0  ;;  %1376 = vst [vmem:[#allocation2 + $0x128] sm:$0xff] %v11209_v63  ;;  %v1030_v6 = vpop.f32.mrb[37].mxu1 }
 0x14b   : >> { %1375 = vst [vmem:[#allocation2 + $0x120] sm:$0xff] %v1030_v6  ;;  %v1557_v11 = vld [vmem:[#allocation2 + $0x100] ss:$2 sm:$0x1f] }
 0x14c   : >> { %1552 = vst [vmem:[#allocation3 + $0x3d] sm:$0xff] %v1550_v61  ;;  %1553 = vst [vmem:[#allocation3 + $0x45] sm:$0x1f] %v1551_v62  ;;  %v1561_v12 = vld [vmem:[#allocation2 + $0x101] ss:$2 sm:$0x1f] }
 0x14d   : >> { %v11212_v8 = vpop.f32.mrb[38].mxu1  ;;  %v1563_v17 = vmax.f32 %v1557_v11, %v1561_v12 }
 0x14e   : >> { %v1565_v9 = vld [vmem:[#allocation2 + $0x10e] ss:$2 sm:$0xff]  ;;  %1378 = vst [vmem:[#allocation2 + $0x138] sm:$0xff] %v11212_v8  ;;  %v1040_v10 = vpop.f32.mrb[39].mxu1  ;;  %v1571_v14 = vld [vmem:[#allocation2 + $0x10f] ss:$2 sm:$0xff] }
 0x14f   : >> { %v1568_v13 = vmax.f32 %v1562_v7, %v1565_v9  ;;  %1377 = vst [vmem:[#allocation2 + $0x130] sm:$0xff] %v1040_v10 }
 0x151   : >> { %v1574_v15 = vmax.f32 %v1568_v13, %v1571_v14  ;;  %v11215_v16 = vpop.f32.mrb[40].mxu1  ;;  %v1806_v14 = vld [vmem:[#allocation3] sm:$0xff] }
 0x152   : >> { %1380 = vst [vmem:[#allocation2 + $0x148] sm:$0xff] %v11215_v16  ;;  %v1050_v18 = vpop.f32.mrb[41].mxu1  ;;  %v1567_v24 = vld [vmem:[#allocation2 + $0x11e] ss:$2 sm:$0x1f] }
 0x153   : >> { %v13874_v20 = vld [vmem:[#allocation3 + $0x39] sm:$0xff]  ;;  %v13876_v21 = vld [vmem:[#allocation3 + $0x41] sm:$0xff]  ;;  %v1576_v23 = vadd.f32 %v13539_v0, %v1574_v15  ;;  %1379 = vst [vmem:[#allocation2 + $0x140] sm:$0xff] %v1050_v18  ;;  %v1569_v25 = vmax.f32 %v1563_v17, %v1567_v24  ;;  %v1573_v27 = vld [vmem:[#allocation2 + $0x11f] ss:$2 sm:$0x1f] }
 0x154   : >> { %11314 = vmatmul.mubr.msk.f32.gmra.mrb[104].mxu1 %vm1835_vm4, %v13874_v20 }
 0x155   : >> { %11316 = vmatprep.mubr.msk.f32.mxu1 %vm1835_vm4, %v13876_v21  ;;  %v1578_v26 = vmax.f32 %v1576_v23, 0.0  ;;  %v11218_v28 = vpop.f32.mrb[42].mxu1  ;;  %v1575_v29 = vmax.f32 %v1569_v25, %v1573_v27  ;;  %v9950_v25 = vld [vmem:[%s15706_s3 + $0x30] sm:$0xff] }
 0x156   : >> { %1382 = vst [vmem:[#allocation2 + $0x158] sm:$0xff] %v11218_v28  ;;  %v1060_v30 = vpop.f32.mrb[43].mxu1  ;;  %v1583_v34 = vld [vmem:[#allocation2 + $0x12c] ss:$2 sm:$0xff]  ;;  %v1587_v35 = vld [vmem:[#allocation2 + $0x12d] ss:$2 sm:$0xff] }
 0x157   : >> { %1580 = vst [vmem:[#allocation3 + $0x4c] sm:$0xff] %v1578_v26  ;;  %1381 = vst [vmem:[#allocation2 + $0x150] sm:$0xff] %v1060_v30  ;;  %v1577_v31 = vadd.f32 %v13539_v0, %v1575_v29  ;;  %v1590_v38 = vmax.f32 %v1583_v34, %v1587_v35  ;;  %v9951_v26 = vld [vmem:[%s15706_s3 + $0x38] sm:$0xff] }
 0x158   : >> { %v13912_v35 = vpack.c.bf16 %v9951_v26, %v9950_v25 }
 0x159   : >> { %v11221_v32 = vpop.f32.mrb[44].mxu1  ;;  %v1579_v33 = vmax.f32 %v1577_v31, 0.0 }
 0x15a   : >> { %1384 = vst [vmem:[#allocation2 + $0x168] sm:$0xff] %v11221_v32  ;;  %v1070_v36 = vpop.f32.mrb[45].mxu1  ;;  %v1585_v37 = vld [vmem:[#allocation2 + $0x13c] ss:$2 sm:$0x1f] }
 0x15b   : >> { %1383 = vst [vmem:[#allocation2 + $0x160] sm:$0xff] %v1070_v36  ;;  %1581 = vst [vmem:[#allocation3 + $0x54] sm:$0x1f] %v1579_v33  ;;  %v1589_v40 = vld [vmem:[#allocation2 + $0x13d] ss:$2 sm:$0x1f] }
 0x15c   : >> { %v1591_v47 = vmax.f32 %v1585_v37, %v1589_v40  ;;  %v1807_v32 = vld [vmem:[#allocation3 + $0x8] sm:$0xff] }
 0x15d   : >> { %v11224_v41 = vpop.f32.mrb[46].mxu1 }
 0x15e   : >> { %v1593_v42 = vld [vmem:[#allocation2 + $0x14a] ss:$2 sm:$0xff]  ;;  %1386 = vst [vmem:[#allocation2 + $0x178] sm:$0xff] %v11224_v41  ;;  %v1080_v43 = vpop.f32.mrb[47].mxu1  ;;  %v13884_v44 = vld [vmem:[#allocation3 + $0x49] sm:$0xff] }
 0x15f   : >> { %v1596_v45 = vmax.f32 %v1590_v38, %v1593_v42  ;;  %1385 = vst [vmem:[#allocation2 + $0x170] sm:$0xff] %v1080_v43  ;;  %11317 = vmatmul.mubr.msk.f32.gmra.mrb[106].mxu1 %vm1835_vm4, %v13884_v44  ;;  %v1599_v46 = vld [vmem:[#allocation2 + $0x14b] ss:$2 sm:$0xff] }
 0x160   : >> { %v13932_v43 = vld [vmem:[#allocation3 + $0x18] sm:$0xff] }
 0x161   : >> { %v1602_v48 = vmax.f32 %v1596_v45, %v1599_v46  ;;  %v11227_v49 = vpop.f32.mrb[48].mxu1 }
 0x162   : >> { %v1595_v50 = vld [vmem:[#allocation2 + $0x15a] ss:$2 sm:$0x1f]  ;;  %1388 = vst [vmem:[#allocation2 + $0x188] sm:$0xff] %v11227_v49  ;;  %v1090_v53 = vpop.f32.mrb[49].mxu1 }
 0x163   : >> { %v13889_v51 = vadd.f32 %v13539_v0, %v1602_v48  ;;  %v1597_v52 = vmax.f32 %v1591_v47, %v1595_v50  ;;  %v13891_v57 = vld [vmem:[#allocation3 + $0x51] sm:$0xff]  ;;  %1387 = vst [vmem:[#allocation2 + $0x180] sm:$0xff] %v1090_v53  ;;  %v13941_v49 = vld [vmem:[#allocation3 + $0x28] sm:$0xff] }
 0x164   : >> { %v1601_v58 = vld [vmem:[#allocation2 + $0x15b] ss:$2 sm:$0x1f]  ;;  %11319 = vmatprep.mubr.msk.f32.mxu1 %vm1835_vm4, %v13891_v57 }
 0x165   : >> { %v1606_v59 = vmax.f32 %v13889_v51, 0.0  ;;  %v1603_v60 = vmax.f32 %v1597_v52, %v1601_v58  ;;  %v11230_v61 = vpop.f32.mrb[50].mxu1  ;;  %v13945_v50 = vld [vmem:[#allocation3 + $0x30] sm:$0xff]  ;;  %v14093_v51 = vld [vmem:[#allocation3 + $0x1f] sm:$0xff] }
 0x166   : >> { %1390 = vst [vmem:[#allocation2 + $0x198] sm:$0xff] %v11230_v61  ;;  %v1100_v62 = vpop.f32.mrb[51].mxu1  ;;  %v1611_v6 = vld [vmem:[#allocation2 + $0x168] ss:$2 sm:$0xff]  ;;  %v1615_v7 = vld [vmem:[#allocation2 + $0x169] ss:$2 sm:$0xff] }
 0x167   : >> { %1608 = vst [vmem:[#allocation3 + $0x5b] sm:$0xff] %v1606_v59  ;;  %v1605_v63 = vadd.f32 %v13539_v0, %v1603_v60  ;;  %1389 = vst [vmem:[#allocation2 + $0x190] sm:$0xff] %v1100_v62  ;;  %v1618_v11 = vmax.f32 %v1611_v6, %v1615_v7 }
 0x169   : >> { %v1607_v4 = vmax.f32 %v1605_v63, 0.0  ;;  %v11233_v5 = vpop.f32.mrb[52].mxu1 }
 0x16a   : >> { %1392 = vst [vmem:[#allocation2 + $0x1a8] sm:$0xff] %v11233_v5  ;;  %v1110_v8 = vpop.f32.mrb[53].mxu1  ;;  %v1613_v9 = vld [vmem:[#allocation2 + $0x178] ss:$2 sm:$0x1f]  ;;  %v13949_v5 = vld [vmem:[#allocation3 + $0x38] sm:$0xff] }
 0x16b   : >> { %1609 = vst [vmem:[#allocation3 + $0x63] sm:$0x1f] %v1607_v4  ;;  %v1617_v10 = vld [vmem:[#allocation2 + $0x179] ss:$2 sm:$0x1f]  ;;  %1391 = vst [vmem:[#allocation2 + $0x1a0] sm:$0xff] %v1110_v8 }
 0x16c   : >> { %v1619_v12 = vmax.f32 %v1613_v9, %v1617_v10  ;;  %v13957_v9 = vld [vmem:[#allocation3 + $0x40] sm:$0xff] }
 0x16d   : >> { %v11236_v13 = vpop.f32.mrb[54].mxu1 }
 0x16e   : >> { %v1621_v15 = vld [vmem:[#allocation2 + $0x186] ss:$2 sm:$0xff]  ;;  %v1623_v16 = vld [vmem:[#allocation2 + $0x196] ss:$2 sm:$0x1f]  ;;  %1394 = vst [vmem:[#allocation2 + $0x1b8] sm:$0xff] %v11236_v13 }
 0x16f   : >> { %v1120_v17 = vpop.f32.mrb[55].mxu1  ;;  %v1624_v18 = vmax.f32 %v1618_v11, %v1621_v15  ;;  %v1625_v23 = vmax.f32 %v1619_v12, %v1623_v16  ;;  %v13899_v24 = vld [vmem:[#allocation3 + $0x59] sm:$0xff]  ;;  %v1629_v28 = vld [vmem:[#allocation2 + $0x197] ss:$2 sm:$0x1f] }
 0x170   : >> { %1393 = vst [vmem:[#allocation2 + $0x1b0] sm:$0xff] %v1120_v17  ;;  %v1627_v27 = vld [vmem:[#allocation2 + $0x187] ss:$2 sm:$0xff]  ;;  %11320 = vmatmul.mubr.msk.f32.gmra.mrb[108].mxu1 %vm1835_vm4, %v13899_v24  ;;  %v13965_v16 = vld [vmem:[#allocation3 + $0x48] sm:$0xff] }
 0x171   : >> { %v1630_v29 = vmax.f32 %v1624_v18, %v1627_v27  ;;  %v1631_v30 = vmax.f32 %v1625_v23, %v1629_v28  ;;  %v11239_v31 = vpop.f32.mrb[56].mxu1  ;;  %11326 = vmatprep.mubr.msk.f32.mxu1 %vm1835_vm4, %v1806_v14  ;;  %v13970_v18 = vld [vmem:[#allocation3 + $0x50] sm:$0xff] }
 0x172   : >> { %1396 = vst [vmem:[#allocation2 + $0x1c8] sm:$0xff] %v11239_v31  ;;  %v1130_v33 = vpop.f32.mrb[57].mxu1  ;;  %v13910_v34 = vld [vmem:[#allocation3 + $0x61] sm:$0xff]  ;;  %v13976_v31 = vld [vmem:[#allocation3 + $0x58] sm:$0xff] }
 0x173   : >> { %v13915_v36 = vadd.f32 %v13539_v0, %v1630_v29  ;;  %v1633_v37 = vadd.f32 %v13539_v0, %v1631_v30  ;;  %1395 = vst [vmem:[#allocation2 + $0x1c0] sm:$0xff] %v1130_v33  ;;  %11657 = vmatmul.mubr.msk.f32.vlgmr.msra.gmra.mrb[0].mxu0 %vm1835_vm4, %v13910_v34  ;;  %v2158_v29 = vld [vmem:[#allocation3 + $0x2] sm:$0xff]  ;;  %v9965_v33 = vld [vmem:[%s15706_s3 + $0x48] sm:$0xff] }
 0x174   : >> { %11327 = vmatmul.mubr.msk.f32.vlgmr.msra.gmra.mrb[98].mxu1 %vm1835_vm4, %v1807_v32  ;;  %11659 = vmatprep.mubr.msk.f32.mxu0 %vm13431_vm5, %v13432_v56  ;;  %v9964_v32 = vld [vmem:[%s15706_s3 + $0x40] sm:$0xff] }
 0x175   : >> { %v1634_v38 = vmax.f32 %v13915_v36, 0.0  ;;  %v1635_v40 = vmax.f32 %v1633_v37, 0.0  ;;  %11329 = vmatprep.mubr.msk.f32.mxu1 %vm1835_vm4, %v1466_v22  ;;  %v11242_v41 = vpop.f32.mrb[58].mxu1  ;;  %12517 = vmatpush3.bf16.msra.mxu1 %v13858_v39 }
 0x176   : >> { %1398 = vst [vmem:[#allocation2 + $0x1d8] sm:$0xff] %v11242_v41  ;;  %v1140_v42 = vpop.f32.mrb[59].mxu1  ;;  %12575 = vmatpush3.bf16.msra.mxu0 %v13837_v54  ;;  %12519 = vmatprep.subr.bf16.mxu1 %v13912_v35 }
 0x177   : >> { %1636 = vst [vmem:[#allocation3 + $0x6a] sm:$0xff] %v1634_v38  ;;  %1637 = vst [vmem:[#allocation3 + $0x72] sm:$0x1f] %v1635_v40  ;;  %12576 = vmatprep.subr.bf16.mxu0 %v13430_v55  ;;  %v1639_v22 = vld [vmem:[#allocation2 + $0x1a4] ss:$2 sm:$0xff] }
 0x178   : >> { %1397 = vst [vmem:[#allocation2 + $0x1d0] sm:$0xff] %v1140_v42  ;;  %11330 = vmatmul.mubr.msk.f32.gmra.mrb[100].mxu1 %vm1835_vm4, %v13932_v43  ;;  %v1641_v45 = vld [vmem:[#allocation2 + $0x1b4] ss:$2 sm:$0x1f]  ;;  %v1643_v46 = vld [vmem:[#allocation2 + $0x1a5] ss:$2 sm:$0xff] }
 0x179   : >> { %11332 = vmatprep.mubr.msk.f32.mxu1 %vm1835_vm4, %v13937_v19  ;;  %v11245_v54 = vpop.f32.mrb[60].mxu1  ;;  %v1645_v47 = vld [vmem:[#allocation2 + $0x1b5] ss:$2 sm:$0x1f]  ;;  %v1646_v52 = vmax.f32 %v1639_v22, %v1643_v46 }
 0x17a   : >> { %1400 = vst [vmem:[#allocation2 + $0x1e8] sm:$0xff] %v11245_v54  ;;  %v1150_v48 = vpop.f32.mrb[61].mxu1  ;;  %v1647_v53 = vmax.f32 %v1641_v45, %v1645_v47  ;;  %v2159_v22 = vld [vmem:[#allocation3 + $0xa] sm:$0xff]  ;;  %v13990_v45 = vpack.c.bf16 %v9965_v33, %v9964_v32  ;;  %v14026_v33 = vld [vmem:[#allocation3 + $0x42] sm:$0xff] }
 0x17b   : >> { %1399 = vst [vmem:[#allocation2 + $0x1e0] sm:$0xff] %v1150_v48 }
 0x17c   : >> { %11333 = vmatmul.mubr.msk.f32.gmra.mrb[102].mxu1 %vm1835_vm4, %v13941_v49 }
 0x17d   : >> { %11335 = vmatprep.mubr.msk.f32.mxu1 %vm1835_vm4, %v13945_v50  ;;  %v11248_v58 = vpop.f32.mrb[62].mxu1 }
 0x17e   : >> { %1402 = vst [vmem:[#allocation2 + $0x1f8] sm:$0xff] %v11248_v58  ;;  %v1160_v62 = vpop.f32.mrb[63].mxu1  ;;  %v13951_v6 = vld [vmem:[#allocation3 + $0x69] sm:$0xff]  ;;  %v4817_v17 = vld [vmem:[#allocation3 + $0x71] sm:$0xff] }
 0x17f   : >> { %v1649_v60 = vld [vmem:[#allocation2 + $0x1c2] ss:$2 sm:$0xff]  ;;  %v1651_v61 = vld [vmem:[#allocation2 + $0x1d2] ss:$2 sm:$0x1f]  ;;  %1401 = vst [vmem:[#allocation2 + $0x1f0] sm:$0xff] %v1160_v62  ;;  %11660 = vmatmul.mubr.msk.f32.gmra.mrb[2].mxu0 %vm1835_vm4, %v13951_v6 }
 0x180   : >> { %v1652_v63 = vmax.f32 %v1646_v52, %v1649_v60  ;;  %v1653_v4 = vmax.f32 %v1647_v53, %v1651_v61  ;;  %v1655_v7 = vld [vmem:[#allocation2 + $0x1c3] ss:$2 sm:$0xff]  ;;  %v1657_v8 = vld [vmem:[#allocation2 + $0x1d3] ss:$2 sm:$0x1f]  ;;  %11336 = vmatmul.mubr.msk.f32.gmra.mrb[104].mxu1 %vm1835_vm4, %v13949_v5  ;;  %11662 = vmatprep.mubr.msk.f32.mxu0 %vm13431_vm5, %v13432_v56 }
 0x181   : >> { %11338 = vmatprep.mubr.msk.f32.mxu1 %vm1835_vm4, %v13957_v9  ;;  %v11251_v12 = vpop.f32.mrb[64].mxu1  ;;  %v13993_v52 = vld [vmem:[#allocation3 + $0x12] sm:$0xff] }
 0x182   : >> { %v1658_v10 = vmax.f32 %v1652_v63, %v1655_v7  ;;  %v1659_v11 = vmax.f32 %v1653_v4, %v1657_v8  ;;  %1404 = vst [vmem:[#allocation2 + $0x208] sm:$0xff] %v11251_v12  ;;  %v1170_v13 = vpop.f32.mrb[65].mxu1  ;;  %v1667_v27 = vld [vmem:[#allocation2 + $0x1e0] ss:$2 sm:$0xff]  ;;  %v1671_v28 = vld [vmem:[#allocation2 + $0x1e1] ss:$2 sm:$0xff] }
 0x183   : >> { %1403 = vst [vmem:[#allocation2 + $0x200] sm:$0xff] %v1170_v13  ;;  %11663 = vmatmul.mubr.msk.f32.gmra.mrb[4].mxu0 %vm1835_vm4, %v4817_v17  ;;  %v1674_v37 = vmax.f32 %v1667_v27, %v1671_v28  ;;  %v14002_v4 = vld [vmem:[#allocation3 + $0x1a] sm:$0xff]  ;;  %v14006_v8 = vld [vmem:[#allocation3 + $0x22] sm:$0xff] }
 0x184   : >> { %v1660_v14 = vadd.f32 %v13539_v0, %v1658_v10  ;;  %v1661_v15 = vadd.f32 %v13539_v0, %v1659_v11  ;;  %11339 = vmatmul.mubr.msk.f32.gmra.mrb[106].mxu1 %vm1835_vm4, %v13965_v16  ;;  %11665 = vmatprep.mubr.msk.f32.mxu0 %vm13431_vm5, %v13432_v56 }
 0x185   : >> { %11341 = vmatprep.mubr.msk.f32.mxu1 %vm1835_vm4, %v13970_v18  ;;  %v11254_v26 = vpop.f32.mrb[66].mxu1 }
 0x186   : >> { %v1662_v23 = vmax.f32 %v1660_v14, 0.0  ;;  %v1663_v25 = vmax.f32 %v1661_v15, 0.0  ;;  %1406 = vst [vmem:[#allocation2 + $0x218] sm:$0xff] %v11254_v26  ;;  %v1180_v30 = vpop.f32.mrb[67].mxu1  ;;  %v14013_v15 = vld [vmem:[#allocation3 + $0x2a] sm:$0xff] }
 0x187   : >> { %1405 = vst [vmem:[#allocation2 + $0x210] sm:$0xff] %v1180_v30  ;;  %v1669_v54 = vld [vmem:[#allocation2 + $0x1f0] ss:$2 sm:$0x1f] }
 0x188   : >> { %1664 = vst [vmem:[#allocation3 + $0x79] sm:$0xff] %v1662_v23  ;;  %1665 = vst [vmem:[#allocation3 + $0x81] sm:$0x1f] %v1663_v25  ;;  %11342 = vmatmul.mubr.msk.f32.gmra.mrb[108].mxu1 %vm1835_vm4, %v13976_v31  ;;  %11666 = vmatmul.mubr.msk.f32.gmra.mrb[6].mxu0 %vm1835_vm4, %v1662_v23  ;;  %v1673_v46 = vld [vmem:[#allocation2 + $0x1f1] ss:$2 sm:$0x1f] }
 0x189   : >> { %v11257_v40 = vpop.f32.mrb[68].mxu1  ;;  %11348 = vmatprep.mubr.msk.f32.mxu1 %vm1835_vm4, %v2158_v29  ;;  %11668 = vmatprep.mubr.msk.f32.mxu0 %vm13431_vm5, %v13432_v56  ;;  %v1675_v60 = vmax.f32 %v1669_v54, %v1673_v46  ;;  %v14018_v23 = vld [vmem:[#allocation3 + $0x32] sm:$0xff]  ;;  %v14022_v30 = vld [vmem:[#allocation3 + $0x3a] sm:$0xff] }
 0x18a   : >> { %v1677_v41 = vld [vmem:[#allocation2 + $0x1fe] ss:$2 sm:$0xff]  ;;  %1408 = vst [vmem:[#allocation2 + $0x228] sm:$0xff] %v11257_v40  ;;  %v1190_v42 = vpop.f32.mrb[69].mxu1  ;;  %v1683_v48 = vld [vmem:[#allocation2 + $0x1ff] ss:$2 sm:$0xff] }
 0x18b   : >> { %v1680_v47 = vmax.f32 %v1674_v37, %v1677_v41  ;;  %1407 = vst [vmem:[#allocation2 + $0x220] sm:$0xff] %v1190_v42 }
 0x18c   : >> { %11349 = vmatmul.mubr.msk.f32.vlgmr.msra.gmra.mrb[98].mxu1 %vm1835_vm4, %v2159_v22 }
 0x18d   : >> { %v1686_v53 = vmax.f32 %v1680_v47, %v1683_v48  ;;  %11351 = vmatprep.mubr.msk.f32.mxu1 %vm1835_vm4, %v13993_v52  ;;  %v11260_v58 = vpop.f32.mrb[70].mxu1  ;;  %12521 = vmatpush3.bf16.msra.mxu1 %v13912_v35  ;;  %v14030_v47 = vld [vmem:[#allocation3 + $0x4a] sm:$0xff] }
 0x18e   : >> { %1410 = vst [vmem:[#allocation2 + $0x238] sm:$0xff] %v11260_v58  ;;  %v1200_v61 = vpop.f32.mrb[71].mxu1  ;;  %12523 = vmatprep.subr.bf16.mxu1 %v13990_v45  ;;  %v1679_v63 = vld [vmem:[#allocation2 + $0x20e] ss:$2 sm:$0x1f] }
 0x18f   : >> { %v14000_v62 = vadd.f32 %v13539_v0, %v1686_v53  ;;  %1409 = vst [vmem:[#allocation2 + $0x230] sm:$0xff] %v1200_v61  ;;  %v1681_v7 = vmax.f32 %v1675_v60, %v1679_v63  ;;  %v1685_v11 = vld [vmem:[#allocation2 + $0x20f] ss:$2 sm:$0x1f]  ;;  %v14035_v53 = vld [vmem:[#allocation3 + $0x52] sm:$0xff] }
 0x190   : >> { %11352 = vmatmul.mubr.msk.f32.gmra.mrb[100].mxu1 %vm1835_vm4, %v14002_v4 }
 0x191   : >> { %v1690_v10 = vmax.f32 %v14000_v62, 0.0  ;;  %11354 = vmatprep.mubr.msk.f32.mxu1 %vm1835_vm4, %v14006_v8  ;;  %v11263_v12 = vpop.f32.mrb[72].mxu1  ;;  %v1687_v13 = vmax.f32 %v1681_v7, %v1685_v11  ;;  %v2346_v7 = vld [vmem:[#allocation3 + $0x3] sm:$0xff] }
 0x192   : >> { %1412 = vst [vmem:[#allocation2 + $0x248] sm:$0xff] %v11263_v12  ;;  %v1210_v14 = vpop.f32.mrb[73].mxu1  ;;  %v1695_v27 = vld [vmem:[#allocation2 + $0x21c] ss:$2 sm:$0xff]  ;;  %v1699_v28 = vld [vmem:[#allocation2 + $0x21d] ss:$2 sm:$0xff] }
 0x193   : >> { %1692 = vst [vmem:[#allocation3 + $0x88] sm:$0xff] %v1690_v10  ;;  %1411 = vst [vmem:[#allocation2 + $0x240] sm:$0xff] %v1210_v14  ;;  %v1689_v17 = vadd.f32 %v13539_v0, %v1687_v13  ;;  %v1702_v37 = vmax.f32 %v1695_v27, %v1699_v28  ;;  %v9978_v11 = vld [vmem:[%s15706_s3 + $0x50] sm:$0xff] }
 0x194   : >> { %11355 = vmatmul.mubr.msk.f32.gmra.mrb[102].mxu1 %vm1835_vm4, %v14013_v15  ;;  %v14248_v62 = vld [vmem:[#allocation3 + $0x21] sm:$0xff] }
 0x195   : >> { %11357 = vmatprep.mubr.msk.f32.mxu1 %vm1835_vm4, %v14018_v23  ;;  %v11266_v25 = vpop.f32.mrb[74].mxu1  ;;  %v1691_v26 = vmax.f32 %v1689_v17, 0.0  ;;  %v14045_v17 = vld [vmem:[#allocation3 + $0x5a] sm:$0xff] }
 0x196   : >> { %1414 = vst [vmem:[#allocation2 + $0x258] sm:$0xff] %v11266_v25  ;;  %v1220_v29 = vpop.f32.mrb[75].mxu1  ;;  %v1697_v32 = vld [vmem:[#allocation2 + $0x22c] ss:$2 sm:$0x1f] }
 0x197   : >> { %1413 = vst [vmem:[#allocation2 + $0x250] sm:$0xff] %v1220_v29  ;;  %1693 = vst [vmem:[#allocation3 + $0x90] sm:$0x1f] %v1691_v26  ;;  %v1701_v40 = vld [vmem:[#allocation2 + $0x22d] ss:$2 sm:$0x1f] }
 0x198   : >> { %11358 = vmatmul.mubr.msk.f32.gmra.mrb[104].mxu1 %vm1835_vm4, %v14022_v30  ;;  %v1703_v58 = vmax.f32 %v1697_v32, %v1701_v40  ;;  %v9979_v26 = vld [vmem:[%s15706_s3 + $0x58] sm:$0xff] }
 0x199   : >> { %11360 = vmatprep.mubr.msk.f32.mxu1 %vm1835_vm4, %v14026_v33  ;;  %v11269_v41 = vpop.f32.mrb[76].mxu1  ;;  %v14056_v40 = vpack.c.bf16 %v9979_v26, %v9978_v11  ;;  %v2350_v11 = vld [vmem:[#allocation3 + $0x23] sm:$0xff] }
 0x19a   : >> { %v1705_v42 = vld [vmem:[#allocation2 + $0x23a] ss:$2 sm:$0xff]  ;;  %1416 = vst [vmem:[#allocation2 + $0x268] sm:$0xff] %v11269_v41  ;;  %v1230_v22 = vpop.f32.mrb[77].mxu1  ;;  %v4819_v54 = vld [vmem:[#allocation3 + $0x81] sm:$0xff] }
 0x19b   : >> { %v1708_v46 = vmax.f32 %v1702_v37, %v1705_v42  ;;  %1415 = vst [vmem:[#allocation2 + $0x260] sm:$0xff] %v1230_v22  ;;  %11669 = vmatmul.mubr.msk.f32.gmra.mrb[8].mxu0 %vm1835_vm4, %v4819_v54  ;;  %v1711_v48 = vld [vmem:[#allocation2 + $0x23b] ss:$2 sm:$0xff] }
 0x19c   : >> { %11361 = vmatmul.mubr.msk.f32.gmra.mrb[106].mxu1 %vm1835_vm4, %v14030_v47  ;;  %11671 = vmatprep.mubr.msk.f32.mxu0 %vm13431_vm5, %v13432_v56  ;;  %v2347_v42 = vld [vmem:[#allocation3 + $0xb] sm:$0xff]  ;;  %v2348_v22 = vld [vmem:[#allocation3 + $0x13] sm:$0xff] }
 0x19d   : >> { %v1714_v60 = vmax.f32 %v1708_v46, %v1711_v48  ;;  %11363 = vmatprep.mubr.msk.f32.mxu1 %vm1835_vm4, %v14035_v53  ;;  %v11272_v61 = vpop.f32.mrb[78].mxu1 }
 0x19e   : >> { %v1707_v63 = vld [vmem:[#allocation2 + $0x24a] ss:$2 sm:$0x1f]  ;;  %1418 = vst [vmem:[#allocation2 + $0x278] sm:$0xff] %v11272_v61  ;;  %v1240_v14 = vpop.f32.mrb[79].mxu1  ;;  %v4820_v25 = vld [vmem:[#allocation3 + $0x89] sm:$0xff] }
 0x19f   : >> { %v1716_v12 = vadd.f32 %v13539_v0, %v1714_v60  ;;  %v1709_v13 = vmax.f32 %v1703_v58, %v1707_v63  ;;  %v1713_v27 = vld [vmem:[#allocation2 + $0x24b] ss:$2 sm:$0x1f]  ;;  %1417 = vst [vmem:[#allocation2 + $0x270] sm:$0xff] %v1240_v14  ;;  %11672 = vmatmul.mubr.msk.f32.gmra.mrb[10].mxu0 %vm1835_vm4, %v4820_v25 }
 0x1a0   : >> { %11364 = vmatmul.mubr.msk.f32.gmra.mrb[108].mxu1 %vm1835_vm4, %v14045_v17  ;;  %11674 = vmatprep.mubr.msk.f32.mxu0 %vm13431_vm5, %v13432_v56  ;;  %v2349_v60 = vld [vmem:[#allocation3 + $0x1b] sm:$0xff] }
 0x1a1   : >> { %v1718_v28 = vmax.f32 %v1716_v12, 0.0  ;;  %v1715_v29 = vmax.f32 %v1709_v13, %v1713_v27  ;;  %v11275_v32 = vpop.f32.mrb[80].mxu1  ;;  %11370 = vmatprep.mubr.msk.f32.mxu1 %vm1835_vm4, %v2346_v7 }
 0x1a2   : >> { %1420 = vst [vmem:[#allocation2 + $0x288] sm:$0xff] %v11275_v32  ;;  %v1250_v37 = vpop.f32.mrb[81].mxu1  ;;  %v1723_v48 = vld [vmem:[#allocation2 + $0x258] ss:$2 sm:$0xff]  ;;  %v1727_v58 = vld [vmem:[#allocation2 + $0x259] ss:$2 sm:$0xff] }
 0x1a3   : >> { %1720 = vst [vmem:[#allocation3 + $0x97] sm:$0xff] %v1718_v28  ;;  %v1717_v41 = vadd.f32 %v13539_v0, %v1715_v29  ;;  %1419 = vst [vmem:[#allocation2 + $0x280] sm:$0xff] %v1250_v37  ;;  %v1730_v12 = vmax.f32 %v1723_v48, %v1727_v58  ;;  %v2351_v32 = vld [vmem:[#allocation3 + $0x2b] sm:$0xff] }
 0x1a4   : >> { %11371 = vmatmul.mubr.msk.f32.vlgmr.msra.gmra.mrb[98].mxu1 %vm1835_vm4, %v2347_v42 }
 0x1a5   : >> { %v1719_v54 = vmax.f32 %v1717_v41, 0.0  ;;  %11373 = vmatprep.mubr.msk.f32.mxu1 %vm1835_vm4, %v2348_v22  ;;  %v11278_v46 = vpop.f32.mrb[82].mxu1  ;;  %12525 = vmatpush3.bf16.msra.mxu1 %v13990_v45  ;;  %v2352_v22 = vld [vmem:[#allocation3 + $0x33] sm:$0xff] }
 0x1a6   : >> { %1422 = vst [vmem:[#allocation2 + $0x298] sm:$0xff] %v11278_v46  ;;  %v1260_v61 = vpop.f32.mrb[83].mxu1  ;;  %12527 = vmatprep.subr.bf16.mxu1 %v14056_v40  ;;  %v1725_v63 = vld [vmem:[#allocation2 + $0x268] ss:$2 sm:$0x1f] }
 0x1a7   : >> { %1721 = vst [vmem:[#allocation3 + $0x9f] sm:$0x1f] %v1719_v54  ;;  %v1729_v7 = vld [vmem:[#allocation2 + $0x269] ss:$2 sm:$0x1f]  ;;  %1421 = vst [vmem:[#allocation2 + $0x290] sm:$0xff] %v1260_v61 }
 0x1a8   : >> { %11374 = vmatmul.mubr.msk.f32.gmra.mrb[100].mxu1 %vm1835_vm4, %v2349_v60  ;;  %v1731_v13 = vmax.f32 %v1725_v63, %v1729_v7  ;;  %v2353_v7 = vld [vmem:[#allocation3 + $0x3b] sm:$0xff] }
 0x1a9   : >> { %11376 = vmatprep.mubr.msk.f32.mxu1 %vm1835_vm4, %v2350_v11  ;;  %v11281_v14 = vpop.f32.mrb[84].mxu1  ;;  %v2354_v11 = vld [vmem:[#allocation3 + $0x43] sm:$0xff] }
 0x1aa   : >> { %v1733_v25 = vld [vmem:[#allocation2 + $0x276] ss:$2 sm:$0xff]  ;;  %v1735_v26 = vld [vmem:[#allocation2 + $0x286] ss:$2 sm:$0x1f]  ;;  %1424 = vst [vmem:[#allocation2 + $0x2a8] sm:$0xff] %v11281_v14 }
 0x1ab   : >> { %v4821_v27 = vld [vmem:[#allocation3 + $0x91] sm:$0xff]  ;;  %v1736_v28 = vmax.f32 %v1730_v12, %v1733_v25  ;;  %v1737_v29 = vmax.f32 %v1731_v13, %v1735_v26  ;;  %v1270_v37 = vpop.f32.mrb[85].mxu1 }
 0x1ac   : >> { %11675 = vmatmul.mubr.msk.f32.gmra.mrb[12].mxu0 %vm1835_vm4, %v4821_v27  ;;  %v1739_v41 = vld [vmem:[#allocation2 + $0x277] ss:$2 sm:$0xff]  ;;  %v1741_v42 = vld [vmem:[#allocation2 + $0x287] ss:$2 sm:$0x1f]  ;;  %11377 = vmatmul.mubr.msk.f32.gmra.mrb[102].mxu1 %vm1835_vm4, %v2351_v32  ;;  %1423 = vst [vmem:[#allocation2 + $0x2a0] sm:$0xff] %v1270_v37 }
 0x1ad   : >> { %11677 = vmatprep.mubr.msk.f32.mxu0 %vm13431_vm5, %v13432_v56  ;;  %v1742_v54 = vmax.f32 %v1736_v28, %v1739_v41  ;;  %v1743_v46 = vmax.f32 %v1737_v29, %v1741_v42  ;;  %11379 = vmatprep.mubr.msk.f32.mxu1 %vm1835_vm4, %v2352_v22  ;;  %v11284_v48 = vpop.f32.mrb[86].mxu1  ;;  %v2355_v28 = vld [vmem:[#allocation3 + $0x4b] sm:$0xff]  ;;  %v2356_v37 = vld [vmem:[#allocation3 + $0x53] sm:$0xff] }
 0x1ae   : >> { %1426 = vst [vmem:[#allocation2 + $0x2b8] sm:$0xff] %v11284_v48  ;;  %v4822_v58 = vld [vmem:[#allocation3 + $0x99] sm:$0xff]  ;;  %v1280_v60 = vpop.f32.mrb[87].mxu1 }
 0x1af   : >> { %v1744_v61 = vadd.f32 %v13539_v0, %v1742_v54  ;;  %v1745_v63 = vadd.f32 %v13539_v0, %v1743_v46  ;;  %1425 = vst [vmem:[#allocation2 + $0x2b0] sm:$0xff] %v1280_v60  ;;  %v9992_v46 = vld [vmem:[%s15706_s3 + $0x60] sm:$0xff]  ;;  %v9993_v48 = vld [vmem:[%s15706_s3 + $0x68] sm:$0xff] }
 0x1b0   : >> { %11678 = vmatmul.mubr.msk.f32.gmra.mrb[14].mxu0 %vm1835_vm4, %v4822_v58  ;;  %11380 = vmatmul.mubr.msk.f32.gmra.mrb[104].mxu1 %vm1835_vm4, %v2353_v7  ;;  %v2534_v58 = vld [vmem:[#allocation3 + $0xf] sm:$0xff] }
 0x1b1   : >> { %11680 = vmatprep.mubr.msk.f32.mxu0 %vm13431_vm5, %v13432_v56  ;;  %v1746_v12 = vmax.f32 %v1744_v61, 0.0  ;;  %v1747_v13 = vmax.f32 %v1745_v63, 0.0  ;;  %11382 = vmatprep.mubr.msk.f32.mxu1 %vm1835_vm4, %v2354_v11  ;;  %v11287_v14 = vpop.f32.mrb[88].mxu1  ;;  %v14089_v11 = vpack.c.bf16 %v9993_v48, %v9992_v46  ;;  %v14335_v36 = vld [vmem:[#allocation3 + $0x92] sm:$0xff] }
 0x1b2   : >> { %1428 = vst [vmem:[#allocation2 + $0x2c8] sm:$0xff] %v11287_v14  ;;  %v1290_v25 = vpop.f32.mrb[89].mxu1 }
 0x1b3   : >> { %1748 = vst [vmem:[#allocation3 + $0xa6] sm:$0xff] %v1746_v12  ;;  %1749 = vst [vmem:[#allocation3 + $0xae] sm:$0x1f] %v1747_v13  ;;  %v1751_v26 = vld [vmem:[#allocation2 + $0x294] ss:$2 sm:$0xff] }
 0x1b4   : >> { %v1753_v27 = vld [vmem:[#allocation2 + $0x2a4] ss:$2 sm:$0x1f]  ;;  %1427 = vst [vmem:[#allocation2 + $0x2c0] sm:$0xff] %v1290_v25  ;;  %v1755_v29 = vld [vmem:[#allocation2 + $0x295] ss:$2 sm:$0xff]  ;;  %11383 = vmatmul.mubr.msk.f32.gmra.mrb[106].mxu1 %vm1835_vm4, %v2355_v28 }
 0x1b5   : >> { %v1757_v32 = vld [vmem:[#allocation2 + $0x2a5] ss:$2 sm:$0x1f]  ;;  %11385 = vmatprep.mubr.msk.f32.mxu1 %vm1835_vm4, %v2356_v37  ;;  %v11290_v41 = vpop.f32.mrb[90].mxu1  ;;  %v1758_v22 = vmax.f32 %v1751_v26, %v1755_v29 }
 0x1b6   : >> { %1430 = vst [vmem:[#allocation2 + $0x2d8] sm:$0xff] %v11290_v41  ;;  %v1300_v42 = vpop.f32.mrb[91].mxu1  ;;  %v1759_v54 = vmax.f32 %v1753_v27, %v1757_v32  ;;  %v2535_v26 = vld [vmem:[#allocation3 + $0x17] sm:$0xff] }
 0x1b7   : >> { %1429 = vst [vmem:[#allocation2 + $0x2d0] sm:$0xff] %v1300_v42 }
 0x1b8   : >> { %11386 = vmatmul.mubr.msk.f32.gmra.mrb[108].mxu1 %vm1835_vm4, %v1606_v59 }
 0x1b9   : >> { %11392 = vmatprep.mubr.msk.f32.mxu1 %vm1835_vm4, %v2534_v58  ;;  %v11293_v60 = vpop.f32.mrb[92].mxu1 }
 0x1ba   : >> { %v4823_v7 = vld [vmem:[#allocation3 + $0xa1] sm:$0xff]  ;;  %1432 = vst [vmem:[#allocation2 + $0x2e8] sm:$0xff] %v11293_v60  ;;  %v1310_v59 = vpop.f32.mrb[93].mxu1  ;;  %v4824_v32 = vld [vmem:[#allocation3 + $0xa9] sm:$0xff] }
 0x1bb   : >> { %v1761_v61 = vld [vmem:[#allocation2 + $0x2b2] ss:$2 sm:$0xff]  ;;  %v1763_v63 = vld [vmem:[#allocation2 + $0x2c2] ss:$2 sm:$0x1f]  ;;  %11681 = vmatmul.mubr.msk.f32.gmra.mrb[16].mxu0 %vm1835_vm4, %v4823_v7  ;;  %1431 = vst [vmem:[#allocation2 + $0x2e0] sm:$0xff] %v1310_v59 }
 0x1bc   : >> { %v1764_v12 = vmax.f32 %v1758_v22, %v1761_v61  ;;  %v1765_v13 = vmax.f32 %v1759_v54, %v1763_v63  ;;  %v1767_v14 = vld [vmem:[#allocation2 + $0x2b3] ss:$2 sm:$0xff]  ;;  %v1769_v25 = vld [vmem:[#allocation2 + $0x2c3] ss:$2 sm:$0x1f]  ;;  %11393 = vmatmul.mubr.msk.f32.vlgmr.msra.gmra.mrb[98].mxu1 %vm1835_vm4, %v2535_v26  ;;  %11683 = vmatprep.mubr.msk.f32.mxu0 %vm13431_vm5, %v13432_v56 }
 0x1bd   : >> { %11395 = vmatprep.mubr.msk.f32.mxu1 %vm1835_vm4, %v14093_v51  ;;  %12529 = vmatpush3.bf16.msra.mxu1 %v14056_v40  ;;  %v11296_v29 = vpop.f32.mrb[94].mxu1  ;;  %v14103_v22 = vld [vmem:[#allocation3 + $0x27] sm:$0xff]  ;;  %v14108_v54 = vld [vmem:[#allocation3 + $0x2f] sm:$0xff]  ;;  %v14114_v63 = vld [vmem:[#allocation3 + $0x37] sm:$0xff] }
 0x1be   : >> { %v1770_v27 = vmax.f32 %v1764_v12, %v1767_v14  ;;  %v1771_v28 = vmax.f32 %v1765_v13, %v1769_v25  ;;  %12531 = vmatprep.subr.bf16.mxu1 %v14089_v11  ;;  %1434 = vst [vmem:[#allocation2 + $0x2f8] sm:$0xff] %v11296_v29  ;;  %v1320_v37 = vpop.f32.mrb[95].mxu1  ;;  %v1779_v46 = vld [vmem:[#allocation2 + $0x2d0] ss:$2 sm:$0xff]  ;;  %v1783_v48 = vld [vmem:[#allocation2 + $0x2d1] ss:$2 sm:$0xff] }
 0x1bf   : >> { %11684 = vmatmul.mubr.msk.f32.gmra.mrb[18].mxu0 %vm1835_vm4, %v4824_v32  ;;  %1433 = vst [vmem:[#allocation2 + $0x2f0] sm:$0xff] %v1320_v37  ;;  %v4825_v61 = vld [vmem:[#allocation3 + $0xb1] sm:$0xf]  ;;  %v1786_v7 = vmax.f32 %v1779_v46, %v1783_v48  ;;  %v14119_v12 = vld [vmem:[#allocation3 + $0x3f] sm:$0xff]  ;;  %v14127_v26 = vld [vmem:[#allocation3 + $0x47] sm:$0xff] }
 0x1c0   : >> { %v1772_v41 = vadd.f32 %v13539_v0, %v1770_v27  ;;  %v1773_v42 = vadd.f32 %v13539_v0, %v1771_v28  ;;  %11396 = vmatmul.mubr.msk.f32.gmra.mrb[100].mxu1 %vm1835_vm4, %v14103_v22  ;;  %11686 = vmatprep.mubr.msk.f32.mxu0 %vm13431_vm5, %v13432_v56  ;;  %v14125_v13 = vld [vmem:[#allocation3 + $0x60] sm:$0xff]  ;;  %v14134_v27 = vld [vmem:[#allocation3 + $0x4f] sm:$0xff]  ;;  %v14143_v32 = vld [vmem:[#allocation3 + $0x57] sm:$0xff] }
 0x1c1   : >> { %11398 = vmatprep.mubr.msk.f32.mxu1 %vm1835_vm4, %v14108_v54  ;;  %v14140_v29 = vld [vmem:[#allocation3 + $0x68] sm:$0xff]  ;;  %v14150_v37 = vld [vmem:[#allocation3 + $0x5f] sm:$0xff] }
 0x1c2   : >> { %v1774_v58 = vmax.f32 %v1772_v41, 0.0  ;;  %v1775_v60 = vmax.f32 %v1773_v42, 0.0  ;;  %v14156_v42 = vld [vmem:[#allocation3 + $0x70] sm:$0xff]  ;;  %v14158_v46 = vld [vmem:[#allocation3 + $0x67] sm:$0xff] }
 0x1c3   : >> { %11687 = vmatmul.mubr.msk.f32.gmra.mrb[20].mxu0 %vm1835_vm4, %v4825_v61  ;;  %v10006_v48 = vld [vmem:[%s15706_s3 + $0x70] sm:$0xff]  ;;  %v14173_v61 = vld [vmem:[#allocation3 + $0x78] sm:$0xff] }
 0x1c4   : >> { %1776 = vst [vmem:[#allocation3 + $0xb5] sm:$0xff] %v1774_v58  ;;  %1777 = vst [vmem:[#allocation3 + $0xbd] sm:$0x1f] %v1775_v60  ;;  %11399 = vmatmul.mubr.msk.f32.gmra.mrb[102].mxu1 %vm1835_vm4, %v14114_v63  ;;  %11693 = vmatprep.mubr.msk.f32.mxu0 %vm13431_vm5, %v13432_v56  ;;  %v10007_v58 = vld [vmem:[%s15706_s3 + $0x78] sm:$0xff]  ;;  %v2722_v60 = vld [vmem:[#allocation3 + $0x10] sm:$0xff] }
 0x1c5   : >> { %11401 = vmatprep.mubr.msk.f32.mxu1 %vm1835_vm4, %v14119_v12 }
 0x1c6   : >> { %v1789_v14 = vld [vmem:[#allocation2 + $0x2ee] ss:$2 sm:$0xff]  ;;  %v1795_v25 = vld [vmem:[#allocation2 + $0x2ef] ss:$2 sm:$0xff] }
 0x1c7   : >> { %11694 = vmatmul.mubr.msk.f32.vlgmr.msra.gmra.mrb[0].mxu0 %vm1835_vm4, %v14125_v13  ;;  %v1792_v59 = vmax.f32 %v1786_v7, %v1789_v14  ;;  %v14175_v7 = vpack.c.bf16 %v10007_v58, %v10006_v48  ;;  %v14186_v14 = vld [vmem:[#allocation3 + $0x80] sm:$0xff]  ;;  %v5312_v48 = vld [vmem:[#allocation3 + $0x6b] sm:$0xff] }
 0x1c8   : >> { %11402 = vmatmul.mubr.msk.f32.gmra.mrb[104].mxu1 %vm1835_vm4, %v14127_v26  ;;  %12578 = vmatpush3.bf16.msra.mxu0 %v13858_v39  ;;  %v14403_v58 = vld [vmem:[#allocation3 + $0x46] sm:$0xff] }
 0x1c9   : >> { %11404 = vmatprep.mubr.msk.f32.mxu1 %vm1835_vm4, %v14134_v27  ;;  %11696 = vmatprep.mubr.msk.f32.mxu0 %vm13431_vm5, %v13432_v56  ;;  %v1798_v28 = vmax.f32 %v1792_v59, %v1795_v25  ;;  %v14256_v25 = vld [vmem:[#allocation3 + $0x29] sm:$0xff]  ;;  %v14261_v59 = vld [vmem:[#allocation3 + $0x31] sm:$0xff] }
 0x1ca   : >> { %12579 = vmatprep.subr.bf16.mxu0 %v13430_v55 }
 0x1cb   : >> { %11697 = vmatmul.mubr.msk.f32.gmra.mrb[2].mxu0 %vm1835_vm4, %v14140_v29  ;;  %v1800_v39 = vadd.f32 %v13539_v0, %v1798_v28  ;;  %v5134_v28 = vld [vmem:[#allocation3 + $0x62] sm:$0xff] }
 0x1cc   : >> { %11405 = vmatmul.mubr.msk.f32.gmra.mrb[106].mxu1 %vm1835_vm4, %v14143_v32  ;;  %11699 = vmatprep.mubr.msk.f32.mxu0 %vm13431_vm5, %v13432_v56 }
 0x1cd   : >> { %11407 = vmatprep.mubr.msk.f32.mxu1 %vm1835_vm4, %v14150_v37  ;;  %v1802_v41 = vmax.f32 %v1800_v39, 0.0  ;;  %v14390_v39 = vld [vmem:[#allocation3 + $0x36] sm:$0xff] }
 0x1cf   : >> { %11700 = vmatmul.mubr.msk.f32.gmra.mrb[4].mxu0 %vm1835_vm4, %v14156_v42  ;;  %1804 = vst [vmem:[#allocation3 + $0xc4] sm:$0xff] %v1802_v41  ;;  %v14396_v41 = vld [vmem:[#allocation3 + $0x3e] sm:$0xff] }
 0x1d0   : >> { %11408 = vmatmul.mubr.msk.f32.gmra.mrb[108].mxu1 %vm1835_vm4, %v14158_v46  ;;  %11702 = vmatprep.mubr.msk.f32.mxu0 %vm13431_vm5, %v13432_v56 }
 0x1d1   : >> { %11414 = vmatprep.mubr.msk.f32.mxu1 %vm1835_vm4, %v2722_v60  ;;  %v14408_v60 = vld [vmem:[#allocation3 + $0x4e] sm:$0xff] }
 0x1d3   : >> { %11703 = vmatmul.mubr.msk.f32.gmra.mrb[6].mxu0 %vm1835_vm4, %v14173_v61 }
 0x1d4   : >> { %11415 = vmatmul.mubr.msk.f32.vlgmr.msra.gmra.mrb[98].mxu1 %vm1835_vm4, %v13932_v43  ;;  %11705 = vmatprep.mubr.msk.f32.mxu0 %vm13431_vm5, %v13432_v56  ;;  %v14206_v43 = vld [vmem:[#allocation3 + $0x90] sm:$0xff] }
 0x1d5   : >> { %11417 = vmatprep.mubr.msk.f32.mxu1 %vm1835_vm4, %v13937_v19  ;;  %12533 = vmatpush3.bf16.msra.mxu1 %v14089_v11  ;;  %v14216_v19 = vld [vmem:[#allocation3 + $0x98] sm:$0xff] }
 0x1d6   : >> { %12535 = vmatprep.subr.bf16.mxu1 %v14175_v7 }
 0x1d7   : >> { %11706 = vmatmul.mubr.msk.f32.gmra.mrb[8].mxu0 %vm1835_vm4, %v14186_v14 }
 0x1d8   : >> { %11418 = vmatmul.mubr.msk.f32.gmra.mrb[100].mxu1 %vm1835_vm4, %v13941_v49  ;;  %11708 = vmatprep.mubr.msk.f32.mxu0 %vm13431_vm5, %v13432_v56  ;;  %v14226_v49 = vld [vmem:[#allocation3 + $0xa0] sm:$0xff] }
 0x1d9   : >> { %11420 = vmatprep.mubr.msk.f32.mxu1 %vm1835_vm4, %v13945_v50  ;;  %v10020_v50 = vld [vmem:[%s15706_s3 + $0x80] sm:$0xff] }
 0x1db   : >> { %11709 = vmatmul.mubr.msk.f32.gmra.mrb[10].mxu0 %vm1835_vm4, %v1690_v10  ;;  %v4812_v10 = vld [vmem:[#allocation3 + $0xb0] sm:$0xf] }
 0x1dc   : >> { %11421 = vmatmul.mubr.msk.f32.gmra.mrb[102].mxu1 %vm1835_vm4, %v13949_v5  ;;  %11711 = vmatprep.mubr.msk.f32.mxu0 %vm13431_vm5, %v13432_v56  ;;  %v10021_v5 = vld [vmem:[%s15706_s3 + $0x88] sm:$0xff] }
 0x1dd   : >> { %11423 = vmatprep.mubr.msk.f32.mxu1 %vm1835_vm4, %v13957_v9  ;;  %v2910_v9 = vld [vmem:[#allocation3 + $0x11] sm:$0xff] }
 0x1df   : >> { %11712 = vmatmul.mubr.msk.f32.gmra.mrb[12].mxu0 %vm1835_vm4, %v14206_v43 }
 0x1e0   : >> { %11424 = vmatmul.mubr.msk.f32.gmra.mrb[104].mxu1 %vm1835_vm4, %v13965_v16  ;;  %11714 = vmatprep.mubr.msk.f32.mxu0 %vm13431_vm5, %v13432_v56  ;;  %v14241_v16 = vld [vmem:[#allocation3 + $0xa8] sm:$0xff] }
 0x1e1   : >> { %11426 = vmatprep.mubr.msk.f32.mxu1 %vm1835_vm4, %v13970_v18  ;;  %v14243_v18 = vpack.c.bf16 %v10021_v5, %v10020_v50  ;;  %v14414_v50 = vld [vmem:[#allocation3 + $0x56] sm:$0xff]  ;;  %v14419_v5 = vld [vmem:[#allocation3 + $0x5e] sm:$0xff] }
 0x1e3   : >> { %11715 = vmatmul.mubr.msk.f32.gmra.mrb[14].mxu0 %vm1835_vm4, %v14216_v19 }
 0x1e4   : >> { %11427 = vmatmul.mubr.msk.f32.gmra.mrb[106].mxu1 %vm1835_vm4, %v13976_v31  ;;  %11717 = vmatprep.mubr.msk.f32.mxu0 %vm13431_vm5, %v13432_v56  ;;  %v2911_v31 = vld [vmem:[#allocation3 + $0x19] sm:$0xff] }
 0x1e5   : >> { %11429 = vmatprep.mubr.msk.f32.mxu1 %vm1835_vm4, %v14125_v13 }
 0x1e7   : >> { %11718 = vmatmul.mubr.msk.f32.gmra.mrb[16].mxu0 %vm1835_vm4, %v14226_v49 }
 0x1e8   : >> { %11430 = vmatmul.mubr.msk.f32.gmra.mrb[108].mxu1 %vm1835_vm4, %v14140_v29  ;;  %11720 = vmatprep.mubr.msk.f32.mxu0 %vm13431_vm5, %v13432_v56 }
 0x1e9   : >> { %11436 = vmatprep.mubr.msk.f32.mxu1 %vm1835_vm4, %v2910_v9  ;;  %v11299_v9 = vpop.f32.mrb[96].mxu1 }
 0x1eb   : >> { %11721 = vmatmul.mubr.msk.f32.gmra.mrb[18].mxu0 %vm1835_vm4, %v14241_v16 }
 0x1ec   : >> { %11437 = vmatmul.mubr.msk.f32.vlgmr.msra.gmra.mrb[98].mxu1 %vm1835_vm4, %v2911_v31  ;;  %11723 = vmatprep.mubr.msk.f32.mxu0 %vm13431_vm5, %v13432_v56  ;;  %v5314_v31 = vld [vmem:[#allocation3 + $0x7b] sm:$0xff] }
 0x1ed   : >> { %11439 = vmatprep.mubr.msk.f32.mxu1 %vm1835_vm4, %v14248_v62  ;;  %12537 = vmatpush3.bf16.msra.mxu1 %v14175_v7 }
 0x1ee   : >> { %12539 = vmatprep.subr.bf16.mxu1 %v14243_v18 }
 0x1ef   : >> { %11724 = vmatmul.mubr.msk.f32.gmra.mrb[20].mxu0 %vm1835_vm4, %v4812_v10  ;;  %v1330_v10 = vpop.f32.mrb[97].mxu1 }
 0x1f0   : >> { %11440 = vmatmul.mubr.msk.f32.gmra.mrb[100].mxu1 %vm1835_vm4, %v14256_v25  ;;  %11730 = vmatprep.mubr.msk.f32.mxu0 %vm13431_vm5, %v13432_v56  ;;  %1435 = vst [vmem:[#allocation2 + $0x300] sm:$0xff] %v1330_v10  ;;  %v5317_v10 = vld [vmem:[#allocation3 + $0x93] sm:$0xff] }
 0x1f1   : >> { %11442 = vmatprep.mubr.msk.f32.mxu1 %vm1835_vm4, %v14261_v59 }
 0x1f3   : >> { %11731 = vmatmul.mubr.msk.f32.vlgmr.msra.gmra.mrb[0].mxu0 %vm1835_vm4, %v5134_v28 }
 0x1f4   : >> { %11443 = vmatmul.mubr.msk.f32.gmra.mrb[102].mxu1 %vm1835_vm4, %v13874_v20  ;;  %12581 = vmatpush3.bf16.msra.mxu0 %v13912_v35  ;;  %v14285_v20 = vld [vmem:[#allocation3 + $0x72] sm:$0xff]  ;;  %v14324_v35 = vld [vmem:[#allocation3 + $0x8a] sm:$0xff] }
 0x1f5   : >> { %11445 = vmatprep.mubr.msk.f32.mxu1 %vm1835_vm4, %v13876_v21  ;;  %11733 = vmatprep.mubr.msk.f32.mxu0 %vm13431_vm5, %v13432_v56  ;;  %v14295_v21 = vld [vmem:[#allocation3 + $0x7a] sm:$0xff] }
 0x1f6   : >> { %12582 = vmatprep.subr.bf16.mxu0 %v13430_v55 }
 0x1f7   : >> { %11734 = vmatmul.mubr.msk.f32.gmra.mrb[2].mxu0 %vm1835_vm4, %v1634_v38  ;;  %v14345_v38 = vld [vmem:[#allocation3 + $0x9a] sm:$0xff]  ;;  %v1797_v9 = vld [vmem:[#allocation2 + $0x2ff] ss:$2 sm:$0x1f] }
 0x1f8   : >> { %11446 = vmatmul.mubr.msk.f32.gmra.mrb[104].mxu1 %vm1835_vm4, %v13884_v44  ;;  %11736 = vmatprep.mubr.msk.f32.mxu0 %vm13431_vm5, %v13432_v56  ;;  %v10034_v44 = vld [vmem:[%s15706_s3 + $0x90] sm:$0xff] }
 0x1f9   : >> { %11448 = vmatprep.mubr.msk.f32.mxu1 %vm1835_vm4, %v13891_v57  ;;  %v10035_v57 = vld [vmem:[%s15706_s3 + $0x98] sm:$0xff] }
 0x1fb   : >> { %11737 = vmatmul.mubr.msk.f32.gmra.mrb[4].mxu0 %vm1835_vm4, %v14285_v20 }
 0x1fc   : >> { %11449 = vmatmul.mubr.msk.f32.gmra.mrb[106].mxu1 %vm1835_vm4, %v13899_v24  ;;  %11739 = vmatprep.mubr.msk.f32.mxu0 %vm13431_vm5, %v13432_v56  ;;  %v14311_v24 = vld [vmem:[#allocation3 + $0x82] sm:$0xff] }
 0x1fd   : >> { %11451 = vmatprep.mubr.msk.f32.mxu1 %vm1835_vm4, %v13910_v34  ;;  %v14313_v34 = vpack.c.bf16 %v10035_v57, %v10034_v44  ;;  %v14428_v44 = vld [vmem:[#allocation3 + $0x6e] sm:$0xff] }
 0x1fe   : >> { %v1781_v57 = vld [vmem:[#allocation2 + $0x2e0] ss:$2 sm:$0x1f] }
 0x1ff   : >> { %11740 = vmatmul.mubr.msk.f32.gmra.mrb[6].mxu0 %vm1835_vm4, %v14295_v21 }
 0x200   : >> { %11452 = vmatmul.mubr.msk.f32.gmra.mrb[108].mxu1 %vm1835_vm4, %v13951_v6  ;;  %11742 = vmatprep.mubr.msk.f32.mxu0 %vm13431_vm5, %v13432_v56  ;;  %v14355_v6 = vld [vmem:[#allocation3 + $0xa2] sm:$0xff] }
 0x201   : >> { %11458 = vmatprep.mubr.msk.f32.mxu1 %vm1835_vm4, %v13993_v52  ;;  %v14364_v52 = vld [vmem:[#allocation3 + $0xaa] sm:$0xff] }
 0x203   : >> { %11743 = vmatmul.mubr.msk.f32.gmra.mrb[8].mxu0 %vm1835_vm4, %v14311_v24 }
 0x204   : >> { %11459 = vmatmul.mubr.msk.f32.vlgmr.msra.gmra.mrb[98].mxu1 %vm1835_vm4, %v14002_v4  ;;  %11745 = vmatprep.mubr.msk.f32.mxu0 %vm13431_vm5, %v13432_v56  ;;  %v3109_v4 = vld [vmem:[#allocation3 + $0x6a] sm:$0xff] }
 0x205   : >> { %11461 = vmatprep.mubr.msk.f32.mxu1 %vm1835_vm4, %v14006_v8  ;;  %12541 = vmatpush3.bf16.msra.mxu1 %v14243_v18  ;;  %v10048_v8 = vld [vmem:[%s15706_s3 + $0xa0] sm:$0xff] }
 0x206   : >> { %12543 = vmatprep.subr.bf16.mxu1 %v14313_v34 }
 0x207   : >> { %11746 = vmatmul.mubr.msk.f32.gmra.mrb[10].mxu0 %vm1835_vm4, %v14324_v35 }
 0x208   : >> { %11462 = vmatmul.mubr.msk.f32.gmra.mrb[100].mxu1 %vm1835_vm4, %v14013_v15  ;;  %11748 = vmatprep.mubr.msk.f32.mxu0 %vm13431_vm5, %v13432_v56  ;;  %v10049_v15 = vld [vmem:[%s15706_s3 + $0xa8] sm:$0xff] }
 0x209   : >> { %11464 = vmatprep.mubr.msk.f32.mxu1 %vm1835_vm4, %v14018_v23  ;;  %v3286_v23 = vld [vmem:[#allocation3 + $0x1e] sm:$0xff] }
 0x20b   : >> { %11749 = vmatmul.mubr.msk.f32.gmra.mrb[12].mxu0 %vm1835_vm4, %v14335_v36 }
 0x20c   : >> { %11465 = vmatmul.mubr.msk.f32.gmra.mrb[102].mxu1 %vm1835_vm4, %v14022_v30  ;;  %11751 = vmatprep.mubr.msk.f32.mxu0 %vm13431_vm5, %v13432_v56  ;;  %v5144_v30 = vld [vmem:[#allocation3 + $0xb2] sm:$0xf] }
 0x20d   : >> { %11467 = vmatprep.mubr.msk.f32.mxu1 %vm1835_vm4, %v14026_v33  ;;  %v14378_v33 = vpack.c.bf16 %v10049_v15, %v10048_v8  ;;  %v5315_v8 = vld [vmem:[#allocation3 + $0x83] sm:$0xff] }
 0x20f   : >> { %11752 = vmatmul.mubr.msk.f32.gmra.mrb[14].mxu0 %vm1835_vm4, %v14345_v38 }
 0x210   : >> { %11468 = vmatmul.mubr.msk.f32.gmra.mrb[104].mxu1 %vm1835_vm4, %v14030_v47  ;;  %11754 = vmatprep.mubr.msk.f32.mxu0 %vm13431_vm5, %v13432_v56  ;;  %v3287_v47 = vld [vmem:[#allocation3 + $0x26] sm:$0xff] }
 0x211   : >> { %11470 = vmatprep.mubr.msk.f32.mxu1 %vm1835_vm4, %v14035_v53  ;;  %v14382_v53 = vld [vmem:[#allocation3 + $0x2e] sm:$0xff] }
 0x213   : >> { %11755 = vmatmul.mubr.msk.f32.gmra.mrb[16].mxu0 %vm1835_vm4, %v14355_v6 }
 0x214   : >> { %11471 = vmatmul.mubr.msk.f32.gmra.mrb[106].mxu1 %vm1835_vm4, %v14045_v17  ;;  %11757 = vmatprep.mubr.msk.f32.mxu0 %vm13431_vm5, %v13432_v56  ;;  %v5311_v17 = vld [vmem:[#allocation3 + $0x63] sm:$0xff] }
 0x215   : >> { %11473 = vmatprep.mubr.msk.f32.mxu1 %vm1835_vm4, %v5134_v28  ;;  %v14425_v28 = vld [vmem:[#allocation3 + $0x66] sm:$0xff] }
 0x217   : >> { %11758 = vmatmul.mubr.msk.f32.gmra.mrb[18].mxu0 %vm1835_vm4, %v14364_v52 }
 0x218   : >> { %11474 = vmatmul.mubr.msk.f32.gmra.mrb[108].mxu1 %vm1835_vm4, %v3109_v4  ;;  %11760 = vmatprep.mubr.msk.f32.mxu0 %vm13431_vm5, %v13432_v56  ;;  %v1785_v4 = vld [vmem:[#allocation2 + $0x2e1] ss:$2 sm:$0x1f] }
 0x219   : >> { %11480 = vmatprep.mubr.msk.f32.mxu1 %vm1835_vm4, %v3286_v23  ;;  %v1787_v15 = vmax.f32 %v1781_v57, %v1785_v4  ;;  %v14436_v23 = vld [vmem:[#allocation3 + $0x76] sm:$0xff] }
 0x21a   : >> { %v5318_v4 = vld [vmem:[#allocation3 + $0x9b] sm:$0xff] }
 0x21b   : >> { %11761 = vmatmul.mubr.msk.f32.gmra.mrb[20].mxu0 %vm1835_vm4, %v5144_v30  ;;  %v10062_v30 = vld [vmem:[%s15706_s3 + $0xb0] sm:$0xff] }
 0x21c   : >> { %11481 = vmatmul.mubr.msk.f32.vlgmr.msra.gmra.mrb[98].mxu1 %vm1835_vm4, %v3287_v47  ;;  %11767 = vmatprep.mubr.msk.f32.mxu0 %vm13431_vm5, %v13432_v56  ;;  %v10063_v47 = vld [vmem:[%s15706_s3 + $0xb8] sm:$0xff] }
 0x21d   : >> { %11483 = vmatprep.mubr.msk.f32.mxu1 %vm1835_vm4, %v14382_v53  ;;  %12545 = vmatpush3.bf16.msra.mxu1 %v14313_v34 }
 0x21e   : >> { %12547 = vmatprep.subr.bf16.mxu1 %v14378_v33 }
 0x21f   : >> { %11768 = vmatmul.mubr.msk.f32.vlgmr.msra.gmra.mrb[0].mxu0 %vm1835_vm4, %v5311_v17  ;;  %v5316_v17 = vld [vmem:[#allocation3 + $0x8b] sm:$0xff] }
 0x220   : >> { %11484 = vmatmul.mubr.msk.f32.gmra.mrb[100].mxu1 %vm1835_vm4, %v14390_v39  ;;  %12584 = vmatpush3.bf16.msra.mxu0 %v13990_v45  ;;  %v5313_v45 = vld [vmem:[#allocation3 + $0x73] sm:$0xff] }
 0x221   : >> { %11486 = vmatprep.mubr.msk.f32.mxu1 %vm1835_vm4, %v14396_v41  ;;  %11770 = vmatprep.mubr.msk.f32.mxu0 %vm13431_vm5, %v13432_v56 }
 0x222   : >> { %12585 = vmatprep.subr.bf16.mxu0 %v13430_v55 }
 0x223   : >> { %11771 = vmatmul.mubr.msk.f32.gmra.mrb[2].mxu0 %vm1835_vm4, %v5312_v48  ;;  %v14451_v48 = vpack.c.bf16 %v10063_v47, %v10062_v30  ;;  %v14513_v47 = vld [vmem:[#allocation3 + $0x30] sm:$0xff] }
 0x224   : >> { %11487 = vmatmul.mubr.msk.f32.gmra.mrb[102].mxu1 %vm1835_vm4, %v14403_v58  ;;  %11773 = vmatprep.mubr.msk.f32.mxu0 %vm13431_vm5, %v13432_v56 }
 0x225   : >> { %11489 = vmatprep.mubr.msk.f32.mxu1 %vm1835_vm4, %v14408_v60 }
 0x227   : >> { %11774 = vmatmul.mubr.msk.f32.gmra.mrb[4].mxu0 %vm1835_vm4, %v5313_v45  ;;  %v1791_v45 = vld [vmem:[#allocation2 + $0x2fe] ss:$2 sm:$0x1f] }
 0x228   : >> { %11490 = vmatmul.mubr.msk.f32.gmra.mrb[104].mxu1 %vm1835_vm4, %v14414_v50  ;;  %11776 = vmatprep.mubr.msk.f32.mxu0 %vm13431_vm5, %v13432_v56 }
 0x229   : >> { %11492 = vmatprep.mubr.msk.f32.mxu1 %vm1835_vm4, %v14419_v5 }
 0x22b   : >> { %11777 = vmatmul.mubr.msk.f32.gmra.mrb[6].mxu0 %vm1835_vm4, %v5314_v31  ;;  %v1793_v31 = vmax.f32 %v1787_v15, %v1791_v45  ;;  %v3663_v15 = vld [vmem:[#allocation3 + $0x28] sm:$0xff]  ;;  %v14534_v45 = vld [vmem:[#allocation3 + $0x7f] sm:$0xff] }
 0x22c   : >> { %11493 = vmatmul.mubr.msk.f32.gmra.mrb[106].mxu1 %vm1835_vm4, %v14425_v28  ;;  %11779 = vmatprep.mubr.msk.f32.mxu0 %vm13431_vm5, %v13432_v56 }
 0x22d   : >> { %11495 = vmatprep.mubr.msk.f32.mxu1 %vm1835_vm4, %v14428_v44 }
 0x22f   : >> { %11780 = vmatmul.mubr.msk.f32.gmra.mrb[8].mxu0 %vm1835_vm4, %v5315_v8  ;;  %v10077_v8 = vld [vmem:[%s15706_s3 + $0xc8] sm:$0xff] }
 0x230   : >> { %11496 = vmatmul.mubr.msk.f32.gmra.mrb[108].mxu1 %vm1835_vm4, %v14436_v23  ;;  %11782 = vmatprep.mubr.msk.f32.mxu0 %vm13431_vm5, %v13432_v56 }
 0x231   : >> { %11502 = vmatprep.mubr.msk.f32.mxu1 %vm1835_vm4, %v14093_v51  ;;  %v1799_v51 = vmax.f32 %v1793_v31, %v1797_v9  ;;  %v14536_v9 = vld [vmem:[#allocation3 + $0x48] sm:$0xff]  ;;  %v14542_v31 = vld [vmem:[#allocation3 + $0x50] sm:$0xff] }
 0x233   : >> { %11783 = vmatmul.mubr.msk.f32.gmra.mrb[10].mxu0 %vm1835_vm4, %v5316_v17  ;;  %v1801_v57 = vadd.f32 %v13539_v0, %v1799_v51  ;;  %v14521_v17 = vld [vmem:[#allocation3 + $0x38] sm:$0xff]  ;;  %v14548_v51 = vld [vmem:[#allocation3 + $0x87] sm:$0xff] }
 0x234   : >> { %11503 = vmatmul.mubr.msk.f32.vlgmr.msra.gmra.mrb[98].mxu1 %vm1835_vm4, %v14103_v22  ;;  %11785 = vmatprep.mubr.msk.f32.mxu0 %vm13431_vm5, %v13432_v56  ;;  %v8936_v0 = vld [vmem:[%s15710_s7 + $0x8] sm:$0xff] (%p376_p11) }
 0x235   : >> { %11505 = vmatprep.mubr.msk.f32.mxu1 %vm1835_vm4, %v14108_v54  ;;  %12549 = vmatpush3.bf16.msra.mxu1 %v14378_v33  ;;  %v1803_v22 = vmax.f32 %v1801_v57, 0.0  ;;  %v14560_v57 = vld [vmem:[#allocation3 + $0x8f] sm:$0xff] }
 0x236   : >> { %12551 = vmatprep.subr.bf16.mxu1 %v14451_v48 }
 0x237   : >> { %11786 = vmatmul.mubr.msk.f32.gmra.mrb[12].mxu0 %vm1835_vm4, %v5317_v10  ;;  %1805 = vst [vmem:[#allocation3 + $0xcc] sm:$0x1f] %v1803_v22  ;;  %v14550_v10 = vld [vmem:[#allocation3 + $0x58] sm:$0xff] }
 0x238   : >> { %11506 = vmatmul.mubr.msk.f32.gmra.mrb[100].mxu1 %vm1835_vm4, %v14114_v63  ;;  %11788 = vmatprep.mubr.msk.f32.mxu0 %vm13431_vm5, %v13432_v56  ;;  %v5319_v63 = vld [vmem:[#allocation3 + $0xa3] sm:$0xff]  ;;  %v14570_v22 = vld [vmem:[#allocation3 + $0x97] sm:$0xff] }
 0x239   : >> { %11508 = vmatprep.mubr.msk.f32.mxu1 %vm1835_vm4, %v14119_v12  ;;  %v5320_v12 = vld [vmem:[#allocation3 + $0xab] sm:$0xff] }
 0x23b   : >> { %11789 = vmatmul.mubr.msk.f32.gmra.mrb[14].mxu0 %vm1835_vm4, %v5318_v4  ;;  %v10091_v4 = vld [vmem:[%s15706_s3 + $0xd8] sm:$0xff] }
 0x23c   : >> { %11509 = vmatmul.mubr.msk.f32.gmra.mrb[102].mxu1 %vm1835_vm4, %v14127_v26  ;;  %11791 = vmatprep.mubr.msk.f32.mxu0 %vm13431_vm5, %v13432_v56  ;;  %v14487_v26 = vld [vmem:[#allocation3 + $0x6f] sm:$0xff] }
 0x23d   : >> { %11511 = vmatprep.mubr.msk.f32.mxu1 %vm1835_vm4, %v14134_v27  ;;  %v5321_v27 = vld [vmem:[#allocation3 + $0xb3] sm:$0xf] }
 0x23f   : >> { %11792 = vmatmul.mubr.msk.f32.gmra.mrb[16].mxu0 %vm1835_vm4, %v5319_v63 }
 0x240   : >> { %11512 = vmatmul.mubr.msk.f32.gmra.mrb[104].mxu1 %vm1835_vm4, %v14143_v32  ;;  %11794 = vmatprep.mubr.msk.f32.mxu0 %vm13431_vm5, %v13432_v56  ;;  %v14493_v32 = vld [vmem:[#allocation3 + $0x77] sm:$0xff] }
 0x241   : >> { %11514 = vmatprep.mubr.msk.f32.mxu1 %vm1835_vm4, %v14150_v37  ;;  %v3662_v37 = vld [vmem:[#allocation3 + $0x20] sm:$0xff] }
 0x243   : >> { %11795 = vmatmul.mubr.msk.f32.gmra.mrb[18].mxu0 %vm1835_vm4, %v5320_v12  ;;  %v14599_v12 = vld [vmem:[#allocation3 + $0xa7] sm:$0xff] }
 0x244   : >> { %11515 = vmatmul.mubr.msk.f32.gmra.mrb[106].mxu1 %vm1835_vm4, %v14158_v46  ;;  %11797 = vmatprep.mubr.msk.f32.mxu0 %vm13431_vm5, %v13432_v56  ;;  %v10076_v46 = vld [vmem:[%s15706_s3 + $0xc0] sm:$0xff] }
 0x245   : >> { %11517 = vmatprep.mubr.msk.f32.mxu1 %vm1835_vm4, %v14487_v26  ;;  %v14509_v30 = vpack.c.bf16 %v10077_v8, %v10076_v46  ;;  %v14616_v46 = vld [vmem:[#allocation3 + $0xb7] sm:$0xff] }
 0x246   : >> { %v3857_v8 = vld [vmem:[#allocation3 + $0x59] sm:$0xff] }
 0x247   : >> { %11798 = vmatmul.mubr.msk.f32.gmra.mrb[20].mxu0 %vm1835_vm4, %v5321_v27  ;;  %v3854_v27 = vld [vmem:[#allocation3 + $0x41] sm:$0xff] }
 0x248   : >> { %11518 = vmatmul.mubr.msk.f32.gmra.mrb[108].mxu1 %vm1835_vm4, %v14493_v32  ;;  %11804 = vmatprep.mubr.msk.f32.mxu0 %vm13431_vm5, %v13432_v56 }
 0x249   : >> { %11524 = vmatprep.mubr.msk.f32.mxu1 %vm1835_vm4, %v3662_v37  ;;  %v3856_v37 = vld [vmem:[#allocation3 + $0x51] sm:$0xff] }
 0x24b   : >> { %11805 = vmatmul.mubr.msk.f32.vlgmr.msra.gmra.mrb[0].mxu0 %vm1835_vm4, %v14487_v26 }
 0x24c   : >> { %11525 = vmatmul.mubr.msk.f32.vlgmr.msra.gmra.mrb[98].mxu1 %vm1835_vm4, %v3663_v15  ;;  %12587 = vmatpush3.bf16.msra.mxu0 %v14056_v40  ;;  %v14528_v40 = vld [vmem:[#allocation3 + $0x40] sm:$0xff] }
 0x24d   : >> { %11527 = vmatprep.mubr.msk.f32.mxu1 %vm1835_vm4, %v14513_v47  ;;  %11807 = vmatprep.mubr.msk.f32.mxu0 %vm13431_vm5, %v13432_v56  ;;  %v3858_v15 = vld [vmem:[#allocation3 + $0x61] sm:$0xff] }
 0x24e   : >> { %12553 = vmatpush3.bf16.msra.mxu1 %v14451_v48  ;;  %12588 = vmatprep.subr.bf16.mxu0 %v13430_v55 }
 0x24f   : >> { %11808 = vmatmul.mubr.msk.f32.gmra.mrb[2].mxu0 %vm1835_vm4, %v14493_v32  ;;  %12555 = vmatprep.subr.bf16.mxu1 %v14509_v30 }
 0x250   : >> { %11528 = vmatmul.mubr.msk.f32.gmra.mrb[100].mxu1 %vm1835_vm4, %v14521_v17  ;;  %11810 = vmatprep.mubr.msk.f32.mxu0 %vm13431_vm5, %v13432_v56 }
 0x251   : >> { %11530 = vmatprep.mubr.msk.f32.mxu1 %vm1835_vm4, %v14528_v40 }
 0x253   : >> { %11811 = vmatmul.mubr.msk.f32.gmra.mrb[4].mxu0 %vm1835_vm4, %v14534_v45 }
 0x254   : >> { %11531 = vmatmul.mubr.msk.f32.gmra.mrb[102].mxu1 %vm1835_vm4, %v14536_v9  ;;  %11813 = vmatprep.mubr.msk.f32.mxu0 %vm13431_vm5, %v13432_v56 }
 0x255   : >> { %11533 = vmatprep.mubr.msk.f32.mxu1 %vm1835_vm4, %v14542_v31 }
 0x257   : >> { %11814 = vmatmul.mubr.msk.f32.gmra.mrb[6].mxu0 %vm1835_vm4, %v14548_v51 }
 0x258   : >> { %11534 = vmatmul.mubr.msk.f32.gmra.mrb[104].mxu1 %vm1835_vm4, %v14550_v10  ;;  %11816 = vmatprep.mubr.msk.f32.mxu0 %vm13431_vm5, %v13432_v56 }
 0x259   : >> { %11536 = vmatprep.mubr.msk.f32.mxu1 %vm1835_vm4, %v14125_v13  ;;  %v10090_v13 = vld [vmem:[%s15706_s3 + $0xd0] sm:$0xff] }
 0x25a   : >> { %v14588_v63 = vpack.c.bf16 %v10091_v4, %v10090_v13  ;;  %v5498_v13 = vld [vmem:[#allocation3 + $0xbf] sm:$0xf]  ;;  %v3859_v4 = vld [vmem:[#allocation3 + $0x69] sm:$0xff] }
 0x25b   : >> { %11817 = vmatmul.mubr.msk.f32.gmra.mrb[8].mxu0 %vm1835_vm4, %v14560_v57 }
 0x25c   : >> { %11537 = vmatmul.mubr.msk.f32.gmra.mrb[106].mxu1 %vm1835_vm4, %v14140_v29  ;;  %11819 = vmatprep.mubr.msk.f32.mxu0 %vm13431_vm5, %v13432_v56  ;;  %v14586_v29 = vld [vmem:[#allocation3 + $0x9f] sm:$0xff] }
 0x25d   : >> { %11539 = vmatprep.mubr.msk.f32.mxu1 %vm1835_vm4, %v14156_v42 }
 0x25f   : >> { %11820 = vmatmul.mubr.msk.f32.gmra.mrb[10].mxu0 %vm1835_vm4, %v14570_v22 }
 0x260   : >> { %11540 = vmatmul.mubr.msk.f32.gmra.mrb[108].mxu1 %vm1835_vm4, %v14173_v61  ;;  %11822 = vmatprep.mubr.msk.f32.mxu0 %vm13431_vm5, %v13432_v56 }
 0x261   : >> { %11546 = vmatprep.mubr.msk.f32.mxu1 %vm1835_vm4, %v14248_v62  ;;  %v3853_v62 = vld [vmem:[#allocation3 + $0x39] sm:$0xff] }
 0x263   : >> { %11823 = vmatmul.mubr.msk.f32.gmra.mrb[12].mxu0 %vm1835_vm4, %v14586_v29 }
 0x264   : >> { %11547 = vmatmul.mubr.msk.f32.vlgmr.msra.gmra.mrb[98].mxu1 %vm1835_vm4, %v14256_v25  ;;  %11825 = vmatprep.mubr.msk.f32.mxu0 %vm13431_vm5, %v13432_v56  ;;  %v14608_v25 = vld [vmem:[#allocation3 + $0xaf] sm:$0xff] }
 0x265   : >> { %11549 = vmatprep.mubr.msk.f32.mxu1 %vm1835_vm4, %v14261_v59  ;;  %12557 = vmatpush3.bf16.msra.mxu1 %v14509_v30  ;;  %v3855_v59 = vld [vmem:[#allocation3 + $0x49] sm:$0xff] }
 0x266   : >> { %12559 = vmatprep.subr.bf16.mxu1 %v14588_v63 }
 0x267   : >> { %11826 = vmatmul.mubr.msk.f32.gmra.mrb[14].mxu0 %vm1835_vm4, %v14599_v12 }
 0x268   : >> { %11550 = vmatmul.mubr.msk.f32.gmra.mrb[100].mxu1 %vm1835_vm4, %v3853_v62  ;;  %11828 = vmatprep.mubr.msk.f32.mxu0 %vm13431_vm5, %v13432_v56  ;;  %v14626_v62 = vld [vmem:[#allocation3 + $0x71] sm:$0xff] }
 0x269   : >> { %11552 = vmatprep.mubr.msk.f32.mxu1 %vm1835_vm4, %v3854_v27  ;;  %v14632_v27 = vld [vmem:[#allocation3 + $0x79] sm:$0xff] }
 0x26b   : >> { %11829 = vmatmul.mubr.msk.f32.gmra.mrb[16].mxu0 %vm1835_vm4, %v14608_v25 }
 0x26c   : >> { %11553 = vmatmul.mubr.msk.f32.gmra.mrb[102].mxu1 %vm1835_vm4, %v3855_v59  ;;  %11831 = vmatprep.mubr.msk.f32.mxu0 %vm13431_vm5, %v13432_v56  ;;  %v10104_v59 = vld [vmem:[%s15706_s3 + $0xe0] sm:$0xff] }
 0x26d   : >> { %11555 = vmatprep.mubr.msk.f32.mxu1 %vm1835_vm4, %v3856_v37  ;;  %v10105_v37 = vld [vmem:[%s15706_s3 + $0xe8] sm:$0xff] }
 0x26f   : >> { %11832 = vmatmul.mubr.msk.f32.gmra.mrb[18].mxu0 %vm1835_vm4, %v14616_v46 }
 0x270   : >> { %11556 = vmatmul.mubr.msk.f32.gmra.mrb[104].mxu1 %vm1835_vm4, %v3857_v8  ;;  %11834 = vmatprep.mubr.msk.f32.mxu0 %vm13431_vm5, %v13432_v56  ;;  %v4038_v8 = vld [vmem:[#allocation3 + $0x2d] sm:$0xff] }
 0x271   : >> { %11558 = vmatprep.mubr.msk.f32.mxu1 %vm1835_vm4, %v3858_v15  ;;  %v4039_v15 = vld [vmem:[#allocation3 + $0x35] sm:$0xff] }
 0x273   : >> { %11835 = vmatmul.mubr.msk.f32.gmra.mrb[20].mxu0 %vm1835_vm4, %v5498_v13  ;;  %v4040_v13 = vld [vmem:[#allocation3 + $0x3d] sm:$0xff] }
 0x274   : >> { %11559 = vmatmul.mubr.msk.f32.gmra.mrb[106].mxu1 %vm1835_vm4, %v3859_v4  ;;  %11841 = vmatprep.mubr.msk.f32.mxu0 %vm13431_vm5, %v13432_v56  ;;  %v4042_v4 = vld [vmem:[#allocation3 + $0x4d] sm:$0xff] }
 0x275   : >> { %11561 = vmatprep.mubr.msk.f32.mxu1 %vm1835_vm4, %v14626_v62 }
 0x277   : >> { %11842 = vmatmul.mubr.msk.f32.vlgmr.msra.gmra.mrb[0].mxu0 %vm1835_vm4, %v14156_v42  ;;  %v14649_v42 = vpack.c.bf16 %v10105_v37, %v10104_v59  ;;  %v4043_v59 = vld [vmem:[#allocation3 + $0x55] sm:$0xff]  ;;  %v4044_v37 = vld [vmem:[#allocation3 + $0x5d] sm:$0xff] }
 0x278   : >> { %11562 = vmatmul.mubr.msk.f32.gmra.mrb[108].mxu1 %vm1835_vm4, %v14632_v27  ;;  %12590 = vmatpush3.bf16.msra.mxu0 %v14089_v11  ;;  %v4041_v11 = vld [vmem:[#allocation3 + $0x45] sm:$0xff] }
 0x279   : >> { %11568 = vmatprep.mubr.msk.f32.mxu1 %vm1835_vm4, %v4038_v8  ;;  %11844 = vmatprep.mubr.msk.f32.mxu0 %vm13431_vm5, %v13432_v56  ;;  %v4046_v8 = vld [vmem:[#allocation3 + $0x6d] sm:$0xff] }
 0x27a   : >> { %12591 = vmatprep.subr.bf16.mxu0 %v13430_v55 }
 0x27b   : >> { %11845 = vmatmul.mubr.msk.f32.gmra.mrb[2].mxu0 %vm1835_vm4, %v14173_v61  ;;  %v14665_v61 = vld [vmem:[#allocation3 + $0x88] sm:$0xff] }
 0x27c   : >> { %11569 = vmatmul.mubr.msk.f32.vlgmr.msra.gmra.mrb[98].mxu1 %vm1835_vm4, %v4039_v15  ;;  %11847 = vmatprep.mubr.msk.f32.mxu0 %vm13431_vm5, %v13432_v56  ;;  %v4047_v15 = vld [vmem:[#allocation3 + $0x75] sm:$0xff] }
 0x27d   : >> { %11571 = vmatprep.mubr.msk.f32.mxu1 %vm1835_vm4, %v4040_v13  ;;  %12561 = vmatpush3.bf16.msra.mxu1 %v14588_v63  ;;  %v4048_v13 = vld [vmem:[#allocation3 + $0x7d] sm:$0xff] }
 0x27e   : >> { %12563 = vmatprep.subr.bf16.mxu1 %v14649_v42 }
 0x27f   : >> { %11848 = vmatmul.mubr.msk.f32.gmra.mrb[4].mxu0 %vm1835_vm4, %v14186_v14  ;;  %v4045_v14 = vld [vmem:[#allocation3 + $0x65] sm:$0xff] }
 0x280   : >> { %11572 = vmatmul.mubr.msk.f32.gmra.mrb[100].mxu1 %vm1835_vm4, %v4041_v11  ;;  %11850 = vmatprep.mubr.msk.f32.mxu0 %vm13431_vm5, %v13432_v56  ;;  %v10118_v11 = vld [vmem:[%s15706_s3 + $0xf0] sm:$0xff] }
 0x281   : >> { %11574 = vmatprep.mubr.msk.f32.mxu1 %vm1835_vm4, %v4042_v4 }
 0x283   : >> { %11851 = vmatmul.mubr.msk.f32.gmra.mrb[6].mxu0 %vm1835_vm4, %v14665_v61 }
 0x284   : >> { %11575 = vmatmul.mubr.msk.f32.gmra.mrb[102].mxu1 %vm1835_vm4, %v4043_v59  ;;  %11853 = vmatprep.mubr.msk.f32.mxu0 %vm13431_vm5, %v13432_v56  ;;  %v14793_v59 = vld [vmem:[#allocation3 + $0xa1] sm:$0xff] }
 0x285   : >> { %11577 = vmatprep.mubr.msk.f32.mxu1 %vm1835_vm4, %v4044_v37  ;;  %v14803_v37 = vld [vmem:[#allocation3 + $0xa9] sm:$0xff] }
 0x287   : >> { %11854 = vmatmul.mubr.msk.f32.gmra.mrb[8].mxu0 %vm1835_vm4, %v14206_v43  ;;  %v4049_v43 = vld [vmem:[#allocation3 + $0x85] sm:$0xff] }
 0x288   : >> { %11578 = vmatmul.mubr.msk.f32.gmra.mrb[104].mxu1 %vm1835_vm4, %v4045_v14  ;;  %11856 = vmatprep.mubr.msk.f32.mxu0 %vm13431_vm5, %v13432_v56  ;;  %v14943_v14 = vld [vmem:[#allocation3 + $0xc6] sm:$0xff] }
 0x289   : >> { %11580 = vmatprep.mubr.msk.f32.mxu1 %vm1835_vm4, %v4046_v8  ;;  %v6206_v8 = vld [vmem:[#allocation3 + $0xce] sm:$0xf] }
 0x28b   : >> { %11857 = vmatmul.mubr.msk.f32.gmra.mrb[10].mxu0 %vm1835_vm4, %v14216_v19  ;;  %v10119_v19 = vld [vmem:[%s15706_s3 + $0xf8] sm:$0xff] }
 0x28c   : >> { %11581 = vmatmul.mubr.msk.f32.gmra.mrb[106].mxu1 %vm1835_vm4, %v4047_v15  ;;  %11859 = vmatprep.mubr.msk.f32.mxu0 %vm13431_vm5, %v13432_v56  ;;  %v14698_v4 = vpack.c.bf16 %v10119_v19, %v10118_v11  ;;  %v10342_v15 = vld [vmem:[%s15708_s5 + $0x38] sm:$0xff]  ;;  %v15056_v11 = vld [vmem:[#allocation3 + $0xc0] sm:$0xff] }
 0x28d   : >> { %11583 = vmatprep.mubr.msk.f32.mxu1 %vm1835_vm4, %v4048_v13  ;;  %v15062_v19 = vld [vmem:[#allocation3 + $0xc8] sm:$0xff] }
 0x28f   : >> { %11860 = vmatmul.mubr.msk.f32.gmra.mrb[12].mxu0 %vm1835_vm4, %v14226_v49  ;;  %v14709_v49 = vld [vmem:[#allocation3 + $0xb0] sm:$0xff] }
 0x290   : >> { %11584 = vmatmul.mubr.msk.f32.gmra.mrb[108].mxu1 %vm1835_vm4, %v4049_v43  ;;  %11862 = vmatprep.mubr.msk.f32.mxu0 %vm13431_vm5, %v13432_v56  ;;  %v15042_v43 = vld [vmem:[#allocation3 + $0xa8] sm:$0xff] }
 0x291   : >> { %11590 = vmatprep.mubr.msk.f32.mxu1 %vm1835_vm4, %v14382_v53  ;;  %v5675_v53 = vld [vmem:[#allocation3 + $0xc0] sm:$0xf] }
 0x293   : >> { %11863 = vmatmul.mubr.msk.f32.gmra.mrb[14].mxu0 %vm1835_vm4, %v14241_v16  ;;  %v14720_v16 = vld [vmem:[#allocation3 + $0xb8] sm:$0xff] }
 0x294   : >> { %11591 = vmatmul.mubr.msk.f32.vlgmr.msra.gmra.mrb[98].mxu1 %vm1835_vm4, %v14390_v39  ;;  %11865 = vmatprep.mubr.msk.f32.mxu0 %vm13431_vm5, %v13432_v56  ;;  %v14742_v39 = vld [vmem:[#allocation3 + $0x7e] sm:$0xff] }
 0x295   : >> { %11593 = vmatprep.mubr.msk.f32.mxu1 %vm1835_vm4, %v14396_v41  ;;  %12565 = vmatpush3.bf16.msra.mxu1 %v14649_v42  ;;  %v14749_v41 = vld [vmem:[#allocation3 + $0x86] sm:$0xff] }
 0x296   : >> { %12567 = vmatprep.subr.bf16.mxu1 %v14698_v4 }
 0x297   : >> { %11866 = vmatmul.mubr.msk.f32.gmra.mrb[16].mxu0 %vm1835_vm4, %v14709_v49 }
 0x298   : >> { %11594 = vmatmul.mubr.msk.f32.gmra.mrb[100].mxu1 %vm1835_vm4, %v14403_v58  ;;  %11868 = vmatprep.mubr.msk.f32.mxu0 %vm13431_vm5, %v13432_v56  ;;  %v4415_v58 = vld [vmem:[#allocation3 + $0x37] sm:$0xff] }
 0x299   : >> { %11596 = vmatprep.mubr.msk.f32.mxu1 %vm1835_vm4, %v14408_v60  ;;  %v4416_v60 = vld [vmem:[#allocation3 + $0x3f] sm:$0xff] }
 0x29b   : >> { %11869 = vmatmul.mubr.msk.f32.gmra.mrb[18].mxu0 %vm1835_vm4, %v14720_v16 }
 0x29c   : >> { %11597 = vmatmul.mubr.msk.f32.gmra.mrb[102].mxu1 %vm1835_vm4, %v14414_v50  ;;  %11871 = vmatprep.mubr.msk.f32.mxu0 %vm13431_vm5, %v13432_v56  ;;  %v14768_v50 = vld [vmem:[#allocation3 + $0x89] sm:$0xff] }
 0x29d   : >> { %11599 = vmatprep.mubr.msk.f32.mxu1 %vm1835_vm4, %v14419_v5  ;;  %v4417_v5 = vld [vmem:[#allocation3 + $0x47] sm:$0xff] }
 0x29f   : >> { %11872 = vmatmul.mubr.msk.f32.gmra.mrb[20].mxu0 %vm1835_vm4, %v5675_v53 }
 0x2a0   : >> { %11600 = vmatmul.mubr.msk.f32.gmra.mrb[104].mxu1 %vm1835_vm4, %v14425_v28  ;;  %11878 = vmatprep.mubr.msk.f32.mxu0 %vm13431_vm5, %v13432_v56  ;;  %v14776_v28 = vld [vmem:[#allocation3 + $0x91] sm:$0xff] }
 0x2a1   : >> { %11602 = vmatprep.mubr.msk.f32.mxu1 %vm1835_vm4, %v14428_v44  ;;  %v4419_v44 = vld [vmem:[#allocation3 + $0x57] sm:$0xff] }
 0x2a3   : >> { %11879 = vmatmul.mubr.msk.f32.vlgmr.msra.gmra.mrb[0].mxu0 %vm1835_vm4, %v14626_v62  ;;  %v14784_v62 = vld [vmem:[#allocation3 + $0x99] sm:$0xff] }
 0x2a4   : >> { %11603 = vmatmul.mubr.msk.f32.gmra.mrb[106].mxu1 %vm1835_vm4, %v14436_v23  ;;  %12593 = vmatpush3.bf16.msra.mxu0 %v14175_v7  ;;  %v14759_v7 = vld [vmem:[#allocation3 + $0x81] sm:$0xff] }
 0x2a5   : >> { %11605 = vmatprep.mubr.msk.f32.mxu1 %vm1835_vm4, %v14742_v39  ;;  %11881 = vmatprep.mubr.msk.f32.mxu0 %vm13431_vm5, %v13432_v56  ;;  %v4420_v23 = vld [vmem:[#allocation3 + $0x5f] sm:$0xff] }
 0x2a6   : >> { %12594 = vmatprep.subr.bf16.mxu0 %v13430_v55 }
 0x2a7   : >> { %11882 = vmatmul.mubr.msk.f32.gmra.mrb[2].mxu0 %vm1835_vm4, %v14632_v27  ;;  %v4421_v27 = vld [vmem:[#allocation3 + $0x67] sm:$0xff] }
 0x2a8   : >> { %11606 = vmatmul.mubr.msk.f32.gmra.mrb[108].mxu1 %vm1835_vm4, %v14749_v41  ;;  %11884 = vmatprep.mubr.msk.f32.mxu0 %vm13431_vm5, %v13432_v56 }
 0x2a9   : >> { %11612 = vmatprep.mubr.msk.f32.mxu1 %vm1835_vm4, %v14108_v54  ;;  %v4418_v54 = vld [vmem:[#allocation3 + $0x4f] sm:$0xff] }
 0x2ab   : >> { %11885 = vmatmul.mubr.msk.f32.gmra.mrb[4].mxu0 %vm1835_vm4, %v14759_v7 }
 0x2ac   : >> { %11613 = vmatmul.mubr.msk.f32.vlgmr.msra.gmra.mrb[98].mxu1 %vm1835_vm4, %v4415_v58  ;;  %11887 = vmatprep.mubr.msk.f32.mxu0 %vm13431_vm5, %v13432_v56 }
 0x2ad   : >> { %11615 = vmatprep.mubr.msk.f32.mxu1 %vm1835_vm4, %v4416_v60  ;;  %12569 = vmatpush3.bf16.msra.mxu1 %v14698_v4 }
 0x2af   : >> { %11888 = vmatmul.mubr.msk.f32.gmra.mrb[6].mxu0 %vm1835_vm4, %v14768_v50 }
 0x2b0   : >> { %11616 = vmatmul.mubr.msk.f32.gmra.mrb[100].mxu1 %vm1835_vm4, %v4417_v5  ;;  %11890 = vmatprep.mubr.msk.f32.mxu0 %vm13431_vm5, %v13432_v56  ;;  %v6736_v5 = vld [vmem:[#allocation3 + $0xc9] sm:$0xff] }
 0x2b1   : >> { %11618 = vmatprep.mubr.msk.f32.mxu1 %vm1835_vm4, %v4418_v54 }
 0x2b3   : >> { %11891 = vmatmul.mubr.msk.f32.gmra.mrb[8].mxu0 %vm1835_vm4, %v14776_v28 }
 0x2b4   : >> { %11619 = vmatmul.mubr.msk.f32.gmra.mrb[102].mxu1 %vm1835_vm4, %v4419_v44  ;;  %11893 = vmatprep.mubr.msk.f32.mxu0 %vm13431_vm5, %v13432_v56 }
 0x2b5   : >> { %11621 = vmatprep.mubr.msk.f32.mxu1 %vm1835_vm4, %v4420_v23  ;;  %v6737_v23 = vld [vmem:[#allocation3 + $0xd1] sm:$0xf] }
 0x2b7   : >> { %11894 = vmatmul.mubr.msk.f32.gmra.mrb[10].mxu0 %vm1835_vm4, %v14784_v62 }
 0x2b8   : >> { %11622 = vmatmul.mubr.msk.f32.gmra.mrb[104].mxu1 %vm1835_vm4, %v4421_v27  ;;  %11896 = vmatprep.mubr.msk.f32.mxu0 %vm13431_vm5, %v13432_v56 }
 0x2b9   : >> { %11624 = vmatprep.mubr.msk.f32.mxu1 %vm1835_vm4, %v14487_v26  ;;  %v14813_v26 = vld [vmem:[#allocation3 + $0xb1] sm:$0xff] }
 0x2bb   : >> { %11897 = vmatmul.mubr.msk.f32.gmra.mrb[12].mxu0 %vm1835_vm4, %v14793_v59 }
 0x2bc   : >> { %11625 = vmatmul.mubr.msk.f32.gmra.mrb[106].mxu1 %vm1835_vm4, %v14493_v32  ;;  %11899 = vmatprep.mubr.msk.f32.mxu0 %vm13431_vm5, %v13432_v56  ;;  %v14823_v32 = vld [vmem:[#allocation3 + $0xb9] sm:$0xff] }
 0x2bd   : >> { %11627 = vmatprep.mubr.msk.f32.mxu1 %vm1835_vm4, %v14534_v45 }
 0x2bf   : >> { %11900 = vmatmul.mubr.msk.f32.gmra.mrb[14].mxu0 %vm1835_vm4, %v14803_v37 }
 0x2c0   : >> { %11628 = vmatmul.mubr.msk.f32.gmra.mrb[108].mxu1 %vm1835_vm4, %v14548_v51  ;;  %11902 = vmatprep.mubr.msk.f32.mxu0 %vm13431_vm5, %v13432_v56 }
 0x2c1   : >> { %11634 = vmatprep.mubr.msk.f32.mxu1 %vm1835_vm4, %v14513_v47  ;;  %v5852_v47 = vld [vmem:[#allocation3 + $0xc1] sm:$0xf] }
 0x2c3   : >> { %11903 = vmatmul.mubr.msk.f32.gmra.mrb[16].mxu0 %vm1835_vm4, %v14813_v26 }
 0x2c4   : >> { %11635 = vmatmul.mubr.msk.f32.vlgmr.msra.gmra.mrb[98].mxu1 %vm1835_vm4, %v14521_v17  ;;  %11905 = vmatprep.mubr.msk.f32.mxu0 %vm13431_vm5, %v13432_v56  ;;  %v4608_v17 = vld [vmem:[#allocation3 + $0x60] sm:$0xff] }
 0x2c5   : >> { %11637 = vmatprep.mubr.msk.f32.mxu1 %vm1835_vm4, %v14528_v40  ;;  %v4609_v40 = vld [vmem:[#allocation3 + $0x68] sm:$0xff] }
 0x2c7   : >> { %11906 = vmatmul.mubr.msk.f32.gmra.mrb[18].mxu0 %vm1835_vm4, %v14823_v32 }
 0x2c8   : >> { %11638 = vmatmul.mubr.msk.f32.gmra.mrb[100].mxu1 %vm1835_vm4, %v14536_v9  ;;  %11908 = vmatprep.mubr.msk.f32.mxu0 %vm13431_vm5, %v13432_v56  ;;  %v4610_v9 = vld [vmem:[#allocation3 + $0x70] sm:$0xff] }
 0x2c9   : >> { %11640 = vmatprep.mubr.msk.f32.mxu1 %vm1835_vm4, %v14542_v31  ;;  %v4611_v31 = vld [vmem:[#allocation3 + $0x78] sm:$0xff] }
 0x2cb   : >> { %11909 = vmatmul.mubr.msk.f32.gmra.mrb[20].mxu0 %vm1835_vm4, %v5852_v47 }
 0x2cc   : >> { %11641 = vmatmul.mubr.msk.f32.gmra.mrb[102].mxu1 %vm1835_vm4, %v14550_v10  ;;  %11915 = vmatprep.mubr.msk.f32.mxu0 %vm13431_vm5, %v13432_v56  ;;  %v14850_v10 = vld [vmem:[#allocation3 + $0x80] sm:$0xff] }
 0x2cd   : >> { %11643 = vmatprep.mubr.msk.f32.mxu1 %vm1835_vm4, %v4608_v17 }
 0x2cf   : >> { %11916 = vmatmul.mubr.msk.f32.vlgmr.msra.gmra.mrb[0].mxu0 %vm1835_vm4, %v14285_v20  ;;  %v6028_v20 = vld [vmem:[#allocation3 + $0xba] sm:$0xff] }
 0x2d0   : >> { %11644 = vmatmul.mubr.msk.f32.gmra.mrb[104].mxu1 %vm1835_vm4, %v4609_v40  ;;  %12596 = vmatpush3.bf16.msra.mxu0 %v14243_v18  ;;  %v6027_v18 = vld [vmem:[#allocation3 + $0xb2] sm:$0xff] }
 0x2d1   : >> { %11646 = vmatprep.mubr.msk.f32.mxu1 %vm1835_vm4, %v4610_v9  ;;  %11918 = vmatprep.mubr.msk.f32.mxu0 %vm13431_vm5, %v13432_v56  ;;  %v6904_v9 = vld [vmem:[#allocation3 + $0x8d] sm:$0xff] }
 0x2d2   : >> { %12597 = vmatprep.subr.bf16.mxu0 %v13430_v55 }
 0x2d3   : >> { %11919 = vmatmul.mubr.msk.f32.gmra.mrb[2].mxu0 %vm1835_vm4, %v14295_v21  ;;  %v6029_v21 = vld [vmem:[#allocation3 + $0xc2] sm:$0xf] }
 0x2d4   : >> { %11647 = vmatmul.mubr.msk.f32.gmra.mrb[106].mxu1 %vm1835_vm4, %v4611_v31  ;;  %11921 = vmatprep.mubr.msk.f32.mxu0 %vm13431_vm5, %v13432_v56 }
 0x2d5   : >> { %11649 = vmatprep.mubr.msk.f32.mxu1 %vm1835_vm4, %v14850_v10 }
 0x2d7   : >> { %11922 = vmatmul.mubr.msk.f32.gmra.mrb[4].mxu0 %vm1835_vm4, %v14311_v24  ;;  %v14901_v24 = vld [vmem:[#allocation3 + $0x8e] sm:$0xff] }
 0x2d8   : >> { %11650 = vmatmul.mubr.msk.f32.gmra.mrb[108].mxu1 %vm1835_vm4, %v14665_v61  ;;  %11924 = vmatprep.mubr.msk.f32.mxu0 %vm13431_vm5, %v13432_v56 }
 0x2db   : >> { %11925 = vmatmul.mubr.msk.f32.gmra.mrb[6].mxu0 %vm1835_vm4, %v14324_v35  ;;  %v14913_v35 = vld [vmem:[#allocation3 + $0x9e] sm:$0xff] }
 0x2dc   : >> { %11927 = vmatprep.mubr.msk.f32.mxu0 %vm13431_vm5, %v13432_v56 }
 0x2df   : >> { %11928 = vmatmul.mubr.msk.f32.gmra.mrb[8].mxu0 %vm1835_vm4, %v14335_v36  ;;  %v14919_v36 = vld [vmem:[#allocation3 + $0xa6] sm:$0xff] }
 0x2e0   : >> { %11930 = vmatprep.mubr.msk.f32.mxu0 %vm13431_vm5, %v13432_v56 }
 0x2e3   : >> { %11931 = vmatmul.mubr.msk.f32.gmra.mrb[10].mxu0 %vm1835_vm4, %v14345_v38  ;;  %v14925_v38 = vld [vmem:[#allocation3 + $0xae] sm:$0xff] }
 0x2e4   : >> { %11933 = vmatprep.mubr.msk.f32.mxu0 %vm13431_vm5, %v13432_v56 }
 0x2e7   : >> { %11934 = vmatmul.mubr.msk.f32.gmra.mrb[12].mxu0 %vm1835_vm4, %v14355_v6  ;;  %v14931_v6 = vld [vmem:[#allocation3 + $0xb6] sm:$0xff] }
 0x2e8   : >> { %11936 = vmatprep.mubr.msk.f32.mxu0 %vm13431_vm5, %v13432_v56 }
 0x2eb   : >> { %11937 = vmatmul.mubr.msk.f32.gmra.mrb[14].mxu0 %vm1835_vm4, %v14364_v52  ;;  %v14937_v52 = vld [vmem:[#allocation3 + $0xbe] sm:$0xff] }
 0x2ec   : >> { %11939 = vmatprep.mubr.msk.f32.mxu0 %vm13431_vm5, %v13432_v56 }
 0x2ef   : >> { %11940 = vmatmul.mubr.msk.f32.gmra.mrb[16].mxu0 %vm1835_vm4, %v6027_v18 }
 0x2f0   : >> { %11942 = vmatprep.mubr.msk.f32.mxu0 %vm13431_vm5, %v13432_v56 }
 0x2f3   : >> { %11943 = vmatmul.mubr.msk.f32.gmra.mrb[18].mxu0 %vm1835_vm4, %v6028_v20 }
 0x2f4   : >> { %11945 = vmatprep.mubr.msk.f32.mxu0 %vm13431_vm5, %v13432_v56 }
 0x2f7   : >> { %11946 = vmatmul.mubr.msk.f32.gmra.mrb[20].mxu0 %vm1835_vm4, %v6029_v21 }
 0x2f8   : >> { %11952 = vmatprep.mubr.msk.f32.mxu0 %vm13431_vm5, %v13432_v56 }
 0x2fb   : >> { %11953 = vmatmul.mubr.msk.f32.vlgmr.msra.gmra.mrb[0].mxu0 %vm1835_vm4, %v14742_v39 }
 0x2fc   : >> { %12599 = vmatpush3.bf16.msra.mxu0 %v14313_v34  ;;  %11955 = vmatprep.mubr.msk.f32.mxu0 %vm13431_vm5, %v13432_v56  ;;  %v14907_v34 = vld [vmem:[#allocation3 + $0x96] sm:$0xff] }
 0x2fd   : >> { %12600 = vmatprep.subr.bf16.mxu0 %v13430_v55 }
 0x2ff   : >> { %11956 = vmatmul.mubr.msk.f32.gmra.mrb[2].mxu0 %vm1835_vm4, %v14749_v41  ;;  %v6735_v41 = vld [vmem:[#allocation3 + $0xc1] sm:$0xff] }
 0x300   : >> { %11958 = vmatprep.mubr.msk.f32.mxu0 %vm13431_vm5, %v13432_v56 }
 0x303   : >> { %11959 = vmatmul.mubr.msk.f32.gmra.mrb[4].mxu0 %vm1835_vm4, %v14901_v24 }
 0x304   : >> { %11961 = vmatprep.mubr.msk.f32.mxu0 %vm13431_vm5, %v13432_v56 }
 0x307   : >> { %11962 = vmatmul.mubr.msk.f32.gmra.mrb[6].mxu0 %vm1835_vm4, %v14907_v34 }
 0x308   : >> { %11964 = vmatprep.mubr.msk.f32.mxu0 %vm13431_vm5, %v13432_v56 }
 0x30b   : >> { %11965 = vmatmul.mubr.msk.f32.gmra.mrb[8].mxu0 %vm1835_vm4, %v14913_v35 }
 0x30c   : >> { %11967 = vmatprep.mubr.msk.f32.mxu0 %vm13431_vm5, %v13432_v56 }
 0x30f   : >> { %11968 = vmatmul.mubr.msk.f32.gmra.mrb[10].mxu0 %vm1835_vm4, %v14919_v36 }
 0x310   : >> { %11970 = vmatprep.mubr.msk.f32.mxu0 %vm13431_vm5, %v13432_v56 }
 0x313   : >> { %11971 = vmatmul.mubr.msk.f32.gmra.mrb[12].mxu0 %vm1835_vm4, %v14925_v38 }
 0x314   : >> { %11973 = vmatprep.mubr.msk.f32.mxu0 %vm13431_vm5, %v13432_v56 }
 0x317   : >> { %11974 = vmatmul.mubr.msk.f32.gmra.mrb[14].mxu0 %vm1835_vm4, %v14931_v6 }
 0x318   : >> { %11976 = vmatprep.mubr.msk.f32.mxu0 %vm13431_vm5, %v13432_v56 }
 0x31b   : >> { %11977 = vmatmul.mubr.msk.f32.gmra.mrb[16].mxu0 %vm1835_vm4, %v14937_v52 }
 0x31c   : >> { %11979 = vmatprep.mubr.msk.f32.mxu0 %vm13431_vm5, %v13432_v56 }
 0x31f   : >> { %11980 = vmatmul.mubr.msk.f32.gmra.mrb[18].mxu0 %vm1835_vm4, %v14943_v14 }
 0x320   : >> { %11982 = vmatprep.mubr.msk.f32.mxu0 %vm13431_vm5, %v13432_v56 }
 0x323   : >> { %11983 = vmatmul.mubr.msk.f32.gmra.mrb[20].mxu0 %vm1835_vm4, %v6206_v8 }
 0x324   : >> { %11989 = vmatprep.mubr.msk.f32.mxu0 %vm13431_vm5, %v13432_v56 }
 0x327   : >> { %11990 = vmatmul.mubr.msk.f32.vlgmr.msra.gmra.mrb[0].mxu0 %vm1835_vm4, %v14534_v45  ;;  %v10340_v45 = vld [vmem:[%s15708_s5 + $0x28] sm:$0xff] }
 0x328   : >> { %12602 = vmatpush3.bf16.msra.mxu0 %v14378_v33  ;;  %11992 = vmatprep.mubr.msk.f32.mxu0 %vm13431_vm5, %v13432_v56  ;;  %v10339_v33 = vld [vmem:[%s15708_s5 + $0x20] sm:$0xff] }
 0x329   : >> { %12603 = vmatprep.subr.bf16.mxu0 %v13430_v55 }
 0x32b   : >> { %11993 = vmatmul.mubr.msk.f32.gmra.mrb[2].mxu0 %vm1835_vm4, %v14548_v51  ;;  %v12618_v51 = vpack.c.bf16 %v10340_v45, %v10339_v33  ;;  %v6905_v33 = vld [vmem:[#allocation3 + $0x95] sm:$0xff] }
 0x32c   : >> { %11995 = vmatprep.mubr.msk.f32.mxu0 %vm13431_vm5, %v13432_v56 }
 0x32d   : >> { %12619 = vmatprep.subr.bf16.mxu1 %v12618_v51 }
 0x32e   : >> { %12621 = vmatpush3.bf16.msra.mxu1 %v12618_v51 }
 0x32f   : >> { %11996 = vmatmul.mubr.msk.f32.gmra.mrb[4].mxu0 %vm1835_vm4, %v14560_v57  ;;  %v10341_v57 = vld [vmem:[%s15708_s5 + $0x30] sm:$0xff] }
 0x330   : >> { %11998 = vmatprep.mubr.msk.f32.mxu0 %vm13431_vm5, %v13432_v56  ;;  %v12622_v13 = vpack.c.bf16 %v10342_v15, %v10341_v57 }
 0x332   : >> { %12623 = vmatprep.subr.bf16.mxu1 %v12622_v13 }
 0x333   : >> { %11999 = vmatmul.mubr.msk.f32.gmra.mrb[6].mxu0 %vm1835_vm4, %v14570_v22  ;;  %12625 = vmatpush3.bf16.msra.mxu1 %v12622_v13  ;;  %v7722_v22 = vld [vmem:[#allocation5 + $0x1] sm:$0xff] }
 0x334   : >> { %12001 = vmatprep.mubr.msk.f32.mxu0 %vm13431_vm5, %v13432_v56  ;;  %12252 = vmatprep.mubr.msk.f32.mxu1 %vm7733_vm6, %v7722_v22  ;;  %v6906_v13 = vld [vmem:[#allocation3 + $0x9d] sm:$0xff] }
 0x337   : >> { %12002 = vmatmul.mubr.msk.f32.gmra.mrb[8].mxu0 %vm1835_vm4, %v14586_v29  ;;  %v14999_v29 = vld [vmem:[#allocation3 + $0xbf] sm:$0xff] }
 0x338   : >> { %12004 = vmatprep.mubr.msk.f32.mxu0 %vm13431_vm5, %v13432_v56 }
 0x33b   : >> { %12005 = vmatmul.mubr.msk.f32.gmra.mrb[10].mxu0 %vm1835_vm4, %v14599_v12  ;;  %v15005_v12 = vld [vmem:[#allocation3 + $0xc7] sm:$0xff] }
 0x33c   : >> { %12007 = vmatprep.mubr.msk.f32.mxu0 %vm13431_vm5, %v13432_v56 }
 0x33f   : >> { %12008 = vmatmul.mubr.msk.f32.gmra.mrb[12].mxu0 %vm1835_vm4, %v14608_v25  ;;  %v6383_v25 = vld [vmem:[#allocation3 + $0xcf] sm:$0xf] }
 0x340   : >> { %12010 = vmatprep.mubr.msk.f32.mxu0 %vm13431_vm5, %v13432_v56 }
 0x343   : >> { %12011 = vmatmul.mubr.msk.f32.gmra.mrb[14].mxu0 %vm1835_vm4, %v14616_v46  ;;  %v15024_v46 = vld [vmem:[#allocation3 + $0x90] sm:$0xff] }
 0x344   : >> { %12013 = vmatprep.mubr.msk.f32.mxu0 %vm13431_vm5, %v13432_v56 }
 0x347   : >> { %12014 = vmatmul.mubr.msk.f32.gmra.mrb[16].mxu0 %vm1835_vm4, %v14999_v29 }
 0x348   : >> { %12016 = vmatprep.mubr.msk.f32.mxu0 %vm13431_vm5, %v13432_v56 }
 0x34b   : >> { %12017 = vmatmul.mubr.msk.f32.gmra.mrb[18].mxu0 %vm1835_vm4, %v15005_v12 }
 0x34c   : >> { %12019 = vmatprep.mubr.msk.f32.mxu0 %vm13431_vm5, %v13432_v56 }
 0x34f   : >> { %12020 = vmatmul.mubr.msk.f32.gmra.mrb[20].mxu0 %vm1835_vm4, %v6383_v25 }
 0x350   : >> { %12026 = vmatprep.mubr.msk.f32.mxu0 %vm13431_vm5, %v13432_v56 }
 0x353   : >> { %12027 = vmatmul.mubr.msk.f32.vlgmr.msra.gmra.mrb[0].mxu0 %vm1835_vm4, %v14850_v10 }
 0x354   : >> { %12605 = vmatpush3.bf16.msra.mxu0 %v14451_v48  ;;  %12029 = vmatprep.mubr.msk.f32.mxu0 %vm13431_vm5, %v13432_v56  ;;  %v15030_v48 = vld [vmem:[#allocation3 + $0x98] sm:$0xff] }
 0x355   : >> { %12606 = vmatprep.subr.bf16.mxu0 %v13430_v55 }
 0x357   : >> { %12030 = vmatmul.mubr.msk.f32.gmra.mrb[2].mxu0 %vm1835_vm4, %v14665_v61  ;;  %v15036_v61 = vld [vmem:[#allocation3 + $0xa0] sm:$0xff] }
 0x358   : >> { %12032 = vmatprep.mubr.msk.f32.mxu0 %vm13431_vm5, %v13432_v56 }
 0x35b   : >> { %12033 = vmatmul.mubr.msk.f32.gmra.mrb[4].mxu0 %vm1835_vm4, %v15024_v46 }
 0x35c   : >> { %12035 = vmatprep.mubr.msk.f32.mxu0 %vm13431_vm5, %v13432_v56 }
 0x35f   : >> { %12036 = vmatmul.mubr.msk.f32.gmra.mrb[6].mxu0 %vm1835_vm4, %v15030_v48 }
 0x360   : >> { %12038 = vmatprep.mubr.msk.f32.mxu0 %vm13431_vm5, %v13432_v56 }
 0x363   : >> { %12039 = vmatmul.mubr.msk.f32.gmra.mrb[8].mxu0 %vm1835_vm4, %v15036_v61 }
 0x364   : >> { %12041 = vmatprep.mubr.msk.f32.mxu0 %vm13431_vm5, %v13432_v56 }
 0x367   : >> { %12042 = vmatmul.mubr.msk.f32.gmra.mrb[10].mxu0 %vm1835_vm4, %v15042_v43 }
 0x368   : >> { %12044 = vmatprep.mubr.msk.f32.mxu0 %vm13431_vm5, %v13432_v56 }
 0x36b   : >> { %12045 = vmatmul.mubr.msk.f32.gmra.mrb[12].mxu0 %vm1835_vm4, %v14709_v49  ;;  %v6560_v49 = vld [vmem:[#allocation3 + $0xd0] sm:$0xf] }
 0x36c   : >> { %12047 = vmatprep.mubr.msk.f32.mxu0 %vm13431_vm5, %v13432_v56 }
 0x36f   : >> { %12048 = vmatmul.mubr.msk.f32.gmra.mrb[14].mxu0 %vm1835_vm4, %v14720_v16 }
 0x370   : >> { %12050 = vmatprep.mubr.msk.f32.mxu0 %vm13431_vm5, %v13432_v56 }
 0x373   : >> { %12051 = vmatmul.mubr.msk.f32.gmra.mrb[16].mxu0 %vm1835_vm4, %v15056_v11 }
 0x374   : >> { %12053 = vmatprep.mubr.msk.f32.mxu0 %vm13431_vm5, %v13432_v56 }
 0x377   : >> { %12054 = vmatmul.mubr.msk.f32.gmra.mrb[18].mxu0 %vm1835_vm4, %v15062_v19 }
 0x378   : >> { %12056 = vmatprep.mubr.msk.f32.mxu0 %vm13431_vm5, %v13432_v56 }
 0x37b   : >> { %12057 = vmatmul.mubr.msk.f32.gmra.mrb[20].mxu0 %vm1835_vm4, %v6560_v49 }
 0x37c   : >> { %12063 = vmatprep.mubr.msk.f32.mxu0 %vm13431_vm5, %v13432_v56 }
 0x37f   : >> { %12064 = vmatmul.mubr.msk.f32.vlgmr.msra.gmra.mrb[0].mxu0 %vm1835_vm4, %v14759_v7 }
 0x380   : >> { %12608 = vmatpush3.bf16.msra.mxu0 %v14509_v30  ;;  %12066 = vmatprep.mubr.msk.f32.mxu0 %vm13431_vm5, %v13432_v56 }
 0x381   : >> { %12609 = vmatprep.subr.bf16.mxu0 %v13430_v55 }
 0x383   : >> { %12067 = vmatmul.mubr.msk.f32.gmra.mrb[2].mxu0 %vm1835_vm4, %v14768_v50 }
 0x384   : >> { %12069 = vmatprep.mubr.msk.f32.mxu0 %vm13431_vm5, %v13432_v56 }
 0x387   : >> { %12070 = vmatmul.mubr.msk.f32.gmra.mrb[4].mxu0 %vm1835_vm4, %v14776_v28 }
 0x388   : >> { %12072 = vmatprep.mubr.msk.f32.mxu0 %vm13431_vm5, %v13432_v56 }
 0x38b   : >> { %12073 = vmatmul.mubr.msk.f32.gmra.mrb[6].mxu0 %vm1835_vm4, %v14784_v62 }
 0x38c   : >> { %12075 = vmatprep.mubr.msk.f32.mxu0 %vm13431_vm5, %v13432_v56 }
 0x38f   : >> { %12076 = vmatmul.mubr.msk.f32.gmra.mrb[8].mxu0 %vm1835_vm4, %v14793_v59 }
 0x390   : >> { %12078 = vmatprep.mubr.msk.f32.mxu0 %vm13431_vm5, %v13432_v56 }
 0x393   : >> { %12079 = vmatmul.mubr.msk.f32.gmra.mrb[10].mxu0 %vm1835_vm4, %v14803_v37 }
 0x394   : >> { %12081 = vmatprep.mubr.msk.f32.mxu0 %vm13431_vm5, %v13432_v56 }
 0x397   : >> { %v11636_v30 = vpop.f32.mrb[98].mxu1  ;;  %12082 = vmatmul.mubr.msk.f32.gmra.mrb[12].mxu0 %vm1835_vm4, %v14813_v26 }
 0x398   : >> { %4791 = vst [vmem:[#allocation4 + $0x8] sm:$0xff] %v11636_v30  ;;  %v4719_v16 = vpop.f32.mrb[99].mxu1  ;;  %12084 = vmatprep.mubr.msk.f32.mxu0 %vm13431_vm5, %v13432_v56 }
 0x399   : >> { %4790 = vst [vmem:[#allocation4] sm:$0xff] %v4719_v16 }
 0x39b   : >> { %v11639_v53 = vpop.f32.mrb[100].mxu1  ;;  %12085 = vmatmul.mubr.msk.f32.gmra.mrb[14].mxu0 %vm1835_vm4, %v14823_v32 }
 0x39c   : >> { %4793 = vst [vmem:[#allocation4 + $0x18] sm:$0xff] %v11639_v53  ;;  %v4729_v39 = vpop.f32.mrb[101].mxu1  ;;  %12087 = vmatprep.mubr.msk.f32.mxu0 %vm13431_vm5, %v13432_v56 }
 0x39d   : >> { %4792 = vst [vmem:[#allocation4 + $0x10] sm:$0xff] %v4729_v39  ;;  %v6907_v39 = vld [vmem:[#allocation3 + $0xa5] sm:$0xff] }
 0x39f   : >> { %v11642_v7 = vpop.f32.mrb[102].mxu1  ;;  %12088 = vmatmul.mubr.msk.f32.gmra.mrb[16].mxu0 %vm1835_vm4, %v6735_v41 }
 0x3a0   : >> { %v7623_v58 = vld [vmem:[#allocation4] ss:$2 sm:$0x3f]  ;;  %v7625_v60 = vld [vmem:[#allocation4 + $0x1] ss:$2 sm:$0x3f]  ;;  %12090 = vmatprep.mubr.msk.f32.mxu0 %vm13431_vm5, %v13432_v56 }
 0x3a1   : >> { %4795 = vst [vmem:[#allocation4 + $0x28] sm:$0xff] %v11642_v7  ;;  %v4739_v50 = vpop.f32.mrb[103].mxu1  ;;  %v7626_v54 = vmax.f32 %v7623_v58, %v7625_v60  ;;  %v6908_v58 = vld [vmem:[#allocation3 + $0xad] sm:$0xff] }
 0x3a2   : >> { %4794 = vst [vmem:[#allocation4 + $0x20] sm:$0xff] %v4739_v50 }
 0x3a3   : >> { %v11645_v28 = vpop.f32.mrb[104].mxu1  ;;  %12091 = vmatmul.mubr.msk.f32.gmra.mrb[18].mxu0 %vm1835_vm4, %v6736_v5  ;;  %v6909_v5 = vld [vmem:[#allocation3 + $0xb5] sm:$0xff] }
 0x3a4   : >> { %v7628_v44 = vld [vmem:[#allocation4 + $0xf] ss:$2 sm:$0x3f]  ;;  %4797 = vst [vmem:[#allocation4 + $0x38] sm:$0xff] %v11645_v28  ;;  %12093 = vmatprep.mubr.msk.f32.mxu0 %vm13431_vm5, %v13432_v56  ;;  %v4749_v27 = vpop.f32.mrb[105].mxu1 }
 0x3a5   : >> { %v7629_v62 = vmax.f32 %v7626_v54, %v7628_v44  ;;  %v7631_v59 = vld [vmem:[#allocation4 + $0x10] ss:$2 sm:$0x3f]  ;;  %4796 = vst [vmem:[#allocation4 + $0x30] sm:$0xff] %v4749_v27  ;;  %v6911_v44 = vld [vmem:[#allocation3 + $0xc5] sm:$0xff] }
 0x3a6   : >> { %v6910_v54 = vld [vmem:[#allocation3 + $0xbd] sm:$0xff] }
 0x3a7   : >> { %v7632_v37 = vmax.f32 %v7629_v62, %v7631_v59  ;;  %v11648_v26 = vpop.f32.mrb[106].mxu1  ;;  %12094 = vmatmul.mubr.msk.f32.gmra.mrb[20].mxu0 %vm1835_vm4, %v6737_v23  ;;  %v6912_v23 = vld [vmem:[#allocation3 + $0xcd] sm:$0xff]  ;;  %v6913_v62 = vld [vmem:[#allocation3 + $0xd5] sm:$0xff]  ;;  %v6914_v27 = vld [vmem:[#allocation3 + $0xdd] sm:$0xf] }
 0x3a8   : >> { %4799 = vst [vmem:[#allocation4 + $0x48] sm:$0xff] %v11648_v26  ;;  %v4759_v32 = vpop.f32.mrb[107].mxu1  ;;  %12100 = vmatprep.mubr.msk.f32.mxu0 %vm13431_vm5, %v13432_v56 }
 0x3a9   : >> { %v7639_v47 = vadd.f32 %v13586_v2, %v7632_v37  ;;  %v7643_v17 = vld [vmem:[#allocation4 + $0x1e] ss:$2 sm:$0x3f]  ;;  %v7645_v40 = vld [vmem:[#allocation4 + $0x1f] ss:$2 sm:$0x3f] }
 0x3aa   : >> { %4798 = vst [vmem:[#allocation4 + $0x40] sm:$0xff] %v4759_v32  ;;  %v7646_v18 = vmax.f32 %v7643_v17, %v7645_v40  ;;  %v7720_v37 = vld [vmem:[%s15708_s5 + $0x10] sm:$0xff]  ;;  %v10355_v32 = vld [vmem:[%s15708_s5 + $0x40] sm:$0xff] }
 0x3ab   : >> { %v7640_v31 = vmax.f32 %v7639_v47, 0.0  ;;  %v11651_v10 = vpop.f32.mrb[108].mxu1  ;;  %12101 = vmatmul.mubr.msk.f32.vlgmr.msra.gmra.mrb[0].mxu0 %vm1835_vm4, %v6904_v9  ;;  %v10356_v47 = vld [vmem:[%s15708_s5 + $0x48] sm:$0xff] }
 0x3ac   : >> { %4801 = vst [vmem:[#allocation4 + $0x58] sm:$0xff] %v11651_v10  ;;  %v4769_v20 = vpop.f32.mrb[109].mxu1  ;;  %12611 = vmatpush3.bf16.msra.mxu0 %v14588_v63  ;;  %12103 = vmatprep.mubr.msk.f32.mxu0 %vm13431_vm5, %v13432_v56  ;;  %v7648_v21 = vld [vmem:[#allocation4 + $0x2d] ss:$2 sm:$0x3f]  ;;  %v15298_v17 = vpack.c.bf16 %v10356_v47, %v10355_v32 }
 0x3ad   : >> { %7641 = vst [vmem:[#allocation5 + $0x9] sm:$0x3f] %v7640_v31  ;;  %4800 = vst [vmem:[#allocation4 + $0x50] sm:$0xff] %v4769_v20  ;;  %12612 = vmatprep.subr.bf16.mxu0 %v13430_v55  ;;  %v7649_v8 = vmax.f32 %v7646_v18, %v7648_v21  ;;  %v7651_v45 = vld [vmem:[#allocation4 + $0x2e] ss:$2 sm:$0x3f] }
 0x3ae   : >> { %v10365_v47 = vld [vmem:[%s15708_s5 + $0x60] sm:$0xff] }
 0x3af   : >> { %12104 = vmatmul.mubr.msk.f32.gmra.mrb[2].mxu0 %vm1835_vm4, %v6905_v33  ;;  %v7652_v51 = vmax.f32 %v7649_v8, %v7651_v45 }
 0x3b0   : >> { %12106 = vmatprep.mubr.msk.f32.mxu0 %vm13431_vm5, %v13432_v56 }
 0x3b1   : >> { %v7657_v57 = vld [vmem:[#allocation4 + $0x3c] ss:$2 sm:$0x3f]  ;;  %v7659_v15 = vld [vmem:[#allocation4 + $0x3d] ss:$2 sm:$0x3f]  ;;  %v7653_v63 = vadd.f32 %v13586_v2, %v7652_v51 }
 0x3b2   : >> { %v7660_v22 = vmax.f32 %v7657_v57, %v7659_v15 }
 0x3b3   : >> { %12107 = vmatmul.mubr.msk.f32.gmra.mrb[4].mxu0 %vm1835_vm4, %v6906_v13  ;;  %v7654_v25 = vmax.f32 %v7653_v63, 0.0 }
 0x3b4   : >> { %v7662_v49 = vld [vmem:[#allocation4 + $0x4b] ss:$2 sm:$0x3f]  ;;  %v15125_v30 = vld [vmem:[#allocation5 + $0x9] sm:$0xff]  ;;  %12109 = vmatprep.mubr.msk.f32.mxu0 %vm13431_vm5, %v13432_v56 }
 0x3b5   : >> { %v7663_v16 = vmax.f32 %v7660_v22, %v7662_v49  ;;  %12253 = vmatmul.mubr.msk.f32.vlgmr.msra.gmra.mrb[110].mxu1 %vm7733_vm6, %v15125_v30  ;;  %7655 = vst [vmem:[#allocation5 + $0x11] sm:$0x3f] %v7654_v25  ;;  %v7665_v53 = vld [vmem:[#allocation4 + $0x4c] ss:$2 sm:$0x3f]  ;;  %v7713_v32 = vld [vmem:[#allocation5 + $0x8] sm:$0xff] }
 0x3b7   : >> { %v7666_v41 = vmax.f32 %v7663_v16, %v7665_v53  ;;  %12110 = vmatmul.mubr.msk.f32.gmra.mrb[6].mxu0 %vm1835_vm4, %v6907_v39 }
 0x3b8   : >> { %12112 = vmatprep.mubr.msk.f32.mxu0 %vm13431_vm5, %v13432_v56 }
 0x3b9   : >> { %v7667_v7 = vadd.f32 %v13586_v2, %v7666_v41 }
 0x3bb   : >> { %v7668_v60 = vmax.f32 %v7667_v7, 0.0  ;;  %12113 = vmatmul.mubr.msk.f32.gmra.mrb[8].mxu0 %vm1835_vm4, %v6908_v58 }
 0x3bc   : >> { %12115 = vmatprep.mubr.msk.f32.mxu0 %vm13431_vm5, %v13432_v56  ;;  %v15138_v50 = vld [vmem:[#allocation5 + $0x11] sm:$0xff] }
 0x3bd   : >> { %7669 = vst [vmem:[#allocation5 + $0x19] sm:$0x3f] %v7668_v60  ;;  %12255 = vmatprep.mubr.msk.f32.mxu1 %vm7733_vm6, %v15138_v50 }
 0x3bf   : >> { %12116 = vmatmul.mubr.msk.f32.gmra.mrb[10].mxu0 %vm1835_vm4, %v6909_v5 }
 0x3c0   : >> { %12118 = vmatprep.mubr.msk.f32.mxu0 %vm13431_vm5, %v13432_v56 }
 0x3c3   : >> { %12119 = vmatmul.mubr.msk.f32.gmra.mrb[12].mxu0 %vm1835_vm4, %v6910_v54 }
 0x3c4   : >> { %v15146_v28 = vld [vmem:[#allocation5 + $0x19] sm:$0xff]  ;;  %12121 = vmatprep.mubr.msk.f32.mxu0 %vm13431_vm5, %v13432_v56 }
 0x3c5   : >> { %12256 = vmatmul.mubr.msk.f32.gmra.mrb[112].mxu1 %vm7733_vm6, %v15146_v28 }
 0x3c7   : >> { %12122 = vmatmul.mubr.msk.f32.gmra.mrb[14].mxu0 %vm1835_vm4, %v6911_v44 }
 0x3c8   : >> { %12124 = vmatprep.mubr.msk.f32.mxu0 %vm13431_vm5, %v13432_v56 }
 0x3cb   : >> { %12125 = vmatmul.mubr.msk.f32.gmra.mrb[16].mxu0 %vm1835_vm4, %v6912_v23 }
 0x3cc   : >> { %12127 = vmatprep.mubr.msk.f32.mxu0 %vm13431_vm5, %v13432_v56 }
 0x3cf   : >> { %12128 = vmatmul.mubr.msk.f32.gmra.mrb[18].mxu0 %vm1835_vm4, %v6913_v62 }
 0x3d0   : >> { %12130 = vmatprep.mubr.msk.f32.mxu0 %vm13431_vm5, %v13432_v56 }
 0x3d3   : >> { %12131 = vmatmul.mubr.msk.f32.gmra.mrb[20].mxu0 %vm1835_vm4, %v6914_v27 }
 0x3d4   : >> { %12137 = vmatprep.mubr.msk.f32.mxu0 %vm13431_vm5, %v13432_v56 }
 0x3d7   : >> { %12138 = vmatmul.mubr.msk.f32.vlgmr.msra.gmra.mrb[0].mxu0 %vm1835_vm4, %v14901_v24  ;;  %v7091_v24 = vld [vmem:[#allocation3 + $0xde] sm:$0xf] }
 0x3d8   : >> { %12614 = vmatpush3.bf16.msra.mxu0 %v14649_v42  ;;  %12140 = vmatprep.mubr.msk.f32.mxu0 %vm13431_vm5, %v13432_v56  ;;  %v7090_v42 = vld [vmem:[#allocation3 + $0xd6] sm:$0xff] }
 0x3d9   : >> { %12615 = vmatprep.subr.bf16.mxu0 %v13430_v55  ;;  %v7089_v55 = vld [vmem:[#allocation3 + $0xce] sm:$0xff] }
 0x3db   : >> { %12141 = vmatmul.mubr.msk.f32.gmra.mrb[2].mxu0 %vm1835_vm4, %v14907_v34  ;;  %v7258_v34 = vld [vmem:[#allocation3 + $0x8f] sm:$0xff] }
 0x3dc   : >> { %12143 = vmatprep.mubr.msk.f32.mxu0 %vm13431_vm5, %v13432_v56 }
 0x3df   : >> { %12144 = vmatmul.mubr.msk.f32.gmra.mrb[4].mxu0 %vm1835_vm4, %v14913_v35  ;;  %v7259_v35 = vld [vmem:[#allocation3 + $0x97] sm:$0xff] }
 0x3e0   : >> { %12146 = vmatprep.mubr.msk.f32.mxu0 %vm13431_vm5, %v13432_v56 }
 0x3e3   : >> { %12147 = vmatmul.mubr.msk.f32.gmra.mrb[6].mxu0 %vm1835_vm4, %v14919_v36  ;;  %v7260_v36 = vld [vmem:[#allocation3 + $0x9f] sm:$0xff] }
 0x3e4   : >> { %12149 = vmatprep.mubr.msk.f32.mxu0 %vm13431_vm5, %v13432_v56 }
 0x3e7   : >> { %12150 = vmatmul.mubr.msk.f32.gmra.mrb[8].mxu0 %vm1835_vm4, %v14925_v38  ;;  %v7261_v38 = vld [vmem:[#allocation3 + $0xa7] sm:$0xff] }
 0x3e8   : >> { %12152 = vmatprep.mubr.msk.f32.mxu0 %vm13431_vm5, %v13432_v56 }
 0x3eb   : >> { %12153 = vmatmul.mubr.msk.f32.gmra.mrb[10].mxu0 %vm1835_vm4, %v14931_v6  ;;  %v7263_v6 = vld [vmem:[#allocation3 + $0xb7] sm:$0xff] }
 0x3ec   : >> { %12155 = vmatprep.mubr.msk.f32.mxu0 %vm13431_vm5, %v13432_v56 }
 0x3ef   : >> { %12156 = vmatmul.mubr.msk.f32.gmra.mrb[12].mxu0 %vm1835_vm4, %v14937_v52  ;;  %v7266_v52 = vld [vmem:[#allocation3 + $0xcf] sm:$0xff] }
 0x3f0   : >> { %12158 = vmatprep.mubr.msk.f32.mxu0 %vm13431_vm5, %v13432_v56 }
 0x3f3   : >> { %12159 = vmatmul.mubr.msk.f32.gmra.mrb[14].mxu0 %vm1835_vm4, %v14943_v14  ;;  %v7267_v14 = vld [vmem:[#allocation3 + $0xd7] sm:$0xff] }
 0x3f4   : >> { %12161 = vmatprep.mubr.msk.f32.mxu0 %vm13431_vm5, %v13432_v56 }
 0x3f7   : >> { %12162 = vmatmul.mubr.msk.f32.gmra.mrb[16].mxu0 %vm1835_vm4, %v7089_v55 }
 0x3f8   : >> { %12164 = vmatprep.mubr.msk.f32.mxu0 %vm13431_vm5, %v13432_v56 }
 0x3fb   : >> { %12165 = vmatmul.mubr.msk.f32.gmra.mrb[18].mxu0 %vm1835_vm4, %v7090_v42 }
 0x3fc   : >> { %12167 = vmatprep.mubr.msk.f32.mxu0 %vm13431_vm5, %v13432_v56 }
 0x3ff   : >> { %12168 = vmatmul.mubr.msk.f32.gmra.mrb[20].mxu0 %vm1835_vm4, %v7091_v24 }
 0x400   : >> { %12174 = vmatprep.mubr.msk.f32.mxu0 %vm13431_vm5, %v13432_v56 }
 0x403   : >> { %12175 = vmatmul.mubr.msk.f32.vlgmr.msra.gmra.mrb[0].mxu0 %vm1835_vm4, %v7258_v34 }
 0x404   : >> { %12617 = vmatpush3.bf16.msra.mxu0 %v14698_v4  ;;  %12177 = vmatprep.mubr.msk.f32.mxu0 %vm13431_vm5, %v13432_v56  ;;  %v7262_v4 = vld [vmem:[#allocation3 + $0xaf] sm:$0xff] }
 0x407   : >> { %12178 = vmatmul.mubr.msk.f32.gmra.mrb[2].mxu0 %vm1835_vm4, %v7259_v35 }
 0x408   : >> { %12180 = vmatprep.mubr.msk.f32.mxu0 %vm13431_vm5, %v13432_v56 }
 0x40b   : >> { %12181 = vmatmul.mubr.msk.f32.gmra.mrb[4].mxu0 %vm1835_vm4, %v7260_v36 }
 0x40c   : >> { %12183 = vmatprep.mubr.msk.f32.mxu0 %vm13431_vm5, %v13432_v56 }
 0x40f   : >> { %12184 = vmatmul.mubr.msk.f32.gmra.mrb[6].mxu0 %vm1835_vm4, %v7261_v38 }
 0x410   : >> { %12186 = vmatprep.mubr.msk.f32.mxu0 %vm13431_vm5, %v13432_v56 }
 0x413   : >> { %12187 = vmatmul.mubr.msk.f32.gmra.mrb[8].mxu0 %vm1835_vm4, %v7262_v4 }
 0x414   : >> { %12189 = vmatprep.mubr.msk.f32.mxu0 %vm13431_vm5, %v13432_v56 }
 0x417   : >> { %12190 = vmatmul.mubr.msk.f32.gmra.mrb[10].mxu0 %vm1835_vm4, %v7263_v6 }
 0x418   : >> { %12192 = vmatprep.mubr.msk.f32.mxu0 %vm13431_vm5, %v13432_v56 }
 0x41b   : >> { %12193 = vmatmul.mubr.msk.f32.gmra.mrb[12].mxu0 %vm1835_vm4, %v14999_v29  ;;  %v7268_v29 = vld [vmem:[#allocation3 + $0xdf] sm:$0xf] }
 0x41c   : >> { %12195 = vmatprep.mubr.msk.f32.mxu0 %vm13431_vm5, %v13432_v56 }
 0x41f   : >> { %12196 = vmatmul.mubr.msk.f32.gmra.mrb[14].mxu0 %vm1835_vm4, %v15005_v12  ;;  %v7439_v12 = vld [vmem:[#allocation3 + $0xb0] sm:$0xff] }
 0x420   : >> { %12198 = vmatprep.mubr.msk.f32.mxu0 %vm13431_vm5, %v13432_v56 }
 0x423   : >> { %12199 = vmatmul.mubr.msk.f32.gmra.mrb[16].mxu0 %vm1835_vm4, %v7266_v52 }
 0x424   : >> { %12201 = vmatprep.mubr.msk.f32.mxu0 %vm13431_vm5, %v13432_v56 }
 0x427   : >> { %12202 = vmatmul.mubr.msk.f32.gmra.mrb[18].mxu0 %vm1835_vm4, %v7267_v14 }
 0x428   : >> { %12204 = vmatprep.mubr.msk.f32.mxu0 %vm13431_vm5, %v13432_v56 }
 0x42b   : >> { %12205 = vmatmul.mubr.msk.f32.gmra.mrb[20].mxu0 %vm1835_vm4, %v7268_v29 }
 0x42c   : >> { %12211 = vmatprep.mubr.msk.f32.mxu0 %vm13431_vm5, %v13432_v56 }
 0x42f   : >> { %12212 = vmatmul.mubr.msk.f32.vlgmr.msra.gmra.mrb[0].mxu0 %vm1835_vm4, %v15024_v46  ;;  %v7440_v46 = vld [vmem:[#allocation3 + $0xb8] sm:$0xff] }
 0x430   : >> { %12214 = vmatprep.mubr.msk.f32.mxu0 %vm13431_vm5, %v13432_v56 }
 0x433   : >> { %12215 = vmatmul.mubr.msk.f32.gmra.mrb[2].mxu0 %vm1835_vm4, %v15030_v48  ;;  %v7443_v48 = vld [vmem:[#allocation3 + $0xd0] sm:$0xff] }
 0x434   : >> { %12217 = vmatprep.mubr.msk.f32.mxu0 %vm13431_vm5, %v13432_v56 }
 0x437   : >> { %12218 = vmatmul.mubr.msk.f32.gmra.mrb[4].mxu0 %vm1835_vm4, %v15036_v61  ;;  %v7444_v61 = vld [vmem:[#allocation3 + $0xd8] sm:$0xff] }
 0x438   : >> { %12220 = vmatprep.mubr.msk.f32.mxu0 %vm13431_vm5, %v13432_v56 }
 0x43b   : >> { %12221 = vmatmul.mubr.msk.f32.gmra.mrb[6].mxu0 %vm1835_vm4, %v15042_v43  ;;  %v7445_v43 = vld [vmem:[#allocation3 + $0xe0] sm:$0xf] }
 0x43c   : >> { %12223 = vmatprep.mubr.msk.f32.mxu0 %vm13431_vm5, %v13432_v56 }
 0x43f   : >> { %12224 = vmatmul.mubr.msk.f32.gmra.mrb[8].mxu0 %vm1835_vm4, %v7439_v12 }
 0x440   : >> { %12226 = vmatprep.mubr.msk.f32.mxu0 %vm13431_vm5, %v13432_v56 }
 0x443   : >> { %12227 = vmatmul.mubr.msk.f32.gmra.mrb[10].mxu0 %vm1835_vm4, %v7440_v46 }
 0x444   : >> { %12229 = vmatprep.mubr.msk.f32.mxu0 %vm13431_vm5, %v13432_v56 }
 0x447   : >> { %12230 = vmatmul.mubr.msk.f32.gmra.mrb[12].mxu0 %vm1835_vm4, %v15056_v11  ;;  %v7718_v11 = vld [vmem:[%s15708_s5] sm:$0xff] }
 0x448   : >> { %12232 = vmatprep.mubr.msk.f32.mxu0 %vm13431_vm5, %v13432_v56 }
 0x44b   : >> { %12233 = vmatmul.mubr.msk.f32.gmra.mrb[14].mxu0 %vm1835_vm4, %v15062_v19  ;;  %v7719_v19 = vld [vmem:[%s15708_s5 + $0x8] sm:$0xff] }
 0x44c   : >> { %12235 = vmatprep.mubr.msk.f32.mxu0 %vm13431_vm5, %v13432_v56  ;;  %v12626_v59 = vpack.c.bf16 %v7719_v19, %v7718_v11 }
 0x44e   : >> { %12627 = vmatprep.subr.bf16.mxu1 %v12626_v59 }
 0x44f   : >> { %12236 = vmatmul.mubr.msk.f32.gmra.mrb[16].mxu0 %vm1835_vm4, %v7443_v48  ;;  %12629 = vmatpush3.bf16.msra.mxu1 %v12626_v59  ;;  %v10358_v59 = vld [vmem:[%s15708_s5 + $0x58] sm:$0xff] }
 0x450   : >> { %12238 = vmatprep.mubr.msk.f32.mxu0 %vm13431_vm5, %v13432_v56 }
 0x453   : >> { %12239 = vmatmul.mubr.msk.f32.gmra.mrb[18].mxu0 %vm1835_vm4, %v7444_v61  ;;  %v7712_v61 = vld [vmem:[#allocation5] sm:$0xff] }
 0x454   : >> { %12241 = vmatprep.mubr.msk.f32.mxu0 %vm13431_vm5, %v13432_v56  ;;  %v7721_v56 = vld [vmem:[%s15708_s5 + $0x18] sm:$0xff] }
 0x455   : >> { %v12630_v26 = vpack.c.bf16 %v7721_v56, %v7720_v37 }
 0x457   : >> { %12242 = vmatmul.mubr.msk.f32.gmra.mrb[20].mxu0 %vm1835_vm4, %v7445_v43  ;;  %12631 = vmatprep.subr.bf16.mxu1 %v12630_v26  ;;  %v10357_v43 = vld [vmem:[%s15708_s5 + $0x50] sm:$0xff] }
 0x458   : >> { %12633 = vmatpush3.bf16.msra.mxu1 %v12630_v26  ;;  %v12638_v26 = vpack.c.bf16 %v10358_v59, %v10357_v43  ;;  %v10418_v43 = vld [vmem:[%s15708_s5 + $0x118] sm:$0xff]  ;;  %v8615_v59 = vld [vmem:[#allocation5 + $0x39] sm:$0xff]  ;;  %12405 = vmatprep.mubr.msk.f32.mxu0 (%p376_p11), %vm13434_vm7, %v13428_v1 }
 0x459   : >> { %12635 = vmatprep.subr.bf16.mxu1 %v15298_v17 }
 0x502   : >> { %v7547_v40 = vpop.f32.mrb[0].mxu0 }
 0x503   : >> { %7612 = vst [vmem:[#allocation4 + $0x60] sm:$0xff] %v7547_v40  ;;  %v12213_v9 = vpop.f32.mrb[1].mxu0  ;;  %v10366_v40 = vld [vmem:[%s15708_s5 + $0x68] sm:$0xff] }
 0x506   : >> { %v7552_v31 = vpop.f32.mrb[2].mxu0 }
 0x507   : >> { %7613 = vst [vmem:[#allocation4 + $0x68] sm:$0xff] %v7552_v31  ;;  %v12216_v10 = vpop.f32.mrb[3].mxu0  ;;  %v15326_v31 = vld [vmem:[#allocation5 + $0x10] sm:$0xff] }
 0x508   : >> { %v12642_v10 = vpack.c.bf16 %v10366_v40, %v10365_v47 }
 0x50a   : >> { %v7557_v18 = vpop.f32.mrb[4].mxu0  ;;  %v7671_v21 = vld [vmem:[#allocation4 + $0x5a] ss:$2 sm:$0x3f] }
 0x50b   : >> { %7614 = vst [vmem:[#allocation4 + $0x70] sm:$0xff] %v7557_v18  ;;  %v12219_v20 = vpop.f32.mrb[5].mxu0  ;;  %v7673_v33 = vld [vmem:[#allocation4 + $0x5b] ss:$2 sm:$0x3f]  ;;  %v15331_v18 = vld [vmem:[#allocation5 + $0x18] sm:$0xff] }
 0x50c   : >> { %v7674_v51 = vmax.f32 %v7671_v21, %v7673_v33  ;;  %v7960_v33 = vld [vmem:[#allocation5 + $0x2] sm:$0xff] }
 0x50e   : >> { %v7562_v8 = vpop.f32.mrb[6].mxu0 }
 0x50f   : >> { %7615 = vst [vmem:[#allocation4 + $0x78] sm:$0xff] %v7562_v8  ;;  %v12222_v45 = vpop.f32.mrb[7].mxu0  ;;  %v10368_v8 = vld [vmem:[%s15708_s5 + $0x78] sm:$0xff] }
 0x512   : >> { %v7567_v57 = vpop.f32.mrb[8].mxu0  ;;  %v7676_v15 = vld [vmem:[#allocation4 + $0x69] ss:$2 sm:$0x3f] }
 0x513   : >> { %7616 = vst [vmem:[#allocation4 + $0x80] sm:$0xff] %v7567_v57  ;;  %v7677_v63 = vmax.f32 %v7674_v51, %v7676_v15  ;;  %v12225_v13 = vpop.f32.mrb[9].mxu0  ;;  %v7679_v22 = vld [vmem:[#allocation4 + $0x6a] ss:$2 sm:$0x3f]  ;;  %v7961_v51 = vld [vmem:[#allocation5 + $0xa] sm:$0xff] }
 0x514   : >> { %v10375_v57 = vld [vmem:[%s15708_s5 + $0x80] sm:$0xff]  ;;  %v10376_v15 = vld [vmem:[%s15708_s5 + $0x88] sm:$0xff] }
 0x515   : >> { %v7680_v25 = vmax.f32 %v7677_v63, %v7679_v22  ;;  %v15357_v63 = vld [vmem:[#allocation5 + $0x12] sm:$0xff]  ;;  %v12650_v13 = vpack.c.bf16 %v10376_v15, %v10375_v57 }
 0x516   : >> { %v7572_v49 = vpop.f32.mrb[10].mxu0 }
 0x517   : >> { %7617 = vst [vmem:[#allocation4 + $0x88] sm:$0xff] %v7572_v49  ;;  %v12228_v16 = vpop.f32.mrb[11].mxu0  ;;  %v7681_v53 = vadd.f32 %v13586_v2, %v7680_v25 }
 0x518   : >> { %v10377_v16 = vld [vmem:[%s15708_s5 + $0x90] sm:$0xff] }
 0x519   : >> { %v7682_v39 = vmax.f32 %v7681_v53, 0.0  ;;  %v10378_v53 = vld [vmem:[%s15708_s5 + $0x98] sm:$0xff] }
 0x51a   : >> { %v7577_v41 = vpop.f32.mrb[12].mxu0  ;;  %v7685_v58 = vld [vmem:[#allocation4 + $0x78] ss:$2 sm:$0x3f] }
 0x51b   : >> { %7618 = vst [vmem:[#allocation4 + $0x90] sm:$0xff] %v7577_v41  ;;  %v12231_v7 = vpop.f32.mrb[13].mxu0  ;;  %7683 = vst [vmem:[#allocation5 + $0x21] sm:$0x3f] %v7682_v39  ;;  %v12654_v39 = vpack.c.bf16 %v10378_v53, %v10377_v16  ;;  %v10385_v41 = vld [vmem:[%s15708_s5 + $0xa0] sm:$0xff] }
 0x51c   : >> { %v7687_v60 = vld [vmem:[#allocation4 + $0x79] ss:$2 sm:$0x3f]  ;;  %v10386_v7 = vld [vmem:[%s15708_s5 + $0xa8] sm:$0xff] }
 0x51d   : >> { %v7688_v44 = vmax.f32 %v7685_v58, %v7687_v60  ;;  %v12658_v58 = vpack.c.bf16 %v10386_v7, %v10385_v41 }
 0x51e   : >> { %v7582_v5 = vpop.f32.mrb[14].mxu0 }
 0x51f   : >> { %7619 = vst [vmem:[#allocation4 + $0x98] sm:$0xff] %v7582_v5  ;;  %v12234_v54 = vpop.f32.mrb[15].mxu0  ;;  %v10387_v5 = vld [vmem:[%s15708_s5 + $0xb0] sm:$0xff] }
 0x520   : >> { %v10388_v54 = vld [vmem:[%s15708_s5 + $0xb8] sm:$0xff] }
 0x522   : >> { %v7690_v23 = vld [vmem:[#allocation4 + $0x87] ss:$2 sm:$0x3f]  ;;  %v7587_v27 = vpop.f32.mrb[16].mxu0  ;;  %v15302_v55 = vld [vmem:[#allocation5 + $0x21] sm:$0xff] }
 0x523   : >> { %v7691_v62 = vmax.f32 %v7688_v44, %v7690_v23  ;;  %v7693_v42 = vld [vmem:[#allocation4 + $0x88] ss:$2 sm:$0x3f]  ;;  %7620 = vst [vmem:[#allocation4 + $0xa0] sm:$0xff] %v7587_v27  ;;  %v12237_v24 = vpop.f32.mrb[17].mxu0  ;;  %12258 = vmatprep.mubr.msk.f32.mxu1 %vm7733_vm6, %v15302_v55  ;;  %v15335_v20 = vld [vmem:[#allocation5 + $0x20] sm:$0xff]  ;;  %v12662_v44 = vpack.c.bf16 %v10388_v54, %v10387_v5 }
 0x524   : >> { %v15361_v22 = vld [vmem:[#allocation5 + $0x1a] sm:$0xff]  ;;  %v10395_v23 = vld [vmem:[%s15708_s5 + $0xc0] sm:$0xff]  ;;  %v10398_v24 = vld [vmem:[%s15708_s5 + $0xd8] sm:$0xff] }
 0x525   : >> { %v7694_v34 = vmax.f32 %v7691_v62, %v7693_v42  ;;  %v10396_v62 = vld [vmem:[%s15708_s5 + $0xc8] sm:$0xff]  ;;  %v10397_v42 = vld [vmem:[%s15708_s5 + $0xd0] sm:$0xff]  ;;  %v8935_v54 = vld [vmem:[%s15710_s7] sm:$0xff] (%p376_p11) }
 0x526   : >> { %v7592_v35 = vpop.f32.mrb[18].mxu0  ;;  %v12666_v27 = vpack.c.bf16 %v10396_v62, %v10395_v23  ;;  %v10439_v5 = vld [vmem:[%s15710_s7 + $0x68] sm:$0xff] (%p376_p11)  ;;  %v12697_v62 = vpack.c.bf16 (%p376_p11), %v8936_v0, %v8935_v54  ;;  %v10437_v54 = vld [vmem:[%s15710_s7 + $0x58] sm:$0xff] (%p376_p11) }
 0x527   : >> { %v7695_v36 = vadd.f32 %v13586_v2, %v7694_v34  ;;  %7621 = vst [vmem:[#allocation4 + $0xa8] sm:$0xff] %v7592_v35  ;;  %v12240_v38 = vpop.f32.mrb[19].mxu0  ;;  %v12670_v34 = vpack.c.bf16 %v10398_v24, %v10397_v42  ;;  %v10405_v35 = vld [vmem:[%s15708_s5 + $0xe0] sm:$0xff] }
 0x529   : >> { %v7696_v4 = vmax.f32 %v7695_v36, 0.0  ;;  %v10406_v36 = vld [vmem:[%s15708_s5 + $0xe8] sm:$0xff] }
 0x52a   : >> { %v7597_v6 = vpop.f32.mrb[20].mxu0  ;;  %v7699_v52 = vld [vmem:[#allocation4 + $0x96] ss:$2 sm:$0x3f]  ;;  %v12674_v38 = vpack.c.bf16 %v10406_v36, %v10405_v35 }
 0x52b   : >> { %7697 = vst [vmem:[#allocation5 + $0x29] sm:$0x3f] %v7696_v4  ;;  %7622 = vst [vmem:[#allocation4 + $0xb0] sm:$0xf] %v7597_v6  ;;  %v12243_v29 = vpop.f32.mrb[21].mxu0  ;;  %v10407_v6 = vld [vmem:[%s15708_s5 + $0xf0] sm:$0xff] }
 0x52c   : >> { %v7701_v14 = vld [vmem:[#allocation4 + $0x97] ss:$2 sm:$0x3f]  ;;  %v10415_v29 = vld [vmem:[%s15708_s5 + $0x100] sm:$0xff] }
 0x52d   : >> { %v7702_v46 = vmax.f32 %v7699_v52, %v7701_v14  ;;  %v10408_v52 = vld [vmem:[%s15708_s5 + $0xf8] sm:$0xff] }
 0x52e   : >> { %v7704_v12 = vld [vmem:[#allocation4 + $0xa5] ss:$2 sm:$0x3f]  ;;  %v12678_v14 = vpack.c.bf16 %v10408_v52, %v10407_v6 }
 0x52f   : >> { %v7705_v48 = vmax.f32 %v7702_v46, %v7704_v12  ;;  %v10416_v12 = vld [vmem:[%s15708_s5 + $0x108] sm:$0xff] }
 0x530   : >> { %v12682_v46 = vpack.c.bf16 %v10416_v12, %v10415_v29 }
 0x532   : >> { %v7707_v11 = vld [vmem:[#allocation4 + $0xa6] ss:$2 sm:$0x3f]  ;;  %v15365_v25 = vld [vmem:[#allocation5 + $0x22] sm:$0xff] }
 0x533   : >> { %v15310_v19 = vld [vmem:[#allocation5 + $0x29] sm:$0xff]  ;;  %v7708_v37 = vmax.f32 %v7705_v48, %v7707_v11  ;;  %v8485_v48 = vld [vmem:[#allocation5 + $0x38] sm:$0xff] }
 0x534   : >> { %12259 = vmatmul.mubr.msk.f32.gmra.mrb[114].mxu1 %vm7733_vm6, %v15310_v19  ;;  %v15339_v21 = vld [vmem:[#allocation5 + $0x28] sm:$0xff] }
 0x535   : >> { %12269 = vmatprep.mubr.msk.f32.mxu1 %vm7733_vm6, %v7712_v61  ;;  %v7709_v56 = vadd.f32 %v13586_v2, %v7708_v37  ;;  %v10417_v61 = vld [vmem:[%s15708_s5 + $0x110] sm:$0xff] }
 0x536   : >> { %v12686_v11 = vpack.c.bf16 %v10418_v43, %v10417_v61  ;;  %v10440_v2 = vld [vmem:[%s15710_s7 + $0x70] sm:$0xff] (%p376_p11)  ;;  %v10445_v61 = vld [vmem:[%s15710_s7 + $0x88] sm:$0xff] (%p376_p11) }
 0x537   : >> { %v7710_v9 = vmax.f32 %v7709_v56, 0.0 }
 0x538   : >> { %12270 = vmatmul.mubr.msk.f32.vlgmr.msra.gmra.mrb[110].mxu1 %vm7733_vm6, %v7713_v32 }
 0x539   : >> { %12637 = vmatpush3.bf16.msra.mxu1 %v15298_v17  ;;  %12272 = vmatprep.mubr.msk.f32.mxu1 %vm7733_vm6, %v15326_v31  ;;  %7711 = vst [vmem:[#allocation5 + $0x31] sm:$0x3f] %v7710_v9  ;;  %v10367_v17 = vld [vmem:[%s15708_s5 + $0x70] sm:$0xff] }
 0x53a   : >> { %12639 = vmatprep.subr.bf16.mxu1 %v12638_v26  ;;  %v12646_v45 = vpack.c.bf16 %v10368_v8, %v10367_v17 }
 0x53c   : >> { %12273 = vmatmul.mubr.msk.f32.gmra.mrb[112].mxu1 %vm7733_vm6, %v15331_v18 }
 0x53d   : >> { %12275 = vmatprep.mubr.msk.f32.mxu1 %vm7733_vm6, %v15335_v20  ;;  %12641 = vmatpush3.bf16.msra.mxu1 %v12638_v26 }
 0x53e   : >> { %12643 = vmatprep.subr.bf16.mxu1 %v12642_v10 }
 0x540   : >> { %12276 = vmatmul.mubr.msk.f32.gmra.mrb[114].mxu1 %vm7733_vm6, %v15339_v21  ;;  %v15369_v49 = vld [vmem:[#allocation5 + $0x2a] sm:$0xff]  ;;  %v8355_v4 = vld [vmem:[#allocation5 + $0x32] sm:$0xff] }
 0x541   : >> { %12286 = vmatprep.mubr.msk.f32.mxu1 %vm7733_vm6, %v7960_v33  ;;  %v8095_v60 = vld [vmem:[#allocation5 + $0x30] sm:$0xff] }
 0x544   : >> { %12287 = vmatmul.mubr.msk.f32.vlgmr.msra.gmra.mrb[110].mxu1 %vm7733_vm6, %v7961_v51 }
 0x545   : >> { %12645 = vmatpush3.bf16.msra.mxu1 %v12642_v10  ;;  %12289 = vmatprep.mubr.msk.f32.mxu1 %vm7733_vm6, %v15357_v63 }
 0x546   : >> { %12647 = vmatprep.subr.bf16.mxu1 %v12646_v45 }
 0x548   : >> { %12290 = vmatmul.mubr.msk.f32.gmra.mrb[112].mxu1 %vm7733_vm6, %v15361_v22 }
 0x549   : >> { %12292 = vmatprep.mubr.msk.f32.mxu1 %vm7733_vm6, %v15365_v25  ;;  %12649 = vmatpush3.bf16.msra.mxu1 %v12646_v45 }
 0x54a   : >> { %12651 = vmatprep.subr.bf16.mxu1 %v12650_v13 }
 0x54c   : >> { %12293 = vmatmul.mubr.msk.f32.gmra.mrb[114].mxu1 %vm7733_vm6, %v15369_v49 }
 0x54d   : >> { %12303 = vmatprep.mubr.msk.f32.mxu1 %vm7733_vm6, %v7713_v32 }
 0x550   : >> { %12304 = vmatmul.mubr.msk.f32.vlgmr.msra.gmra.mrb[110].mxu1 %vm7733_vm6, %v15326_v31 }
 0x551   : >> { %12653 = vmatpush3.bf16.msra.mxu1 %v12650_v13  ;;  %12306 = vmatprep.mubr.msk.f32.mxu1 %vm7733_vm6, %v15331_v18 }
 0x552   : >> { %12655 = vmatprep.subr.bf16.mxu1 %v12654_v39 }
 0x554   : >> { %12307 = vmatmul.mubr.msk.f32.gmra.mrb[112].mxu1 %vm7733_vm6, %v15335_v20 }
 0x555   : >> { %12309 = vmatprep.mubr.msk.f32.mxu1 %vm7733_vm6, %v15339_v21  ;;  %12657 = vmatpush3.bf16.msra.mxu1 %v12654_v39 }
 0x556   : >> { %12659 = vmatprep.subr.bf16.mxu1 %v12658_v58 }
 0x558   : >> { %12310 = vmatmul.mubr.msk.f32.gmra.mrb[114].mxu1 %vm7733_vm6, %v8095_v60 }
 0x559   : >> { %12320 = vmatprep.mubr.msk.f32.mxu1 %vm7733_vm6, %v15125_v30  ;;  %v8225_v30 = vld [vmem:[#allocation5 + $0x31] sm:$0xff] }
 0x55c   : >> { %12321 = vmatmul.mubr.msk.f32.vlgmr.msra.gmra.mrb[110].mxu1 %vm7733_vm6, %v15138_v50 }
 0x55d   : >> { %12661 = vmatpush3.bf16.msra.mxu1 %v12658_v58  ;;  %12323 = vmatprep.mubr.msk.f32.mxu1 %vm7733_vm6, %v15146_v28 }
 0x55e   : >> { %12663 = vmatprep.subr.bf16.mxu1 %v12662_v44 }
 0x560   : >> { %12324 = vmatmul.mubr.msk.f32.gmra.mrb[112].mxu1 %vm7733_vm6, %v15302_v55 }
 0x561   : >> { %12326 = vmatprep.mubr.msk.f32.mxu1 %vm7733_vm6, %v15310_v19  ;;  %12665 = vmatpush3.bf16.msra.mxu1 %v12662_v44  ;;  %v13433_v44 = vmov (%p376_p11), 0.0|0.0  }
 0x562   : >> { %12667 = vmatprep.subr.bf16.mxu1 %v12666_v27  ;;  %12690 = vmatprep.subr.bf16.mxu0 (%p376_p11), %v13433_v44 }
 0x564   : >> { %12327 = vmatmul.mubr.msk.f32.gmra.mrb[114].mxu1 %vm7733_vm6, %v8225_v30 }
 0x565   : >> { %12337 = vmatprep.mubr.msk.f32.mxu1 %vm7733_vm6, %v7961_v51 }
 0x568   : >> { %12338 = vmatmul.mubr.msk.f32.vlgmr.msra.gmra.mrb[110].mxu1 %vm7733_vm6, %v15357_v63 }
 0x569   : >> { %12669 = vmatpush3.bf16.msra.mxu1 %v12666_v27  ;;  %12340 = vmatprep.mubr.msk.f32.mxu1 %vm7733_vm6, %v15361_v22  ;;  %v8937_v27 = vld [vmem:[%s15710_s7 + $0x10] sm:$0xff] (%p376_p11) }
 0x56a   : >> { %12671 = vmatprep.subr.bf16.mxu1 %v12670_v34 }
 0x56c   : >> { %12341 = vmatmul.mubr.msk.f32.gmra.mrb[112].mxu1 %vm7733_vm6, %v15365_v25 }
 0x56d   : >> { %12343 = vmatprep.mubr.msk.f32.mxu1 %vm7733_vm6, %v15369_v49  ;;  %12673 = vmatpush3.bf16.msra.mxu1 %v12670_v34 }
 0x56e   : >> { %12675 = vmatprep.subr.bf16.mxu1 %v12674_v38 }
 0x570   : >> { %12344 = vmatmul.mubr.msk.f32.gmra.mrb[114].mxu1 %vm7733_vm6, %v8355_v4 }
 0x571   : >> { %12354 = vmatprep.mubr.msk.f32.mxu1 %vm7733_vm6, %v15326_v31 }
 0x574   : >> { %12355 = vmatmul.mubr.msk.f32.vlgmr.msra.gmra.mrb[110].mxu1 %vm7733_vm6, %v15331_v18 }
 0x575   : >> { %12677 = vmatpush3.bf16.msra.mxu1 %v12674_v38  ;;  %12357 = vmatprep.mubr.msk.f32.mxu1 %vm7733_vm6, %v15335_v20 }
 0x576   : >> { %12679 = vmatprep.subr.bf16.mxu1 %v12678_v14 }
 0x578   : >> { %12358 = vmatmul.mubr.msk.f32.gmra.mrb[112].mxu1 %vm7733_vm6, %v15339_v21 }
 0x579   : >> { %12360 = vmatprep.mubr.msk.f32.mxu1 %vm7733_vm6, %v8095_v60  ;;  %12681 = vmatpush3.bf16.msra.mxu1 %v12678_v14  ;;  %v10438_v60 = vld [vmem:[%s15710_s7 + $0x60] sm:$0xff] (%p376_p11) }
 0x57a   : >> { %12683 = vmatprep.subr.bf16.mxu1 %v12682_v46  ;;  %v12691_v23 = vpack.c.bf16 (%p376_p11), %v10439_v5, %v10438_v60  ;;  %v10436_v5 = vld [vmem:[%s15710_s7 + $0x50] sm:$0xff] (%p376_p11) }
 0x57c   : >> { %12361 = vmatmul.mubr.msk.f32.gmra.mrb[114].mxu1 %vm7733_vm6, %v8485_v48  ;;  %12692 = vmatpush3.bf16.msra.mxu0 (%p376_p11), %v12691_v23  ;;  %v10444_v48 = vld [vmem:[%s15710_s7 + $0x80] sm:$0xff] (%p376_p11) }
 0x57d   : >> { %12371 = vmatprep.mubr.msk.f32.mxu1 %vm7733_vm6, %v15138_v50  ;;  %v8745_v50 = vld [vmem:[#allocation5 + $0x3a] sm:$0xff]  ;;  %12693 = vmatprep.subr.bf16.mxu0 (%p376_p11), %v13433_v44  ;;  %v12703_v43 = vpack.c.bf16 (%p376_p11), %v10445_v61, %v10444_v48  ;;  %v10459_v48 = vld [vmem:[%s15710_s7 + $0xd8] sm:$0xff] (%p376_p11) }
 0x580   : >> { %12372 = vmatmul.mubr.msk.f32.vlgmr.msra.gmra.mrb[110].mxu1 %vm7733_vm6, %v15146_v28 }
 0x581   : >> { %12685 = vmatpush3.bf16.msra.mxu1 %v12682_v46  ;;  %12374 = vmatprep.mubr.msk.f32.mxu1 %vm7733_vm6, %v15302_v55 }
 0x582   : >> { %12687 = vmatprep.subr.bf16.mxu1 %v12686_v11 }
 0x584   : >> { %12375 = vmatmul.mubr.msk.f32.gmra.mrb[112].mxu1 %vm7733_vm6, %v15310_v19 }
 0x585   : >> { %12377 = vmatprep.mubr.msk.f32.mxu1 %vm7733_vm6, %v8225_v30  ;;  %12689 = vmatpush3.bf16.msra.mxu1 %v12686_v11  ;;  %v8938_v30 = vld [vmem:[%s15710_s7 + $0x18] sm:$0xff] (%p376_p11)  ;;  %v10430_v11 = vld [vmem:[%s15710_s7 + $0x20] sm:$0xff] (%p376_p11) }
 0x586   : > { %12696 = vmatprep.subr.bf16.mxu1 (%p376_p11), %v13433_v44  ;;  %v12700_v36 = vpack.c.bf16 (%p376_p11), %v8938_v30, %v8937_v27 }
 0x588   : >> { %12378 = vmatmul.mubr.msk.f32.gmra.mrb[114].mxu1 %vm7733_vm6, %v8615_v59  ;;  %v10431_v59 = vld [vmem:[%s15710_s7 + $0x28] sm:$0xff] (%p376_p11) }
 0x589   : >> { %12388 = vmatprep.mubr.msk.f32.mxu1 %vm7733_vm6, %v15357_v63 }
 0x58c   : >> { %12389 = vmatmul.mubr.msk.f32.vlgmr.msra.gmra.mrb[110].mxu1 %vm7733_vm6, %v15361_v22 }
 0x58d   : >> { %12391 = vmatprep.mubr.msk.f32.mxu1 %vm7733_vm6, %v15365_v25  ;;  %12698 = vmatpush3.bf16.msra.mxu1 (%p376_p11), %v12697_v62 }
 0x58e   : > { %12699 = vmatprep.subr.bf16.mxu1 (%p376_p11), %v13433_v44 }
 0x590   : >> { %12392 = vmatmul.mubr.msk.f32.gmra.mrb[112].mxu1 %vm7733_vm6, %v15369_v49 }
 0x591   : >> { %12394 = vmatprep.mubr.msk.f32.mxu1 %vm7733_vm6, %v8355_v4  ;;  %12701 = vmatpush3.bf16.msra.mxu1 (%p376_p11), %v12700_v36 }
 0x592   : > { %12708 = vmatprep.subr.bf16.mxu1 (%p376_p11), %v13433_v44 }
 0x594   : >> { %12395 = vmatmul.mubr.msk.f32.gmra.mrb[114].mxu1 %vm7733_vm6, %v8745_v50  ;;  %v10446_v50 = vld [vmem:[%s15710_s7 + $0x90] sm:$0xff] (%p376_p11) }
 0x595   : > { %12416 = vmatprep.mubr.msk.f32.mxu1 (%p376_p11), %vm13434_vm7, %v13428_v1 }
 0x65f   : >> { %v12390_v28 = vpop.f32.mrb[110].mxu1 }
 0x660   : >> { %8871 = vst [vmem:[#allocation6 + $0x8] sm:$0xff] %v12390_v28  ;;  %v8835_v55 = vpop.f32.mrb[111].mxu1 }
 0x661   : >> { %8870 = vst [vmem:[#allocation6] sm:$0xff] %v8835_v55 }
 0x663   : >> { %v12393_v19 = vpop.f32.mrb[112].mxu1 }
 0x664   : >> { %8873 = vst [vmem:[#allocation6 + $0x18] sm:$0xff] %v12393_v19  ;;  %v8845_v37 = vpop.f32.mrb[113].mxu1  ;;  %v10447_v19 = vld [vmem:[%s15710_s7 + $0x98] sm:$0xff] (%p376_p11) }
 0x665   : >> { %8872 = vst [vmem:[#allocation6 + $0x10] sm:$0xff] %v8845_v37  ;;  %v10432_v37 = vld [vmem:[%s15710_s7 + $0x30] sm:$0xff] (%p376_p11) }
 0x667   : >> { %v12396_v47 = vpop.f32.mrb[114].mxu1  ;;  %v8881_v40 = vld [vmem:[#allocation6 + $0x8] ss:$2 sm:$0x7] }
 0x668   : >> { %v8876_v56 = vld [vmem:[#allocation6] ss:$2 sm:$0x7]  ;;  %v8878_v26 = vld [vmem:[#allocation6 + $0x1] ss:$2 sm:$0x7] }
 0x669   : >> { %v8879_v32 = vmax.f32 %v8876_v56, %v8878_v26  ;;  %8875 = vst [vmem:[#allocation6 + $0x28] sm:$0xff] %v12396_v47  ;;  %v8855_v9 = vpop.f32.mrb[115].mxu1  ;;  %v8884_v31 = vld [vmem:[#allocation6 + $0x9] ss:$2 sm:$0x7]  ;;  %v10433_v56 = vld [vmem:[%s15710_s7 + $0x38] sm:$0xff] (%p376_p11)  ;;  %v12709_v26 = vpack.c.bf16 (%p376_p11), %v10431_v59, %v10430_v11 }
 0x66a   : >> { %8874 = vst [vmem:[#allocation6 + $0x20] sm:$0xff] %v8855_v9 }
 0x66b   : >> { %v8882_v10 = vmax.f32 %v8879_v32, %v8881_v40  ;;  %v8902_v8 = vld [vmem:[#allocation6 + $0x18] ss:$2 sm:$0x7]  ;;  %v8905_v51 = vld [vmem:[#allocation6 + $0x19] ss:$2 sm:$0x7] }
 0x66c   : >> { %v8897_v18 = vld [vmem:[#allocation6 + $0x10] ss:$2 sm:$0x7]  ;;  %v8899_v20 = vld [vmem:[#allocation6 + $0x11] ss:$2 sm:$0x7] }
 0x66d   : >> { %v8885_v21 = vmax.f32 %v8882_v10, %v8884_v31  ;;  %v8900_v17 = vmax.f32 %v8897_v18, %v8899_v20  ;;  %v12706_v18 = vpack.c.bf16 (%p376_p11), %v10447_v19, %v10446_v50 }
 0x66f   : >> { %v8892_v33 = vadd.f32 %v13591_v3, %v8885_v21  ;;  %v8903_v45 = vmax.f32 %v8900_v17, %v8902_v8 }
 0x670   : >> { %v8918_v16 = vld [vmem:[#allocation6 + $0x28] ss:$2 sm:$0x7]  ;;  %v8921_v39 = vld [vmem:[#allocation6 + $0x29] ss:$2 sm:$0x7] }
 0x671   : >> { %v8893_v57 = vmax.f32 %v8892_v33, 0.0  ;;  %v8906_v15 = vmax.f32 %v8903_v45, %v8905_v51  ;;  %v8913_v63 = vld [vmem:[#allocation6 + $0x20] ss:$2 sm:$0x7]  ;;  %v12712_v45 = vpack.c.bf16 (%p376_p11), %v10433_v56, %v10432_v37  ;;  %v10463_v37 = vld [vmem:[%s15710_s7 + $0xf0] sm:$0xff] (%p376_p11) }
 0x672   : >> { %v8915_v22 = vld [vmem:[#allocation6 + $0x21] ss:$2 sm:$0x7] }
 0x673   : >> { %8895 = vst [vmem:[%s8894_s14] sm:$0x7] %v8893_v57  ;;  %v8907_v13 = vadd.f32 %v13591_v3, %v8906_v15  ;;  %v8916_v25 = vmax.f32 %v8913_v63, %v8915_v22  ;;  %v10450_v57 = vld [vmem:[%s15710_s7 + $0xa0] sm:$0xff] (%p376_p11)  ;;  %v10451_v15 = vld [vmem:[%s15710_s7 + $0xa8] sm:$0xff] (%p376_p11)  ;;  %v10464_v56 = vld [vmem:[%s15710_s7 + $0xf8] sm:$0xff] (%p376_p11) }
 0x674   : > { %v10434_v22 = vld [vmem:[%s15710_s7 + $0x40] sm:$0xff] (%p376_p11) }
 0x675   : >> { %v8908_v49 = vmax.f32 %v8907_v13, 0.0  ;;  %v8919_v53 = vmax.f32 %v8916_v25, %v8918_v16  ;;  %v10435_v25 = vld [vmem:[%s15710_s7 + $0x48] sm:$0xff] (%p376_p11)  ;;  %v10452_v16 = vld [vmem:[%s15710_s7 + $0xb0] sm:$0xff] (%p376_p11) }
 0x676   : > { %v12721_v60 = vpack.c.bf16 (%p376_p11), %v10435_v25, %v10434_v22 }
 0x677   : >> { %10427 = vst [vmem:[%s8894_s14 + $0x3] sm:$0x7] %v8908_v49  ;;  %v8922_v41 = vmax.f32 %v8919_v53, %v8921_v39  ;;  %378 = sbr.rel (!%p376_p11) target bundleno = 35 (0x23), region = 278  ;;  %v12715_v49 = vpack.c.bf16 (%p376_p11), %v10451_v15, %v10450_v57  ;;  %v10453_v53 = vld [vmem:[%s15710_s7 + $0xb8] sm:$0xff] (%p376_p11)  ;;  %v10468_v57 = vld [vmem:[%s15710_s7 + $0x110] sm:$0xff] (%p376_p11) }
 0x678   : > { %v12718_v62 = vpack.c.bf16 (%p376_p11), %v10453_v53, %v10452_v16  ;;  %v10469_v15 = vld [vmem:[%s15710_s7 + $0x118] sm:$0xff] (%p376_p11) }
 0x679   : >> { %v8923_v7 = vadd.f32 %v13591_v3, %v8922_v41  ;;  %v10441_v3 = vld [vmem:[%s15710_s7 + $0x78] sm:$0xff] (%p376_p11) }
 0x67a   : > { %v12694_v24 = vpack.c.bf16 (%p376_p11), %v10441_v3, %v10440_v2 }
 0x67b   : >> { %v8924_v58 = vmax.f32 %v8923_v7, 0.0 }
 0x67c   : > { %12695 = vmatpush3.bf16.msra.mxu0 (%p376_p11), %v12694_v24  ;;  %v10456_v24 = vld [vmem:[%s15710_s7 + $0xc0] sm:$0xff] (%p376_p11) }
 0x67d   : >> { %10429 = vst [vmem:[%s8894_s14 + $0x6] sm:$0x7] %v8924_v58  ;;  %12702 = vmatprep.subr.bf16.mxu0 (%p376_p11), %v13433_v44  ;;  %s13356_s14 = scalar_lea.vmem (%p376_p11), %s15659_s27, 128 }
 0x67e   : > { %p13357_p12 = scmp.ne.s32.totalorder %s15659_s27, %s13356_s14  ;;  %p13364_p2 = scmp.lt.s32.totalorder %s13362_s17, %s13356_s14 }
 0x680   : > { %p13358_p13 = pnand %p13357_p12, %p13524_p5  ;;  %p13365_p3 = por %p13364_p2, %p13363_p1 }
 0x682   : > { %p13359_p0 = pneg %p13358_p13 }
 0x684   : > { %v8966_v42 = vld [vmem:[#allocation7 + $0x3] ss:$16 sm:$0x3]  ;;  %v8928_v6 = vld [vmem:[#allocation7] ss:$16 sm:$0x3]  ;;  %p13366_p4 = pnand %p13365_p3, %p13359_p0 }
 0x685   : > { %v8967_v34 = vld [vmem:[#allocation7 + $0x3] ss:$16 sm:$0xc]  ;;  %v8929_v52 = vld [vmem:[#allocation7] ss:$16 sm:$0xc] }
 0x686   : > { %v8969_v35 = vld [vmem:[#allocation7 + $0x3] ss:$16 sm:$0x30]  ;;  %v8968_v38 = vor.u32 %v8967_v34, %v8966_v42  ;;  %v8931_v14 = vld [vmem:[#allocation7] ss:$16 sm:$0x30]  ;;  %v8930_v12 = vor.u32 %v8929_v52, %v8928_v6 }
 0x687   : > { %v8971_v4 = vld [vmem:[#allocation7 + $0x3] ss:$16 sm:$0xc0]  ;;  %v8933_v46 = vld [vmem:[#allocation7] ss:$16 sm:$0xc0] }
 0x688   : > { %v8970_v29 = vor.u32 %v8969_v35, %v8968_v38  ;;  %v8932_v55 = vor.u32 %v8931_v14, %v8930_v12  ;;  %v9126_v32 = vld [vmem:[#allocation7 + $0x4] ss:$16 sm:$0x3]  ;;  %v8940_v20 = vld [vmem:[#allocation7 + $0x1] ss:$16 sm:$0x3]  ;;  %v12724_v35 = vpack.c.bf16 %v10437_v54, %v10436_v5 }
 0x689   : > { %v9127_v47 = vld [vmem:[#allocation7 + $0x4] ss:$16 sm:$0xc]  ;;  %v8941_v21 = vld [vmem:[#allocation7 + $0x1] ss:$16 sm:$0xc] }
 0x68a   : > { %v8972_v28 = vor.u32 %v8971_v4, %v8970_v29  ;;  %v8934_v40 = vor.u32 %v8933_v46, %v8932_v55  ;;  %v9128_v9 = vor.u32 %v9127_v47, %v9126_v32  ;;  %v9129_v31 = vld [vmem:[#allocation7 + $0x4] ss:$16 sm:$0x30]  ;;  %v8942_v8 = vor.u32 %v8941_v21, %v8940_v20  ;;  %v8943_v33 = vld [vmem:[#allocation7 + $0x1] ss:$16 sm:$0x30] }
 0x68b   : > { %v9131_v10 = vld [vmem:[#allocation7 + $0x4] ss:$16 sm:$0xc0]  ;;  %v8945_v51 = vld [vmem:[#allocation7 + $0x1] ss:$16 sm:$0xc0]  ;;  %v12736_v20 = vpack.c.bf16 %v10464_v56, %v10463_v37 }
 0x68c   : > { %12406 = vmatmul.mubr.msk.f32.vlgmr.msra.gmra.mrb[0].mxu0 %vm7733_vm6, %v8972_v28  ;;  %12417 = vmatmul.mubr.msk.f32.vlgmr.msra.gmra.mrb[0].mxu1 %vm7733_vm6, %v8934_v40  ;;  %v9130_v17 = vor.u32 %v9129_v31, %v9128_v9  ;;  %v8944_v13 = vor.u32 %v8943_v33, %v8942_v8  ;;  %v9285_v39 = vld [vmem:[#allocation7 + $0x5] ss:$16 sm:$0x3]  ;;  %v8953_v0 = vld [vmem:[#allocation7 + $0x2] ss:$16 sm:$0x3] }
 0x68d   : > { %12704 = vmatpush3.bf16.msra.mxu0 %v12703_v43  ;;  %12427 = vmatprep.mubr.msk.f32.mxu0 %vm13434_vm7, %v13428_v1  ;;  %v9286_v7 = vld [vmem:[#allocation7 + $0x5] ss:$16 sm:$0xc]  ;;  %v8954_v2 = vld [vmem:[#allocation7 + $0x2] ss:$16 sm:$0xc] }
 0x68e   : > { %12705 = vmatprep.subr.bf16.mxu0 %v13433_v44  ;;  %12710 = vmatpush3.bf16.msra.mxu1 %v12709_v26  ;;  %v9132_v63 = vor.u32 %v9131_v10, %v9130_v17  ;;  %v8946_v41 = vor.u32 %v8945_v51, %v8944_v13  ;;  %v9288_v58 = vld [vmem:[#allocation7 + $0x5] ss:$16 sm:$0x30]  ;;  %v9287_v23 = vor.u32 %v9286_v7, %v9285_v39  ;;  %v8956_v3 = vld [vmem:[#allocation7 + $0x2] ss:$16 sm:$0x30] }
 0x68f   : > { %12438 = vmatprep.mubr.msk.f32.mxu1 %vm13434_vm7, %v13428_v1  ;;  %12711 = vmatprep.subr.bf16.mxu1 %v13433_v44  ;;  %v9290_v30 = vld [vmem:[#allocation7 + $0x5] ss:$16 sm:$0xc0]  ;;  %v8955_v42 = vor.u32 %v8954_v2, %v8953_v0  ;;  %v8958_v38 = vld [vmem:[#allocation7 + $0x2] ss:$16 sm:$0xc0]  ;;  %v12742_v13 = vpack.c.bf16 %v10469_v15, %v10468_v57 }
 0x690   : > { %v9289_v27 = vor.u32 %v9288_v58, %v9287_v23  ;;  %v10457_v34 = vld [vmem:[%s15710_s7 + $0xc8] sm:$0xff]  ;;  %v10461_v4 = vld [vmem:[%s15710_s7 + $0xe0] sm:$0xff]  ;;  %v10458_v46 = vld [vmem:[%s15710_s7 + $0xd0] sm:$0xff] }
 0x691   : > { %12707 = vmatpush3.bf16.msra.mxu0 %v12706_v18  ;;  %v8957_v36 = vor.u32 %v8956_v3, %v8955_v42  ;;  %v10462_v6 = vld [vmem:[%s15710_s7 + $0xe8] sm:$0xff]  ;;  %v12727_v12 = vpack.c.bf16 %v10457_v34, %v10456_v24  ;;  %v12730_v32 = vpack.c.bf16 %v10459_v48, %v10458_v46  ;;  %v9618_v40 = vld [vmem:[#allocation7 + $0x8] ss:$16 sm:$0x3] }
 0x692   : > { %12714 = vmatprep.subr.bf16.mxu0 %v13433_v44  ;;  %12713 = vmatpush3.bf16.msra.mxu1 %v12712_v45  ;;  %v9291_v52 = vor.u32 %v9290_v30, %v9289_v27  ;;  %v9444_v14 = vld [vmem:[#allocation7 + $0x6] ss:$16 sm:$0x3]  ;;  %v9531_v59 = vld [vmem:[#allocation7 + $0x7] ss:$16 sm:$0x3]  ;;  %v12733_v28 = vpack.c.bf16 %v10462_v6, %v10461_v4 }
 0x693   : > { %12720 = vmatprep.subr.bf16.mxu1 %v13433_v44  ;;  %v9445_v29 = vld [vmem:[#allocation7 + $0x6] ss:$16 sm:$0xc]  ;;  %v8959_v11 = vor.u32 %v8958_v38, %v8957_v36  ;;  %v9532_v50 = vld [vmem:[#allocation7 + $0x7] ss:$16 sm:$0xc] }
 0x694   : > { %12428 = vmatmul.mubr.msk.f32.vlgmr.msra.gmra.mrb[2].mxu0 %vm7733_vm6, %v9132_v63  ;;  %v9446_v61 = vor.u32 %v9445_v29, %v9444_v14  ;;  %v9447_v43 = vld [vmem:[#allocation7 + $0x6] ss:$16 sm:$0x30]  ;;  %v9533_v55 = vor.u32 %v9532_v50, %v9531_v59  ;;  %v9534_v19 = vld [vmem:[#allocation7 + $0x7] ss:$16 sm:$0x30] }
 0x695   : > { %12716 = vmatpush3.bf16.msra.mxu0 %v12715_v49  ;;  %12449 = vmatprep.mubr.msk.f32.mxu0 %vm13434_vm7, %v13428_v1  ;;  %v9449_v47 = vld [vmem:[#allocation7 + $0x6] ss:$16 sm:$0xc0]  ;;  %v10466_v31 = vld [vmem:[%s15710_s7 + $0x100] sm:$0xff] }
 0x696   : > { %12439 = vmatmul.mubr.msk.f32.vlgmr.msra.gmra.mrb[2].mxu1 %vm7733_vm6, %v8946_v41  ;;  %12717 = vmatprep.subr.bf16.mxu0 %v13433_v44  ;;  %v9448_v26 = vor.u32 %v9447_v43, %v9446_v61  ;;  %v9535_v9 = vor.u32 %v9534_v19, %v9533_v55  ;;  %v10467_v10 = vld [vmem:[%s15710_s7 + $0x108] sm:$0xff]  ;;  %v9619_v18 = vld [vmem:[#allocation7 + $0x8] ss:$16 sm:$0xc] }
 0x697   : > { %12722 = vmatpush3.bf16.msra.mxu1 %v12721_v60  ;;  %12460 = vmatprep.mubr.msk.f32.mxu1 %vm13434_vm7, %v13428_v1  ;;  %v9536_v21 = vld [vmem:[#allocation7 + $0x7] ss:$16 sm:$0xc0]  ;;  %v9620_v8 = vor.u32 %v9619_v18, %v9618_v40  ;;  %v12739_v33 = vpack.c.bf16 %v10467_v10, %v10466_v31  ;;  %v9621_v45 = vld [vmem:[#allocation7 + $0x8] ss:$16 sm:$0x30] }
 0x698   : > { %12723 = vmatprep.subr.bf16.mxu1 %v13433_v44  ;;  %v9450_v17 = vor.u32 %v9449_v47, %v9448_v26  ;;  %v9537_v51 = vor.u32 %v9536_v21, %v9535_v9  ;;  %v9623_v22 = vld [vmem:[#allocation7 + $0x8] ss:$16 sm:$0xc0] }
 0x699   : > { %12719 = vmatpush3.bf16.msra.mxu0 %v12718_v62  ;;  %v9622_v63 = vor.u32 %v9621_v45, %v9620_v8  ;;  %v10471_v4 = vld [vmem:[%s15711_s8] ss:$0 sm:$0xff] }
 0x69a   : > { %12726 = vmatprep.subr.bf16.mxu0 %v13433_v44 }
 0x69b   : > { %12725 = vmatpush3.bf16.msra.mxu1 %v12724_v35  ;;  %v9624_v25 = vor.u32 %v9623_v22, %v9622_v63 }
 0x69c   : > { %12450 = vmatmul.mubr.msk.f32.vlgmr.msra.gmra.mrb[4].mxu0 %vm7733_vm6, %v9291_v52  ;;  %12732 = vmatprep.subr.bf16.mxu1 %v13433_v44 }
 0x69d   : > { %12728 = vmatpush3.bf16.msra.mxu0 %v12727_v12  ;;  %12471 = vmatprep.mubr.msk.f32.mxu0 %vm13434_vm7, %v13428_v1 }
 0x69e   : > { %12461 = vmatmul.mubr.msk.f32.vlgmr.msra.gmra.mrb[4].mxu1 %vm7733_vm6, %v8959_v11  ;;  %12729 = vmatprep.subr.bf16.mxu0 %v13433_v44 }
 0x69f   : > { %12734 = vmatpush3.bf16.msra.mxu1 %v12733_v28  ;;  %12482 = vmatprep.mubr.msk.f32.mxu1 %vm13434_vm7, %v13428_v1 }
 0x6a0   : > { %12735 = vmatprep.subr.bf16.mxu1 %v13433_v44 }
 0x6a1   : > { %12731 = vmatpush3.bf16.msra.mxu0 %v12730_v32 }
 0x6a2   : > { %12738 = vmatprep.subr.bf16.mxu0 %v13433_v44 }
 0x6a3   : > { %12737 = vmatpush3.bf16.msra.mxu1 %v12736_v20 }
 0x6a4   : > { %12472 = vmatmul.mubr.msk.f32.vlgmr.msra.gmra.mrb[6].mxu0 %vm7733_vm6, %v9450_v17 }
 0x6a5   : > { %12740 = vmatpush3.bf16.msra.mxu0 %v12739_v33  ;;  %12493 = vmatprep.mubr.msk.f32.mxu0 %vm13434_vm7, %v13428_v1 }
 0x6a6   : > { %12483 = vmatmul.mubr.msk.f32.vlgmr.msra.gmra.mrb[6].mxu1 %vm7733_vm6, %v9537_v51  ;;  %12741 = vmatprep.subr.bf16.mxu0 %v13433_v44 }
 0x6a9   : > { %12743 = vmatpush3.bf16.msra.mxu0 %v12742_v13 }
 0x6ac   : > { %12494 = vmatmul.mubr.msk.f32.vlgmr.msra.gmra.mrb[8].mxu0 %vm7733_vm6, %v9624_v25 }
 0x75f   : > { %v9048_v49 = vpop.f32.mrb[0].mxu0  ;;  %v9121_v53 = vpop.f32.mrb[0].mxu1 }
 0x760   : > { %v12407_v16 = vpop.f32.mrb[1].mxu0  ;;  %v9122_v39 = vadd.f32 %v9121_v53, %v9048_v49  ;;  %v12418_v41 = vpop.f32.mrb[1].mxu1 }
 0x767   : > { %v9207_v7 = vpop.f32.mrb[2].mxu0 }
 0x768   : > { %v12429_v58 = vpop.f32.mrb[3].mxu0 }
 0x769   : > { %v9280_v60 = vpop.f32.mrb[2].mxu1 }
 0x76a   : > { %v9281_v5 = vadd.f32 %v9280_v60, %v9207_v7  ;;  %v12440_v54 = vpop.f32.mrb[3].mxu1 }
 0x76f   : > { %v9366_v1 = vpop.f32.mrb[4].mxu0 }
 0x770   : > { %v12451_v23 = vpop.f32.mrb[5].mxu0 }
 0x771   : > { %v9439_v0 = vpop.f32.mrb[4].mxu1 }
 0x772   : > { %v9440_v44 = vadd.f32 %v9439_v0, %v9366_v1  ;;  %v12462_v2 = vpop.f32.mrb[5].mxu1 }
 0x777   : > { %v9525_v3 = vpop.f32.mrb[6].mxu0 }
 0x778   : > { %v9529_v62 = vadd.f32 %v9525_v3, %v9122_v39  ;;  %v12473_v27 = vpop.f32.mrb[7].mxu0 }
 0x779   : > { %v9612_v30 = vpop.f32.mrb[6].mxu1 }
 0x77a   : > { %v9616_v42 = vadd.f32 %v9612_v30, %v9281_v5  ;;  %v12484_v24 = vpop.f32.mrb[7].mxu1 }
 0x77c   : > { %v9704_v34 = vadd.f32 %v9616_v42, %v9529_v62 }
 0x77f   : > { %v9699_v35 = vpop.f32.mrb[8].mxu0 }
 0x780   : > { %v9703_v36 = vadd.f32 %v9699_v35, %v9440_v44  ;;  %v12495_v38 = vpop.f32.mrb[9].mxu0 }
 0x782   : > { %v9705_v6 = vadd.f32 %v9704_v34, %v9703_v36 }
 0x784   : > { %v9713_v52 = vadd.f32 %v10471_v4, %v9705_v6 }
 0x786   : > { %9714 = vst [vmem:[%s15719_s23] sm:$0xff] %v9713_v52 }
 0x787   : > { %13369 = shalt.err (!%p13366_p4)
}
 0x788   : > { %s13370_s25 = scalar_lea.hbm %s15657_s0, 128  ;;  %s13374_s28 = scalar_lea.hbm %s15712_s9, 256 }
 0x789   : > { %p13371_p7 = scmp.ne.s32.totalorder %s15657_s0, %s13370_s25  ;;  %p13375_p10 = scmp.lt.u32.totalorder %s15657_s0, %s15712_s9 }
 0x78a   : > { %p13376_p11 = scmp.lt.u32.totalorder %s13374_s28, %s13370_s25  ;;  %p13378_p13 = scmp.lt.u32.totalorder %s13370_s25, %s15657_s0 }
 0x78b   : > { %p13372_p8 = pnand %p13371_p7, %p13524_p5 }
 0x78c   : > { %p13377_p12 = por %p13376_p11, %p13375_p10 }
 0x78d   : > { %p13373_p9 = pneg %p13372_p8 }
 0x78e   : > { %p13379_p0 = por %p13378_p13, %p13377_p12 }
 0x790   : > { %p13380_p1 = pnand %p13379_p0, %p13373_p9 }
 0x792   : > { %13383 = shalt.err (!%p13380_p1)
}
 0x793   : > { %13302 = dma.vmem_to_hbm [thread:$0]  (%p13524_p5), %s15659_s27, 128, %s15657_s0, %s9716_s29  }
 0x794 PF: > { %p13308_p2 = scmp.ge.s32.totalorder %s13422_s12, 2  ;;  %s9741_s24 = sand.u32 1, %s13410_s30  }
 0x795   : > { %s9742_s14 = scalar_lea.sflag [#allocation9], %s9741_s24 }
 0x796   : > { %p13305_p3 = pnand %p13308_p2, %p13528_p6 }
 0x798   : > { %13405 = dma.done.wait (!%p13305_p3), %s9742_s14, 128  }
 0x799   : > { %13407 = vsyncadd (!%p13305_p3), %s9742_s14, 4294967168  ;;  %p19_p4 = scmp.ge.s32.totalorder %s13511_s15, 4   ;;  %s15721_s30 = smov %s13414_s10 }
 0x79a   : > { %s15722_s10 = smov %s13418_s11  ;;  %s15723_s11 = smov %s13522_s18 }
 0x79b   : > { %s15724_s12 = smov %s13511_s15  ;;  %21 = sbr.rel (!%p19_p4) target bundleno = 5 (0x5), region = 289 }
 0x7a2   :  { %9747 = vsyncpa [#allocation9], 1 }
 0x7a3   :  { %9749 = vsyncpa [#allocation9 + $0x1], 1 }

</bundles_post_ra>
